<compile_context>
chip_gen: v7x
topology: tpu7x:2x2x1
jax: 0.10.0
libtpu: 0.0.40
codegen_flags: <defaults>
</compile_context>

<pallas_src>
import functools

import jax
import jax.numpy as jnp
from jax.experimental import pallas as pl
from jax.experimental.pallas import tpu as pltpu


H = 512          # hidden width
OUT = 784        # 28*28
OUT_PAD = 896    # 7*128, lane-dense padded output width


def _round_up(x, m):
    return (x + m - 1) // m * m


# -----------------------------------------------------------------------------
# Kernel
# -----------------------------------------------------------------------------
def _decoder_kernel(z_ref, w1_ref, b1_ref, w2_ref, b2_ref, w3_ref, b3_ref,
                    logits_ref, probs_ref=None):
    """Fused 3-layer MLP on one batch tile.

    z (TB, M) bf16 @ w1 (M,512) bf16 -> +b1, ReLU
              @ w2 (512,512) bf16   -> +b2, ReLU
              @ w3 (512,896) bf16   -> +b3 -> logits (TB,896)
    All matmuls accumulate in f32 on the MXU. Optional second output:
    probs = sigmoid(logits) (Bernoulli mean), computed on the EUP.
    """
    z = z_ref[...]                                               # bf16 already

    h1 = jnp.dot(z, w1_ref[...], preferred_element_type=jnp.float32)
    h1 = jnp.maximum(h1 + b1_ref[...], 0.0).astype(jnp.bfloat16)

    h2 = jnp.dot(h1, w2_ref[...], preferred_element_type=jnp.float32)
    h2 = jnp.maximum(h2 + b2_ref[...], 0.0).astype(jnp.bfloat16)

    logits = jnp.dot(h2, w3_ref[...], preferred_element_type=jnp.float32)
    logits = logits + b3_ref[...]
    logits_ref[...] = logits.astype(logits_ref.dtype)

    if probs_ref is not None:                                    # static branch
        probs_ref[...] = (1.0 / (1.0 + jnp.exp(-logits))).astype(probs_ref.dtype)


# -----------------------------------------------------------------------------
# Parameter preparation (do this ONCE, not per forward call)
# -----------------------------------------------------------------------------
def prepare_decoder_params(params):
    """Pre-cast / pre-pad decoder weights for the kernel (cacheable)."""
    if params.get("_prepared", False):
        return params
    w1 = params["w1"].astype(jnp.bfloat16)                                   # (M, 512)
    w2 = params["w2"].astype(jnp.bfloat16)                                   # (512, 512)
    w3 = jnp.pad(params["w3"], ((0, 0), (0, OUT_PAD - OUT))).astype(jnp.bfloat16)  # (512, 896)
    b1 = params["b1"].reshape(1, H).astype(jnp.float32)
    b2 = params["b2"].reshape(1, H).astype(jnp.float32)
    b3 = jnp.pad(params["b3"], (0, OUT_PAD - OUT)).reshape(1, OUT_PAD).astype(jnp.float32)
    return {"w1": w1, "b1": b1, "w2": w2, "b2": b2, "w3": w3, "b3": b3,
            "_prepared": True}


# -----------------------------------------------------------------------------
# Wrapper
# -----------------------------------------------------------------------------
def _pick_tile(B, block_b, min_blocks):
    """Batch tile (multiple of 8) and padded batch; ensure >= min_blocks steps."""
    B8 = _round_up(max(B, 8), 8)
    tb = max(8, min(_round_up(block_b, 8), B8))
    while min_blocks > 1 and (_round_up(B8, tb) // tb) < min_blocks and tb > 8:
        tb = max(8, _round_up(tb // 2, 8))
    B_pad = _round_up(B8, tb)
    return tb, B_pad


def _build_call(tb, M, n_blocks, B_pad, emit_probs, logits_dtype,
                single_buffer_weights):
    if single_buffer_weights:
        const = lambda shape: pl.BlockSpec(shape, lambda i: (0, 0),
                                           pipeline_mode=pl.Buffered(1))
    else:
        const = lambda shape: pl.BlockSpec(shape, lambda i: (0, 0))

    out_tile = pl.BlockSpec((tb, OUT_PAD), lambda i: (i, 0))
    if emit_probs:
        out_specs = [out_tile, out_tile]
        out_shape = (jax.ShapeDtypeStruct((B_pad, OUT_PAD), logits_dtype),
                     jax.ShapeDtypeStruct((B_pad, OUT_PAD), jnp.float32))
    else:
        out_specs = out_tile
        out_shape = jax.ShapeDtypeStruct((B_pad, OUT_PAD), logits_dtype)

    return pl.pallas_call(
        _decoder_kernel,
        grid=(n_blocks,),
        in_specs=[
            pl.BlockSpec((tb, M), lambda i: (i, 0)),          # z tile (double-buffered)
            const((M, H)), const((1, H)),                     # w1, b1  (VMEM-resident)
            const((H, H)), const((1, H)),                     # w2, b2
            const((H, OUT_PAD)), const((1, OUT_PAD)),         # w3, b3
        ],
        out_specs=out_specs,
        out_shape=out_shape,
        compiler_params=pltpu.CompilerParams(
            dimension_semantics=("parallel",)),
    )


def bernoulli_decoder_forward(z, params, *, block_b=None, return_probs=False,
                              logits_dtype=jnp.float32, return_padded=False):
    """Runs the decoder net as a batch-tiled Pallas kernel.

    Args:
      z: (B, M) latents (f32 or bf16).
      params: raw {w1,b1,w2,b2,w3,b3[,std]} dict or output of
        prepare_decoder_params (preferred: prepare once, reuse).
      block_b: target batch tile (multiple of 8). Default: 1024 (512 when
        return_probs=True, so two f32 output tiles fit v5e's default VMEM).
      return_probs: also emit sigmoid(logits) from the kernel.
      logits_dtype: jnp.float32 (default, matches PyTorch) or jnp.bfloat16 to
        halve output writeback on HBM-bound parts (v6e).
      return_padded: return the (B_pad, 896) kernel output(s) directly and skip
        the wrapper slice/reshape (saves a full HBM pass under jit; caller
        slices [:B, :784] lazily).

    Returns:
      logits (B, 28, 28) [, probs (B, 28, 28)]  — parameters / mean of the
      Independent(Bernoulli, 2) decoder distribution. Padded shapes if
      return_padded=True.
    """
    B, M = z.shape
    if block_b is None:
        block_b = 512 if return_probs else 1024

    prepped = prepare_decoder_params(params)
    w1, b1 = prepped["w1"], prepped["b1"]
    w2, b2 = prepped["w2"], prepped["b2"]
    w3, b3 = prepped["w3"], prepped["b3"]

    # >= 2 grid steps for B >= 16 so the two v7x TensorCores both get work.
    min_blocks = 2 if B >= 16 else 1
    tb, B_pad = _pick_tile(B, block_b, min_blocks)
    n_blocks = B_pad // tb

    # Cast z to bf16 once here (no per-tile cast in-kernel); pad batch.
    z_pad = jnp.pad(z.astype(jnp.bfloat16), ((0, B_pad - B), (0, 0)))

    args = (z_pad, w1, b1, w2, b2, w3, b3)
    try:
        call = _build_call(tb, M, n_blocks, B_pad, return_probs, logits_dtype,
                           single_buffer_weights=True)
        outs = call(*args)
    except Exception:
        # Fallback if single-buffered (pl.Buffered(1)) constant specs are
        # rejected by this jax/Mosaic version; identical semantics.
        call = _build_call(tb, M, n_blocks, B_pad, return_probs, logits_dtype,
                           single_buffer_weights=False)
        outs = call(*args)

    if return_probs:
        logits_pad, probs_pad = outs
    else:
        logits_pad, probs_pad = outs, None

    if return_padded:
        # Consumer slices [:B, :OUT] lazily / fuses with downstream log-prob.
        return (logits_pad, probs_pad) if return_probs else logits_pad

    # nn.Unflatten(-1, (28, 28)) is layout glue; note this slice is an extra
    # HBM pass under jit — prefer return_padded=True in hot paths.
    logits = logits_pad[:B, :OUT].reshape(B, 28, 28)
    if return_probs:
        probs = probs_pad[:B, :OUT].reshape(B, 28, 28)
        return logits, probs
    return logits


# -----------------------------------------------------------------------------
# Init + references
# -----------------------------------------------------------------------------
def init_params(key, M):
    """Deterministic init matching the PyTorch layer shapes (uniform ±1/sqrt(fan_in))."""
    ks = jax.random.split(key, 6)

    def lin(kw, kb, fan_in, fan_out):
        bound = 1.0 / jnp.sqrt(jnp.float32(fan_in))
        w = jax.random.uniform(kw, (fan_in, fan_out), jnp.float32, -bound, bound)
        b = jax.random.uniform(kb, (fan_out,), jnp.float32, -bound, bound)
        return w, b

    w1, b1 = lin(ks[0], ks[1], M, H)
    w2, b2 = lin(ks[2], ks[3], H, H)
    w3, b3 = lin(ks[4], ks[5], H, OUT)
    # self.std = nn.Parameter(torch.ones(28, 28) * 0.5) — unused in forward().
    std = jnp.ones((28, 28), jnp.float32) * 0.5
    return {"w1": w1, "b1": b1, "w2": w2, "b2": b2, "w3": w3, "b3": b3, "std": std}


def _reference_forward_bf16(z, params):
    """Reference with the same bf16 weight/activation casts as the kernel."""
    w1 = params["w1"].astype(jnp.bfloat16)
    w2 = params["w2"].astype(jnp.bfloat16)
    w3 = params["w3"].astype(jnp.bfloat16)
    h1 = jnp.dot(z.astype(jnp.bfloat16), w1, preferred_element_type=jnp.float32)
    h1 = jnp.maximum(h1 + params["b1"], 0.0).astype(jnp.bfloat16)
    h2 = jnp.dot(h1, w2, preferred_element_type=jnp.float32)
    h2 = jnp.maximum(h2 + params["b2"], 0.0).astype(jnp.bfloat16)
    logits = jnp.dot(h2, w3, preferred_element_type=jnp.float32) + params["b3"]
    return logits.reshape(z.shape[0], 28, 28)


def _reference_forward_f32(z, params):
    h1 = jnp.maximum(z @ params["w1"] + params["b1"], 0.0)
    h2 = jnp.maximum(h1 @ params["w2"] + params["b2"], 0.0)
    return (h2 @ params["w3"] + params["b3"]).reshape(z.shape[0], 28, 28)


if __name__ == "__main__":
    key = jax.random.PRNGKey(0)
    kz, kp = jax.random.split(key)

    B, M = 2, 32  # small batch of latents, latent dim M
    z = jax.random.normal(kz, (B, M), dtype=jnp.float32)
    params = init_params(kp, M)
    prepped = prepare_decoder_params(params)  # cast/pad weights ONCE

    logits, probs = bernoulli_decoder_forward(z, prepped, return_probs=True)
    jax.block_until_ready((logits, probs))
    assert logits.shape == (B, 28, 28) and probs.shape == (B, 28, 28)

    # Tight check vs. a reference using the same bf16 casts (f32 accumulation).
    ref_bf16 = _reference_forward_bf16(z, params)
    assert jnp.allclose(logits, ref_bf16, atol=2e-3, rtol=2e-3)
    # Coarse check vs. the pure-f32 reference (bf16 weight quantization error).
    ref_f32 = _reference_forward_f32(z, params)
    assert jnp.allclose(logits, ref_f32, atol=5e-2, rtol=5e-2)
    assert jnp.allclose(probs, jax.nn.sigmoid(ref_bf16), atol=1e-3, rtol=1e-3)

    # Multi-block path: exercises >= 2 grid steps (v7x dual-TC split) and the
    # logits-only output variant.
    B2 = 64
    z2 = jax.random.normal(jax.random.PRNGKey(1), (B2, M), dtype=jnp.float32)
    logits2 = bernoulli_decoder_forward(z2, prepped)
    jax.block_until_ready(logits2)
    assert logits2.shape == (B2, 28, 28)
    assert jnp.allclose(logits2, _reference_forward_bf16(z2, params),
                        atol=2e-3, rtol=2e-3)

    # TODO(synk): the td.Independent(td.Bernoulli(logits), 2) distribution
    # object (log_prob / sampling), the encoder's rsample reparameterization,
    # the prior mixture (MoG/VAMP) and the KL term of the ELBO have no direct
    # Pallas equivalent; the kernel emits the decoder distribution's
    # parameters (logits) and mean (probs) instead.
    print("KERNEL_OK")
</pallas_src>

<mosaic_0001>
module attributes {stable_mosaic.version = 11 : i64} {
  func.func @_decoder_kernel(%arg0: i32, %arg1: memref<8x32xbf16, #tpu.memory_space<vmem>>, %arg2: memref<32x512xbf16, #tpu.memory_space<vmem>>, %arg3: memref<1x512xf32, #tpu.memory_space<vmem>>, %arg4: memref<512x512xbf16, #tpu.memory_space<vmem>>, %arg5: memref<1x512xf32, #tpu.memory_space<vmem>>, %arg6: memref<512x896xbf16, #tpu.memory_space<vmem>>, %arg7: memref<1x896xf32, #tpu.memory_space<vmem>>, %arg8: memref<8x896xf32, #tpu.memory_space<vmem>>, %arg9: memref<8x896xf32, #tpu.memory_space<vmem>>) attributes {dimension_semantics = [#tpu.dimension_semantics<parallel>], iteration_bounds = array<i64: 1>, scalar_prefetch = 0 : i64, scratch_operands = 0 : i64, tpu.core_type = #tpu.core_type<tc>, window_params = [{transform_indices = @transform_0, window_bounds = array<i64: 8, 32>}, {pipeline_mode = #tpu.pipeline_mode<synchronous>, transform_indices = @transform_1, window_bounds = array<i64: 32, 512>}, {pipeline_mode = #tpu.pipeline_mode<synchronous>, transform_indices = @transform_2, window_bounds = array<i64: 1, 512>}, {pipeline_mode = #tpu.pipeline_mode<synchronous>, transform_indices = @transform_3, window_bounds = array<i64: 512, 512>}, {pipeline_mode = #tpu.pipeline_mode<synchronous>, transform_indices = @transform_4, window_bounds = array<i64: 1, 512>}, {pipeline_mode = #tpu.pipeline_mode<synchronous>, transform_indices = @transform_5, window_bounds = array<i64: 512, 896>}, {pipeline_mode = #tpu.pipeline_mode<synchronous>, transform_indices = @transform_6, window_bounds = array<i64: 1, 896>}, {transform_indices = @transform_7, window_bounds = array<i64: 8, 896>}, {transform_indices = @transform_8, window_bounds = array<i64: 8, 896>}]} {
    %c0 = arith.constant 0 : index
    %c0_0 = arith.constant 0 : index
    %0 = vector.load %arg1[%c0, %c0_0] : memref<8x32xbf16, #tpu.memory_space<vmem>>, vector<8x32xbf16>
    %c0_1 = arith.constant 0 : index
    %c0_2 = arith.constant 0 : index
    %1 = vector.load %arg2[%c0_1, %c0_2] : memref<32x512xbf16, #tpu.memory_space<vmem>>, vector<32x512xbf16>
    %cst = arith.constant dense<0.000000e+00> : vector<8x512xf32>
    %2 = tpu.matmul %0, %1, %cst {dimension_numbers = #tpu.dot_dimension_numbers<[1], [0], [0], [1], [0, 0, 1, 1], [], []>} : vector<8x32xbf16>, vector<32x512xbf16>, vector<8x512xf32> -> vector<8x512xf32>
    %c0_3 = arith.constant 0 : index
    %c0_4 = arith.constant 0 : index
    %3 = vector.load %arg3[%c0_3, %c0_4] : memref<1x512xf32, #tpu.memory_space<vmem>>, vector<1x512xf32>
    %4 = vector.broadcast %3 : vector<1x512xf32> to vector<8x512xf32>
    %5 = arith.addf %2, %4 : vector<8x512xf32>
    %cst_5 = arith.constant 0.000000e+00 : f32
    %6 = vector.broadcast %cst_5 : f32 to vector<8x512xf32>
    %7 = arith.maximumf %5, %6 : vector<8x512xf32>
    %8 = arith.truncf %7 : vector<8x512xf32> to vector<8x512xbf16>
    %c0_6 = arith.constant 0 : index
    %c0_7 = arith.constant 0 : index
    %9 = vector.load %arg4[%c0_6, %c0_7] : memref<512x512xbf16, #tpu.memory_space<vmem>>, vector<512x512xbf16>
    %cst_8 = arith.constant dense<0.000000e+00> : vector<8x512xf32>
    %10 = tpu.matmul %8, %9, %cst_8 {dimension_numbers = #tpu.dot_dimension_numbers<[1], [0], [0], [1], [0, 0, 1, 1], [], []>} : vector<8x512xbf16>, vector<512x512xbf16>, vector<8x512xf32> -> vector<8x512xf32>
    %c0_9 = arith.constant 0 : index
    %c0_10 = arith.constant 0 : index
    %11 = vector.load %arg5[%c0_9, %c0_10] : memref<1x512xf32, #tpu.memory_space<vmem>>, vector<1x512xf32>
    %12 = vector.broadcast %11 : vector<1x512xf32> to vector<8x512xf32>
    %13 = arith.addf %10, %12 : vector<8x512xf32>
    %cst_11 = arith.constant 0.000000e+00 : f32
    %14 = vector.broadcast %cst_11 : f32 to vector<8x512xf32>
    %15 = arith.maximumf %13, %14 : vector<8x512xf32>
    %16 = arith.truncf %15 : vector<8x512xf32> to vector<8x512xbf16>
    %c0_12 = arith.constant 0 : index
    %c0_13 = arith.constant 0 : index
    %17 = vector.load %arg6[%c0_12, %c0_13] : memref<512x896xbf16, #tpu.memory_space<vmem>>, vector<512x896xbf16>
    %cst_14 = arith.constant dense<0.000000e+00> : vector<8x896xf32>
    %18 = tpu.matmul %16, %17, %cst_14 {dimension_numbers = #tpu.dot_dimension_numbers<[1], [0], [0], [1], [0, 0, 1, 1], [], []>} : vector<8x512xbf16>, vector<512x896xbf16>, vector<8x896xf32> -> vector<8x896xf32>
    %c0_15 = arith.constant 0 : index
    %c0_16 = arith.constant 0 : index
    %19 = vector.load %arg7[%c0_15, %c0_16] : memref<1x896xf32, #tpu.memory_space<vmem>>, vector<1x896xf32>
    %20 = vector.broadcast %19 : vector<1x896xf32> to vector<8x896xf32>
    %21 = arith.addf %18, %20 : vector<8x896xf32>
    %c0_17 = arith.constant 0 : index
    %c0_18 = arith.constant 0 : index
    %22 = vector.load %arg8[%c0_17, %c0_18] : memref<8x896xf32, #tpu.memory_space<vmem>>, vector<8x896xf32>
    tpu.vector_store %arg8[%c0_17, %c0_18], %21 {strides = array<i32>} : memref<8x896xf32, #tpu.memory_space<vmem>>, vector<8x896xf32>,
    %cst_19 = arith.constant 0.000000e+00 : f32
    %23 = vector.broadcast %cst_19 : f32 to vector<8x896xf32>
    %24 = arith.subf %23, %21 : vector<8x896xf32>
    %25 = math.exp %24 : vector<8x896xf32>
    %cst_20 = arith.constant 1.000000e+00 : f32
    %26 = vector.broadcast %cst_20 : f32 to vector<8x896xf32>
    %27 = arith.addf %26, %25 : vector<8x896xf32>
    %cst_21 = arith.constant 1.000000e+00 : f32
    %28 = vector.broadcast %cst_21 : f32 to vector<8x896xf32>
    %29 = arith.divf %28, %27 : vector<8x896xf32>
    %c0_22 = arith.constant 0 : index
    %c0_23 = arith.constant 0 : index
    %30 = vector.load %arg9[%c0_22, %c0_23] : memref<8x896xf32, #tpu.memory_space<vmem>>, vector<8x896xf32>
    tpu.vector_store %arg9[%c0_22, %c0_23], %29 {strides = array<i32>} : memref<8x896xf32, #tpu.memory_space<vmem>>, vector<8x896xf32>,
    return
  }
  func.func @transform_0(%arg0: i32) -> (i32, i32) {
    %c0_i32 = arith.constant 0 : i32
    %c0_i32_0 = arith.constant 0 : i32
    return %arg0, %c0_i32 : i32, i32
  }
  func.func @transform_1(%arg0: i32) -> (i32, i32) {
    %c0_i32 = arith.constant 0 : i32
    %c0_i32_0 = arith.constant 0 : i32
    %c0_i32_1 = arith.constant 0 : i32
    return %c0_i32, %c0_i32_0 : i32, i32
  }
  func.func @transform_2(%arg0: i32) -> (i32, i32) {
    %c0_i32 = arith.constant 0 : i32
    %c0_i32_0 = arith.constant 0 : i32
    %c0_i32_1 = arith.constant 0 : i32
    return %c0_i32, %c0_i32_0 : i32, i32
  }
  func.func @transform_3(%arg0: i32) -> (i32, i32) {
    %c0_i32 = arith.constant 0 : i32
    %c0_i32_0 = arith.constant 0 : i32
    %c0_i32_1 = arith.constant 0 : i32
    return %c0_i32, %c0_i32_0 : i32, i32
  }
  func.func @transform_4(%arg0: i32) -> (i32, i32) {
    %c0_i32 = arith.constant 0 : i32
    %c0_i32_0 = arith.constant 0 : i32
    %c0_i32_1 = arith.constant 0 : i32
    return %c0_i32, %c0_i32_0 : i32, i32
  }
  func.func @transform_5(%arg0: i32) -> (i32, i32) {
    %c0_i32 = arith.constant 0 : i32
    %c0_i32_0 = arith.constant 0 : i32
    %c0_i32_1 = arith.constant 0 : i32
    return %c0_i32, %c0_i32_0 : i32, i32
  }
  func.func @transform_6(%arg0: i32) -> (i32, i32) {
    %c0_i32 = arith.constant 0 : i32
    %c0_i32_0 = arith.constant 0 : i32
    %c0_i32_1 = arith.constant 0 : i32
    return %c0_i32, %c0_i32_0 : i32, i32
  }
  func.func @transform_7(%arg0: i32) -> (i32, i32) {
    %c0_i32 = arith.constant 0 : i32
    %c0_i32_0 = arith.constant 0 : i32
    return %arg0, %c0_i32 : i32, i32
  }
  func.func @transform_8(%arg0: i32) -> (i32, i32) {
    %c0_i32 = arith.constant 0 : i32
    %c0_i32_0 = arith.constant 0 : i32
    return %arg0, %c0_i32 : i32, i32
  }
}

module attributes {stable_mosaic.version = 11 : i64} {
  func.func @_decoder_kernel(%arg0: i32, %arg1: memref<8x32xbf16, #tpu.memory_space<vmem>>, %arg2: memref<32x512xbf16, #tpu.memory_space<vmem>>, %arg3: memref<1x512xf32, #tpu.memory_space<vmem>>, %arg4: memref<512x512xbf16, #tpu.memory_space<vmem>>, %arg5: memref<1x512xf32, #tpu.memory_space<vmem>>, %arg6: memref<512x896xbf16, #tpu.memory_space<vmem>>, %arg7: memref<1x896xf32, #tpu.memory_space<vmem>>, %arg8: memref<8x896xf32, #tpu.memory_space<vmem>>, %arg9: memref<8x896xf32, #tpu.memory_space<vmem>>) attributes {dimension_semantics = [#tpu.dimension_semantics<parallel>], iteration_bounds = array<i64: 1>, scalar_prefetch = 0 : i64, scratch_operands = 0 : i64, tpu.core_type = #tpu.core_type<tc>, window_params = [{transform_indices = @transform_0, window_bounds = array<i64: 8, 32>}, {pipeline_mode = #tpu.pipeline_mode<synchronous>, transform_indices = @transform_1, window_bounds = array<i64: 32, 512>}, {pipeline_mode = #tpu.pipeline_mode<synchronous>, transform_indices = @transform_2, window_bounds = array<i64: 1, 512>}, {pipeline_mode = #tpu.pipeline_mode<synchronous>, transform_indices = @transform_3, window_bounds = array<i64: 512, 512>}, {pipeline_mode = #tpu.pipeline_mode<synchronous>, transform_indices = @transform_4, window_bounds = array<i64: 1, 512>}, {pipeline_mode = #tpu.pipeline_mode<synchronous>, transform_indices = @transform_5, window_bounds = array<i64: 512, 896>}, {pipeline_mode = #tpu.pipeline_mode<synchronous>, transform_indices = @transform_6, window_bounds = array<i64: 1, 896>}, {transform_indices = @transform_7, window_bounds = array<i64: 8, 896>}, {transform_indices = @transform_8, window_bounds = array<i64: 8, 896>}]} {
    %c0 = arith.constant 0 : index
    %c0_0 = arith.constant 0 : index
    %0 = vector.load %arg1[%c0, %c0_0] : memref<8x32xbf16, #tpu.memory_space<vmem>>, vector<8x32xbf16>
    %c0_1 = arith.constant 0 : index
    %c0_2 = arith.constant 0 : index
    %1 = vector.load %arg2[%c0_1, %c0_2] : memref<32x512xbf16, #tpu.memory_space<vmem>>, vector<32x512xbf16>
    %cst = arith.constant dense<0.000000e+00> : vector<8x512xf32>
    %2 = tpu.matmul %0, %1, %cst {dimension_numbers = #tpu.dot_dimension_numbers<[1], [0], [0], [1], [0, 0, 1, 1], [], []>} : vector<8x32xbf16>, vector<32x512xbf16>, vector<8x512xf32> -> vector<8x512xf32>
    %c0_3 = arith.constant 0 : index
    %c0_4 = arith.constant 0 : index
    %3 = vector.load %arg3[%c0_3, %c0_4] : memref<1x512xf32, #tpu.memory_space<vmem>>, vector<1x512xf32>
    %4 = vector.broadcast %3 : vector<1x512xf32> to vector<8x512xf32>
    %5 = arith.addf %2, %4 : vector<8x512xf32>
    %cst_5 = arith.constant 0.000000e+00 : f32
    %6 = vector.broadcast %cst_5 : f32 to vector<8x512xf32>
    %7 = arith.maximumf %5, %6 : vector<8x512xf32>
    %8 = arith.truncf %7 : vector<8x512xf32> to vector<8x512xbf16>
    %c0_6 = arith.constant 0 : index
    %c0_7 = arith.constant 0 : index
    %9 = vector.load %arg4[%c0_6, %c0_7] : memref<512x512xbf16, #tpu.memory_space<vmem>>, vector<512x512xbf16>
    %cst_8 = arith.constant dense<0.000000e+00> : vector<8x512xf32>
    %10 = tpu.matmul %8, %9, %cst_8 {dimension_numbers = #tpu.dot_dimension_numbers<[1], [0], [0], [1], [0, 0, 1, 1], [], []>} : vector<8x512xbf16>, vector<512x512xbf16>, vector<8x512xf32> -> vector<8x512xf32>
    %c0_9 = arith.constant 0 : index
    %c0_10 = arith.constant 0 : index
    %11 = vector.load %arg5[%c0_9, %c0_10] : memref<1x512xf32, #tpu.memory_space<vmem>>, vector<1x512xf32>
    %12 = vector.broadcast %11 : vector<1x512xf32> to vector<8x512xf32>
    %13 = arith.addf %10, %12 : vector<8x512xf32>
    %cst_11 = arith.constant 0.000000e+00 : f32
    %14 = vector.broadcast %cst_11 : f32 to vector<8x512xf32>
    %15 = arith.maximumf %13, %14 : vector<8x512xf32>
    %16 = arith.truncf %15 : vector<8x512xf32> to vector<8x512xbf16>
    %c0_12 = arith.constant 0 : index
    %c0_13 = arith.constant 0 : index
    %17 = vector.load %arg6[%c0_12, %c0_13] : memref<512x896xbf16, #tpu.memory_space<vmem>>, vector<512x896xbf16>
    %cst_14 = arith.constant dense<0.000000e+00> : vector<8x896xf32>
    %18 = tpu.matmul %16, %17, %cst_14 {dimension_numbers = #tpu.dot_dimension_numbers<[1], [0], [0], [1], [0, 0, 1, 1], [], []>} : vector<8x512xbf16>, vector<512x896xbf16>, vector<8x896xf32> -> vector<8x896xf32>
    %c0_15 = arith.constant 0 : index
    %c0_16 = arith.constant 0 : index
    %19 = vector.load %arg7[%c0_15, %c0_16] : memref<1x896xf32, #tpu.memory_space<vmem>>, vector<1x896xf32>
    %20 = vector.broadcast %19 : vector<1x896xf32> to vector<8x896xf32>
    %21 = arith.addf %18, %20 : vector<8x896xf32>
    %c0_17 = arith.constant 0 : index
    %c0_18 = arith.constant 0 : index
    %22 = vector.load %arg8[%c0_17, %c0_18] : memref<8x896xf32, #tpu.memory_space<vmem>>, vector<8x896xf32>
    tpu.vector_store %arg8[%c0_17, %c0_18], %21 {strides = array<i32>} : memref<8x896xf32, #tpu.memory_space<vmem>>, vector<8x896xf32>,
    %cst_19 = arith.constant 0.000000e+00 : f32
    %23 = vector.broadcast %cst_19 : f32 to vector<8x896xf32>
    %24 = arith.subf %23, %21 : vector<8x896xf32>
    %25 = math.exp %24 : vector<8x896xf32>
    %cst_20 = arith.constant 1.000000e+00 : f32
    %26 = vector.broadcast %cst_20 : f32 to vector<8x896xf32>
    %27 = arith.addf %26, %25 : vector<8x896xf32>
    %cst_21 = arith.constant 1.000000e+00 : f32
    %28 = vector.broadcast %cst_21 : f32 to vector<8x896xf32>
    %29 = arith.divf %28, %27 : vector<8x896xf32>
    %c0_22 = arith.constant 0 : index
    %c0_23 = arith.constant 0 : index
    %30 = vector.load %arg9[%c0_22, %c0_23] : memref<8x896xf32, #tpu.memory_space<vmem>>, vector<8x896xf32>
    tpu.vector_store %arg9[%c0_22, %c0_23], %29 {strides = array<i32>} : memref<8x896xf32, #tpu.memory_space<vmem>>, vector<8x896xf32>,
    return
  }
  func.func @transform_0(%arg0: i32) -> (i32, i32) {
    %c0_i32 = arith.constant 0 : i32
    %c0_i32_0 = arith.constant 0 : i32
    return %arg0, %c0_i32 : i32, i32
  }
  func.func @transform_1(%arg0: i32) -> (i32, i32) {
    %c0_i32 = arith.constant 0 : i32
    %c0_i32_0 = arith.constant 0 : i32
    %c0_i32_1 = arith.constant 0 : i32
    return %c0_i32, %c0_i32_0 : i32, i32
  }
  func.func @transform_2(%arg0: i32) -> (i32, i32) {
    %c0_i32 = arith.constant 0 : i32
    %c0_i32_0 = arith.constant 0 : i32
    %c0_i32_1 = arith.constant 0 : i32
    return %c0_i32, %c0_i32_0 : i32, i32
  }
  func.func @transform_3(%arg0: i32) -> (i32, i32) {
    %c0_i32 = arith.constant 0 : i32
    %c0_i32_0 = arith.constant 0 : i32
    %c0_i32_1 = arith.constant 0 : i32
    return %c0_i32, %c0_i32_0 : i32, i32
  }
  func.func @transform_4(%arg0: i32) -> (i32, i32) {
    %c0_i32 = arith.constant 0 : i32
    %c0_i32_0 = arith.constant 0 : i32
    %c0_i32_1 = arith.constant 0 : i32
    return %c0_i32, %c0_i32_0 : i32, i32
  }
  func.func @transform_5(%arg0: i32) -> (i32, i32) {
    %c0_i32 = arith.constant 0 : i32
    %c0_i32_0 = arith.constant 0 : i32
    %c0_i32_1 = arith.constant 0 : i32
    return %c0_i32, %c0_i32_0 : i32, i32
  }
  func.func @transform_6(%arg0: i32) -> (i32, i32) {
    %c0_i32 = arith.constant 0 : i32
    %c0_i32_0 = arith.constant 0 : i32
    %c0_i32_1 = arith.constant 0 : i32
    return %c0_i32, %c0_i32_0 : i32, i32
  }
  func.func @transform_7(%arg0: i32) -> (i32, i32) {
    %c0_i32 = arith.constant 0 : i32
    %c0_i32_0 = arith.constant 0 : i32
    return %arg0, %c0_i32 : i32, i32
  }
  func.func @transform_8(%arg0: i32) -> (i32, i32) {
    %c0_i32 = arith.constant 0 : i32
    %c0_i32_0 = arith.constant 0 : i32
    return %arg0, %c0_i32 : i32, i32
  }
}

</mosaic_0001>

<bundles_post_ra>
// kernel: tpu_custom_call.1
= control target key start
LH: loop header
LB: loop body
LE: loop exit
PB: predicated region body
PF: predicated region fallthrough
CT: control target
= control target key end

     0   :  { %14 = vsyncpa [#allocation3], 0  ;;  %s4435_s0 = inlined_call_operand.hbm [shape: bf16[8,32], index: 0, kind: input, shape index: {}]   ;;  %s4436_s1 = inlined_call_operand.hbm [shape: bf16[32,512], index: 1, kind: input, shape index: {}]   ;;  %s4437_s2 = inlined_call_operand.vmem [shape: f32[1,512], index: 2, kind: input, shape index: {}]   ;;  %s4438_s3 = inlined_call_operand.hbm [shape: bf16[512,512], index: 3, kind: input, shape index: {}]   ;;  %s4439_s4 = inlined_call_operand.vmem [shape: f32[1,512], index: 4, kind: input, shape index: {}]   ;;  %s4440_s5 = inlined_call_operand.hbm [shape: bf16[512,896], index: 5, kind: input, shape index: {}]   ;;  %s4441_s6 = inlined_call_operand.vmem [shape: f32[1,896], index: 6, kind: input, shape index: {}]   ;;  %s4442_s7 = inlined_call_operand.hbm [shape: f32[8,896], index: 7, kind: output, shape index: {0}]   ;;  %s4443_s8 = inlined_call_operand.hbm [shape: f32[8,896], index: 8, kind: output, shape index: {1}]  }
   0x1   :  { %15 = vsyncpa [#allocation6], 0 }
   0x2   :  { %16 = vsyncpa [#allocation9], 0 }
   0x3   :  { %17 = vsyncpa [#allocation4], 0 }
   0x4   :  { %18 = vsyncpa [#allocation12], 0  ;;  %s4210_s27 = smov [#allocation5]   ;;  %s4068_s9 = scalar_lea.hbm %s4436_s1, 1024 }
   0x5   :  { %s34_s28 = sshll.u32 %s4210_s27, 4  ;;  %p4069_p0 = scmp.ne.s32.totalorder %s4436_s1, %s4068_s9  ;;  %s35_s28 = int_to_ptr.vmem [resolvable:$true] %s34_s28 }
   0x6   :  { %p4072_p1 = scmp.lt.u32.totalorder %s4068_s9, %s4436_s1 }
   0x8   :  { %p4074_p2 = pnand %p4072_p1, %p4069_p0 }
   0xa   :  { %4077 = shalt.err (!%p4074_p2)
}
   0xb   :  { %s4078_s14 = scalar_lea.vmem %s35_s28, 1024  ;;  %p4083_p4 = scmp.lt.s32.totalorder %s35_s28, %s35_s28 }
   0xc   :  { %p4079_p3 = scmp.ne.s32.totalorder %s35_s28, %s4078_s14  ;;  %p4084_p5 = scmp.lt.s32.totalorder %s4078_s14, %s4078_s14 }
   0xe   :  { %p4085_p6 = por %p4084_p5, %p4083_p4 }
  0x10   :  { %p4086_p7 = pnand %p4085_p6, %p4079_p3 }
  0x12   :  { %4089 = shalt.err (!%p4086_p7)
}
  0x13   :  { %s4211_s15 = smov 256   ;;  %s4212_s16 = smov 16  }
  0x14   :  { %40 = dma.hbm_to_vmem [thread:$0]  %s4436_s1, 1024, %s35_s28, [#allocation6], %s4211_s15, %s4211_s15, %s4212_s16  }
  0x15   :  { %s4213_s19 = smov [#allocation2]   ;;  %s4214_s21 = smov [#allocation7]  }
  0x16   :  { %s25_s20 = sshll.u32 %s4213_s19, 4  ;;  %s48_s22 = sshll.u32 %s4214_s21, 4  ;;  %s26_s20 = int_to_ptr.vmem [resolvable:$true] %s25_s20  ;;  %s49_s22 = int_to_ptr.vmem [resolvable:$true] %s48_s22 }
  0x17   :  { %s4090_s25 = scalar_lea.hbm %s4435_s0, 64 }
  0x18   :  { %p4091_p8 = scmp.ne.s32.totalorder %s4435_s0, %s4090_s25  ;;  %p4094_p9 = scmp.lt.u32.totalorder %s4090_s25, %s4435_s0 }
  0x1a   :  { %p4096_p10 = pnand %p4094_p9, %p4091_p8 }
  0x1c   :  { %4099 = shalt.err (!%p4096_p10)
}
  0x1d   :  { %s4100_s1 = scalar_lea.vmem %s26_s20, 64  ;;  %p4105_p12 = scmp.lt.s32.totalorder %s26_s20, %s26_s20 }
  0x1e   :  { %p4101_p11 = scmp.ne.s32.totalorder %s26_s20, %s4100_s1  ;;  %p4106_p13 = scmp.lt.s32.totalorder %s4100_s1, %s4100_s1 }
  0x20   :  { %p4107_p0 = por %p4106_p13, %p4105_p12 }
  0x22   :  { %p4108_p1 = pnand %p4107_p0, %p4101_p11 }
  0x24   :  { %4111 = shalt.err (!%p4108_p1)
}
  0x25   :  { %28 = dma.hbm_to_vmem [thread:$0]  %s4435_s0, 64, %s26_s20, [#allocation3]  }
  0x26   :  { %s4112_s12 = scalar_lea.hbm %s4438_s3, 16384 }
  0x27   :  { %p4113_p2 = scmp.ne.s32.totalorder %s4438_s3, %s4112_s12  ;;  %p4116_p3 = scmp.lt.u32.totalorder %s4112_s12, %s4438_s3 }
  0x29   :  { %p4118_p4 = pnand %p4116_p3, %p4113_p2 }
  0x2b   :  { %4121 = shalt.err (!%p4118_p4)
}
  0x2c   :  { %s4122_s19 = scalar_lea.vmem %s49_s22, 16384  ;;  %p4127_p6 = scmp.lt.s32.totalorder %s49_s22, %s49_s22 }
  0x2d   :  { %p4123_p5 = scmp.ne.s32.totalorder %s49_s22, %s4122_s19  ;;  %p4128_p7 = scmp.lt.s32.totalorder %s4122_s19, %s4122_s19 }
  0x2f   :  { %p4129_p8 = por %p4128_p7, %p4127_p6 }
  0x31   :  { %p4130_p9 = pnand %p4129_p8, %p4123_p5 }
  0x33   :  { %4133 = shalt.err (!%p4130_p9)
}
  0x34   :  { %54 = dma.hbm_to_vmem [thread:$0]  %s4438_s3, 16384, %s49_s22, [#allocation6], %s4211_s15, %s4211_s15, %s4212_s16  }
  0x35   :  { %s4215_s21 = smov [#allocation8]   ;;  %s4134_s26 = scalar_lea.hbm %s4440_s5, 28672 }
  0x36   :  { %s62_s23 = sshll.u32 %s4215_s21, 4  ;;  %p4135_p10 = scmp.ne.s32.totalorder %s4440_s5, %s4134_s26  ;;  %s63_s23 = int_to_ptr.vmem [resolvable:$true] %s62_s23 }
  0x37   :  { %p4138_p11 = scmp.lt.u32.totalorder %s4134_s26, %s4440_s5 }
  0x39   :  { %p4140_p12 = pnand %p4138_p11, %p4135_p10 }
  0x3b   :  { %4143 = shalt.err (!%p4140_p12)
}
  0x3c   :  { %s4144_s28 = scalar_lea.vmem %s63_s23, 28672  ;;  %p4149_p0 = scmp.lt.s32.totalorder %s63_s23, %s63_s23 }
  0x3d   :  { %p4145_p13 = scmp.ne.s32.totalorder %s63_s23, %s4144_s28  ;;  %p4150_p1 = scmp.lt.s32.totalorder %s4144_s28, %s4144_s28 }
  0x3f   :  { %p4151_p2 = por %p4150_p1, %p4149_p0 }
  0x41   :  { %p4152_p3 = pnand %p4151_p2, %p4145_p13 }
  0x43   :  { %4155 = shalt.err (!%p4152_p3)
}
  0x44   :  { %s4216_s3 = smov 448   ;;  %s4217_s15 = smov 28  }
  0x45   :  { %68 = dma.hbm_to_vmem [thread:$0]  %s4440_s5, 28672, %s63_s23, [#allocation9], %s4216_s3, %s4216_s3, %s4217_s15  }
  0x46   :  { %4200 = dma.done.wait [#allocation3], 64  }
  0x47   :  { %4201 = vsyncadd [#allocation3], 4294967232 }
  0x48   :  { %4202 = dma.done.wait [#allocation6], 17408  }
  0x49   :  { %4203 = vsyncadd [#allocation6], 4294949888 }
  0x4a   :  { %4204 = dma.done.wait [#allocation9], 28672  }
  0x4b   :  { %4205 = vsyncadd [#allocation9], 4294938624  ;;  %v4218_v0 = vmov 0   ;;  %v3516_v1 = vld [vmem:[#allocation5 + $0x4] ss:$16 sps:$4 sm:$0xff]   ;;  %vm155_vm0 = vcmask 261120  }
  0x4c   :  { %191 = vmatprep.mubr.bf16.mxu1 %v4218_v0  ;;  %v3518_v2 = vld [vmem:[#allocation5] ss:$16 sps:$4 sm:$0xff]   ;;  %159 = vmatprep.subr.bf16.mxu1 %v3516_v1  ;;  %v3519_v3 = vld [vmem:[#allocation5 + $0x24] ss:$16 sps:$4 sm:$0xff]   ;;  %v3524_v5 = vld [vmem:[#allocation5 + $0xc] ss:$16 sps:$4 sm:$0xff]  }
  0x4d   :  { %160 = vmatpush1.bf16.msra.mxu1 %v3518_v2  ;;  %v3521_v4 = vld [vmem:[#allocation5 + $0x20] ss:$16 sps:$4 sm:$0xff]   ;;  %v84_v6 = vld [vmem:[#allocation2] sm:$0xf]  ;;  %v3528_v7 = vld [vmem:[#allocation7 + $0x4] ss:$16 sps:$4 sm:$0xff]  }
  0x4e   :  { %161 = vmatprep.subr.bf16.mxu1 %v3519_v3  ;;  %v3522_v8 = vld [vmem:[#allocation5 + $0x8] ss:$16 sps:$4 sm:$0xff]   ;;  %v3527_v9 = vld [vmem:[#allocation5 + $0x2c] ss:$16 sps:$4 sm:$0xff]   ;;  %1039 = vmatprep.subr.bf16.mxu0 %v3528_v7  ;;  %v3533_v10 = vld [vmem:[#allocation7] ss:$16 sps:$4 sm:$0xff]  }
  0x4f   :  { %v3534_v11 = vld [vmem:[#allocation7 + $0x24] ss:$16 sps:$4 sm:$0xff]   ;;  %v3525_v12 = vld [vmem:[#allocation5 + $0x28] ss:$16 sps:$4 sm:$0xff]   ;;  %1040 = vmatpush1.bf16.msra.mxu0 %v3533_v10  ;;  %v3539_v13 = vld [vmem:[#allocation7 + $0x20] ss:$16 sps:$4 sm:$0xff]  }
  0x50   :  { %v3540_v14 = vld [vmem:[#allocation7 + $0x44] ss:$16 sps:$4 sm:$0xff]   ;;  %v3532_v15 = vld [vmem:[#allocation7 + $0xc] ss:$16 sps:$4 sm:$0xff]   ;;  %1041 = vmatprep.subr.bf16.mxu0 %v3534_v11  ;;  %v3545_v16 = vld [vmem:[#allocation7 + $0x40] ss:$16 sps:$4 sm:$0xff]  }
  0x51   :  { %162 = vmatpush1.bf16.msra.mxu1 %v3521_v4  ;;  %v3530_v17 = vld [vmem:[#allocation7 + $0x8] ss:$16 sps:$4 sm:$0xff]   ;;  %v3546_v18 = vld [vmem:[#allocation7 + $0x64] ss:$16 sps:$4 sm:$0xff]   ;;  %v3538_v19 = vld [vmem:[#allocation7 + $0x2c] ss:$16 sps:$4 sm:$0xff]  }
  0x52   :  { %200 = vmatprep.subr.bf16.mxu1 %v3524_v5  ;;  %v3536_v20 = vld [vmem:[#allocation7 + $0x28] ss:$16 sps:$4 sm:$0xff]   ;;  %v3551_v21 = vld [vmem:[#allocation7 + $0x60] ss:$16 sps:$4 sm:$0xff]   ;;  %v3552_v22 = vld [vmem:[#allocation7 + $0x84] ss:$16 sps:$4 sm:$0xff]  }
  0x53   :  { %1042 = vmatpush1.bf16.msra.mxu0 %v3539_v13  ;;  %v3544_v23 = vld [vmem:[#allocation7 + $0x4c] ss:$16 sps:$4 sm:$0xff]   ;;  %v3557_v24 = vld [vmem:[#allocation7 + $0x80] ss:$16 sps:$4 sm:$0xff]   ;;  %v3542_v25 = vld [vmem:[#allocation7 + $0x48] ss:$16 sps:$4 sm:$0xff]  }
  0x54   :  { %3077 = vmatmul.mubr.msk.bf16.vlgmr.msra.gmra.mrb[0].mxu1 %vm155_vm0, %v84_v6  ;;  %1043 = vmatprep.subr.bf16.mxu0 %v3540_v14  ;;  %v3558_v26 = vld [vmem:[#allocation7 + $0xa4] ss:$16 sps:$4 sm:$0xff]   ;;  %v3550_v27 = vld [vmem:[#allocation7 + $0x6c] ss:$16 sps:$4 sm:$0xff]   ;;  %v3548_v28 = vld [vmem:[#allocation7 + $0x68] ss:$16 sps:$4 sm:$0xff]  }
  0x55   :  { %201 = vmatpush1.bf16.msra.mxu1 %v3522_v8  ;;  %232 = vmatprep.mubr.bf16.mxu1 %v4218_v0  ;;  %v3563_v29 = vld [vmem:[#allocation7 + $0xa0] ss:$16 sps:$4 sm:$0xff]   ;;  %v3564_v30 = vld [vmem:[#allocation7 + $0xc4] ss:$16 sps:$4 sm:$0xff]   ;;  %v3556_v31 = vld [vmem:[#allocation7 + $0x8c] ss:$16 sps:$4 sm:$0xff]  }
  0x56   :  { %202 = vmatprep.subr.bf16.mxu1 %v3527_v9  ;;  %v3569_v32 = vld [vmem:[#allocation7 + $0xc0] ss:$16 sps:$4 sm:$0xff]   ;;  %v3554_v33 = vld [vmem:[#allocation7 + $0x88] ss:$16 sps:$4 sm:$0xff]   ;;  %v3570_v34 = vld [vmem:[#allocation7 + $0xe4] ss:$16 sps:$4 sm:$0xff]  }
  0x57   :  { %1044 = vmatpush1.bf16.msra.mxu0 %v3545_v16  ;;  %v3562_v35 = vld [vmem:[#allocation7 + $0xac] ss:$16 sps:$4 sm:$0xff]   ;;  %v3560_v36 = vld [vmem:[#allocation7 + $0xa8] ss:$16 sps:$4 sm:$0xff]   ;;  %v3575_v37 = vld [vmem:[#allocation7 + $0xe0] ss:$16 sps:$4 sm:$0xff]  }
  0x58   :  { %1045 = vmatprep.subr.bf16.mxu0 %v3546_v18  ;;  %v3576_v38 = vld [vmem:[#allocation7 + $0x104] ss:$16 sps:$4 sm:$0xff]   ;;  %v3568_v39 = vld [vmem:[#allocation7 + $0xcc] ss:$16 sps:$4 sm:$0xff]   ;;  %v3581_v40 = vld [vmem:[#allocation7 + $0x100] ss:$16 sps:$4 sm:$0xff]  }
  0x59   :  { %203 = vmatpush1.bf16.msra.mxu1 %v3525_v12  ;;  %v3566_v41 = vld [vmem:[#allocation7 + $0xc8] ss:$16 sps:$4 sm:$0xff]   ;;  %v3582_v42 = vld [vmem:[#allocation7 + $0x124] ss:$16 sps:$4 sm:$0xff]   ;;  %v3574_v43 = vld [vmem:[#allocation7 + $0xec] ss:$16 sps:$4 sm:$0xff]   ;;  %v95_v12 = vlaneseq }
  0x5a   :  { %1121 = vmatprep.subr.bf16.mxu1 %v3532_v15  ;;  %v3572_v44 = vld [vmem:[#allocation7 + $0xe8] ss:$16 sps:$4 sm:$0xff]   ;;  %v3580_v45 = vld [vmem:[#allocation7 + $0x10c] ss:$16 sps:$4 sm:$0xff]   ;;  %v3587_v46 = vld [vmem:[#allocation7 + $0x120] ss:$16 sps:$4 sm:$0xff]  }
  0x5b   :  { %1046 = vmatpush1.bf16.msra.mxu0 %v3551_v21  ;;  %v3588_v47 = vld [vmem:[#allocation7 + $0x144] ss:$16 sps:$4 sm:$0xff]   ;;  %v3593_v48 = vld [vmem:[#allocation7 + $0x140] ss:$16 sps:$4 sm:$0xff]   ;;  %v3578_v49 = vld [vmem:[#allocation7 + $0x108] ss:$16 sps:$4 sm:$0xff]  }
  0x5c   :  { %3078 = vmatmul.mubr.msk.bf16.vlgmr.msra.gmra.mrb[4].mxu1 %vm155_vm0, %v84_v6  ;;  %1047 = vmatprep.subr.bf16.mxu0 %v3552_v22  ;;  %v3594_v50 = vld [vmem:[#allocation7 + $0x164] ss:$16 sps:$4 sm:$0xff]   ;;  %v3586_v51 = vld [vmem:[#allocation7 + $0x12c] ss:$16 sps:$4 sm:$0xff]   ;;  %v3599_v52 = vld [vmem:[#allocation7 + $0x160] ss:$16 sps:$4 sm:$0xff]  }
  0x5d   :  { %1122 = vmatpush1.bf16.msra.mxu1 %v3530_v17  ;;  %v3584_v53 = vld [vmem:[#allocation7 + $0x128] ss:$16 sps:$4 sm:$0xff]   ;;  %v3600_v54 = vld [vmem:[#allocation7 + $0x184] ss:$16 sps:$4 sm:$0xff]   ;;  %v3592_v55 = vld [vmem:[#allocation7 + $0x14c] ss:$16 sps:$4 sm:$0xff]  }
  0x5e   :  { %1123 = vmatprep.subr.bf16.mxu1 %v3538_v19  ;;  %v3605_v56 = vld [vmem:[#allocation7 + $0x180] ss:$16 sps:$4 sm:$0xff]   ;;  %v3590_v57 = vld [vmem:[#allocation7 + $0x148] ss:$16 sps:$4 sm:$0xff]   ;;  %v3606_v58 = vld [vmem:[#allocation7 + $0x1a4] ss:$16 sps:$4 sm:$0xff]  }
  0x5f   :  { %1048 = vmatpush1.bf16.msra.mxu0 %v3557_v24  ;;  %v3598_v59 = vld [vmem:[#allocation7 + $0x16c] ss:$16 sps:$4 sm:$0xff]   ;;  %v3611_v60 = vld [vmem:[#allocation7 + $0x1a0] ss:$16 sps:$4 sm:$0xff]   ;;  %v3596_v61 = vld [vmem:[#allocation7 + $0x168] ss:$16 sps:$4 sm:$0xff]  }
  0x60   :  { %1049 = vmatprep.subr.bf16.mxu0 %v3558_v26  ;;  %v3604_v62 = vld [vmem:[#allocation7 + $0x18c] ss:$16 sps:$4 sm:$0xff]   ;;  %v3602_v63 = vld [vmem:[#allocation7 + $0x188] ss:$16 sps:$4 sm:$0xff]   ;;  %v3612_v2 = vld [vmem:[#allocation7 + $0x1c4] ss:$16 sps:$4 sm:$0xff]  }
  0x61   :  { %1124 = vmatpush1.bf16.msra.mxu1 %v3536_v20  ;;  %v3610_v0 = vld [vmem:[#allocation7 + $0x1ac] ss:$16 sps:$4 sm:$0xff]   ;;  %v3608_v1 = vld [vmem:[#allocation7 + $0x1a8] ss:$16 sps:$4 sm:$0xff]   ;;  %v3617_v5 = vld [vmem:[#allocation7 + $0x1c0] ss:$16 sps:$4 sm:$0xff]  }
  0x62   :  { %1125 = vmatprep.subr.bf16.mxu1 %v3544_v23  ;;  %v3616_v3 = vld [vmem:[#allocation7 + $0x1cc] ss:$16 sps:$4 sm:$0xff]   ;;  %v3614_v4 = vld [vmem:[#allocation7 + $0x1c8] ss:$16 sps:$4 sm:$0xff]   ;;  %v3618_v6 = vld [vmem:[#allocation7 + $0x1e4] ss:$16 sps:$4 sm:$0xff]  }
  0x63   :  { %1050 = vmatpush1.bf16.msra.mxu0 %v3563_v29  ;;  %v3622_v7 = vld [vmem:[#allocation7 + $0x1ec] ss:$16 sps:$4 sm:$0xff]   ;;  %v3620_v8 = vld [vmem:[#allocation7 + $0x1e8] ss:$16 sps:$4 sm:$0xff]   ;;  %v3623_v9 = vld [vmem:[#allocation7 + $0x1e0] ss:$16 sps:$4 sm:$0xff]  }
  0x64   :  { %1051 = vmatprep.subr.bf16.mxu0 %v3564_v30  ;;  %v3626_v10 = vld [vmem:[#allocation7 + $0x204] ss:$16 sps:$4 sm:$0xff]   ;;  %v3629_v11 = vld [vmem:[#allocation7 + $0x20c] ss:$16 sps:$4 sm:$0xff]   ;;  %v4322_v13 = vshrl.u32 %v95_v12, 7 }
  0x65   :  { %1126 = vmatpush1.bf16.msra.mxu1 %v3542_v25  ;;  %v4330_v15 = vld [vmem:[%s4437_s2] sm:$0xf]  ;;  %v3624_v29 = vld [vmem:[#allocation7 + $0x200] ss:$16 sps:$4 sm:$0xff]   ;;  %v3627_v30 = vld [vmem:[#allocation7 + $0x208] ss:$16 sps:$4 sm:$0xff]  }
  0x66   :  { %1127 = vmatprep.subr.bf16.mxu1 %v3550_v27  ;;  %v4325_v14 = vsub.s32 0, %v4322_v13  ;;  %v4333_v16 = vsub.s32 1, %v4322_v13  ;;  %v4340_v24 = vsub.s32 3, %v4322_v13  ;;  %v3686_v12 = vld [vmem:[#allocation7 + $0x344] ss:$16 sps:$4 sm:$0xff]  }
  0x67   :  { %1052 = vmatpush1.bf16.msra.mxu0 %v3569_v32 }
  0x68   :  { %1053 = vmatprep.subr.bf16.mxu0 %v3570_v34  ;;  %v98_v17 = vrot.slane %v4330_v15, %v4325_v14  ;;  %v102_v18 = vrot.slane %v4330_v15, %v4333_v16  ;;  %v3635_v34 = vld [vmem:[#allocation7 + $0x22c] ss:$16 sps:$4 sm:$0xff]  }
  0x69   :  { %1128 = vmatpush1.bf16.msra.mxu1 %v3548_v28 }
  0x6a   :  { %1129 = vmatprep.subr.bf16.mxu1 %v3556_v31  ;;  %v110_v31 = vrot.slane %v4330_v15, %v4340_v24 }
  0x6b   :  { %1054 = vmatpush1.bf16.msra.mxu0 %v3575_v37  ;;  %v3630_v37 = vld [vmem:[#allocation7 + $0x220] ss:$16 sps:$4 sm:$0xff]  }
  0x6c   :  { %1055 = vmatprep.subr.bf16.mxu0 %v3576_v38  ;;  %v3633_v38 = vld [vmem:[#allocation7 + $0x228] ss:$16 sps:$4 sm:$0xff]  }
  0x6d   :  { %1130 = vmatpush1.bf16.msra.mxu1 %v3554_v33  ;;  %v3632_v33 = vld [vmem:[#allocation7 + $0x224] ss:$16 sps:$4 sm:$0xff]  }
  0x6e   :  { %1131 = vmatprep.subr.bf16.mxu1 %v3562_v35 }
  0x6f   :  { %1056 = vmatpush1.bf16.msra.mxu0 %v3581_v40 }
  0x70   :  { %1057 = vmatprep.subr.bf16.mxu0 %v3582_v42  ;;  %v3641_v42 = vld [vmem:[#allocation7 + $0x24c] ss:$16 sps:$4 sm:$0xff]  }
  0x71   :  { %1132 = vmatpush1.bf16.msra.mxu1 %v3560_v36 }
  0x72   :  { %1133 = vmatprep.subr.bf16.mxu1 %v3568_v39 }
  0x73   :  { %1058 = vmatpush1.bf16.msra.mxu0 %v3587_v46  ;;  %v3639_v46 = vld [vmem:[#allocation7 + $0x248] ss:$16 sps:$4 sm:$0xff]  }
  0x74   :  { %1059 = vmatprep.subr.bf16.mxu0 %v3588_v47 }
  0x75   :  { %1134 = vmatpush1.bf16.msra.mxu1 %v3566_v41  ;;  %v3638_v41 = vld [vmem:[#allocation7 + $0x244] ss:$16 sps:$4 sm:$0xff]  }
  0x76   :  { %1135 = vmatprep.subr.bf16.mxu1 %v3574_v43 }
  0x77   :  { %1060 = vmatpush1.bf16.msra.mxu0 %v3593_v48  ;;  %v3644_v48 = vld [vmem:[#allocation7 + $0x264] ss:$16 sps:$4 sm:$0xff]  }
  0x78   :  { %1061 = vmatprep.subr.bf16.mxu0 %v3594_v50  ;;  %v3642_v50 = vld [vmem:[#allocation7 + $0x260] ss:$16 sps:$4 sm:$0xff]  }
  0x79   :  { %1136 = vmatpush1.bf16.msra.mxu1 %v3572_v44 }
  0x7a   :  { %1137 = vmatprep.subr.bf16.mxu1 %v3580_v45  ;;  %v3636_v45 = vld [vmem:[#allocation7 + $0x240] ss:$16 sps:$4 sm:$0xff]  }
  0x7b   :  { %1062 = vmatpush1.bf16.msra.mxu0 %v3599_v52  ;;  %v3650_v52 = vld [vmem:[#allocation7 + $0x284] ss:$16 sps:$4 sm:$0xff]  }
  0x7c   :  { %1063 = vmatprep.subr.bf16.mxu0 %v3600_v54  ;;  %v3648_v54 = vld [vmem:[#allocation7 + $0x280] ss:$16 sps:$4 sm:$0xff]  }
  0x7d   :  { %1138 = vmatpush1.bf16.msra.mxu1 %v3578_v49  ;;  %v3647_v49 = vld [vmem:[#allocation7 + $0x26c] ss:$16 sps:$4 sm:$0xff]  }
  0x7e   :  { %1139 = vmatprep.subr.bf16.mxu1 %v3586_v51  ;;  %v3645_v51 = vld [vmem:[#allocation7 + $0x268] ss:$16 sps:$4 sm:$0xff]  }
  0x7f   :  { %1064 = vmatpush1.bf16.msra.mxu0 %v3605_v56  ;;  %v3656_v56 = vld [vmem:[#allocation7 + $0x2a4] ss:$16 sps:$4 sm:$0xff]  }
  0x80   :  { %1065 = vmatprep.subr.bf16.mxu0 %v3606_v58  ;;  %v3654_v58 = vld [vmem:[#allocation7 + $0x2a0] ss:$16 sps:$4 sm:$0xff]  }
  0x81   :  { %1140 = vmatpush1.bf16.msra.mxu1 %v3584_v53  ;;  %v3653_v53 = vld [vmem:[#allocation7 + $0x28c] ss:$16 sps:$4 sm:$0xff]  }
  0x82   :  { %1141 = vmatprep.subr.bf16.mxu1 %v3592_v55  ;;  %v3651_v55 = vld [vmem:[#allocation7 + $0x288] ss:$16 sps:$4 sm:$0xff]  }
  0x83   :  { %1066 = vmatpush1.bf16.msra.mxu0 %v3611_v60  ;;  %v3662_v60 = vld [vmem:[#allocation7 + $0x2c4] ss:$16 sps:$4 sm:$0xff]  }
  0x84   :  { %1067 = vmatprep.subr.bf16.mxu0 %v3612_v2  ;;  %v3666_v2 = vld [vmem:[#allocation7 + $0x2e0] ss:$16 sps:$4 sm:$0xff]  }
  0x85   :  { %1142 = vmatpush1.bf16.msra.mxu1 %v3590_v57  ;;  %v3659_v57 = vld [vmem:[#allocation7 + $0x2ac] ss:$16 sps:$4 sm:$0xff]  }
  0x86   :  { %1143 = vmatprep.subr.bf16.mxu1 %v3598_v59  ;;  %v3657_v59 = vld [vmem:[#allocation7 + $0x2a8] ss:$16 sps:$4 sm:$0xff]  }
  0x87   :  { %1068 = vmatpush1.bf16.msra.mxu0 %v3617_v5  ;;  %v3677_v5 = vld [vmem:[#allocation7 + $0x30c] ss:$16 sps:$4 sm:$0xff]  }
  0x88   :  { %1069 = vmatprep.subr.bf16.mxu0 %v3618_v6  ;;  %v3672_v6 = vld [vmem:[#allocation7 + $0x300] ss:$16 sps:$4 sm:$0xff]  }
  0x89   :  { %1144 = vmatpush1.bf16.msra.mxu1 %v3596_v61  ;;  %v3665_v61 = vld [vmem:[#allocation7 + $0x2cc] ss:$16 sps:$4 sm:$0xff]  }
  0x8a   :  { %1145 = vmatprep.subr.bf16.mxu1 %v3604_v62  ;;  %v3660_v62 = vld [vmem:[#allocation7 + $0x2c0] ss:$16 sps:$4 sm:$0xff]  }
  0x8b   :  { %1070 = vmatpush1.bf16.msra.mxu0 %v3623_v9  ;;  %v3683_v9 = vld [vmem:[#allocation7 + $0x32c] ss:$16 sps:$4 sm:$0xff]  }
  0x8c   :  { %1080 = vmatprep.subr.bf16.mxu0 %v3626_v10  ;;  %v3678_v10 = vld [vmem:[#allocation7 + $0x320] ss:$16 sps:$4 sm:$0xff]  }
  0x8d   :  { %1146 = vmatpush1.bf16.msra.mxu1 %v3602_v63  ;;  %v3663_v63 = vld [vmem:[#allocation7 + $0x2c8] ss:$16 sps:$4 sm:$0xff]  }
  0x8e   :  { %1147 = vmatprep.subr.bf16.mxu1 %v3610_v0  ;;  %v3668_v0 = vld [vmem:[#allocation7 + $0x2e4] ss:$16 sps:$4 sm:$0xff]  }
  0x91   :  { %1148 = vmatpush1.bf16.msra.mxu1 %v3608_v1  ;;  %v3671_v1 = vld [vmem:[#allocation7 + $0x2ec] ss:$16 sps:$4 sm:$0xff]  }
  0x92   :  { %1149 = vmatprep.subr.bf16.mxu1 %v3616_v3  ;;  %v3669_v3 = vld [vmem:[#allocation7 + $0x2e8] ss:$16 sps:$4 sm:$0xff]  }
  0x95   :  { %1150 = vmatpush1.bf16.msra.mxu1 %v3614_v4  ;;  %v3674_v4 = vld [vmem:[#allocation7 + $0x304] ss:$16 sps:$4 sm:$0xff]  }
  0x96   :  { %1151 = vmatprep.subr.bf16.mxu1 %v3622_v7  ;;  %v3675_v7 = vld [vmem:[#allocation7 + $0x308] ss:$16 sps:$4 sm:$0xff]  }
  0x99   :  { %1152 = vmatpush1.bf16.msra.mxu1 %v3620_v8  ;;  %v3680_v8 = vld [vmem:[#allocation7 + $0x324] ss:$16 sps:$4 sm:$0xff]  }
  0x9a   :  { %1162 = vmatprep.subr.bf16.mxu1 %v3629_v11  ;;  %v3681_v11 = vld [vmem:[#allocation7 + $0x328] ss:$16 sps:$4 sm:$0xff]  }
 0x127   :  { %v193_v19 = vpop.f32.mrb[0].mxu1 }
 0x128   :  { %v194_v20 = vadd.f32 %v193_v19, %v98_v17  ;;  %v195_v21 = vpop.f32.mrb[1].mxu1  ;;  %v3689_v17 = vld [vmem:[#allocation7 + $0x34c] ss:$16 sps:$4 sm:$0xff]   ;;  %v3687_v19 = vld [vmem:[#allocation7 + $0x348] ss:$16 sps:$4 sm:$0xff]  }
 0x129   :  { %v196_v22 = vadd.f32 %v195_v21, %v102_v18  ;;  %v197_v23 = vpop.f32.mrb[2].mxu1  ;;  %v3684_v18 = vld [vmem:[#allocation7 + $0x340] ss:$16 sps:$4 sm:$0xff]   ;;  %v3695_v21 = vld [vmem:[#allocation7 + $0x36c] ss:$16 sps:$4 sm:$0xff]  }
 0x12a   :  { %v241_v25 = vmax.f32 %v194_v20, 0.0  ;;  %v198_v26 = vpop.f32.mrb[3].mxu1  ;;  %v3692_v20 = vld [vmem:[#allocation7 + $0x364] ss:$16 sps:$4 sm:$0xff]   ;;  %v3693_v23 = vld [vmem:[#allocation7 + $0x368] ss:$16 sps:$4 sm:$0xff]  }
 0x12b   :  { %v242_v27 = vmax.f32 %v196_v22, 0.0  ;;  %v3690_v22 = vld [vmem:[#allocation7 + $0x360] ss:$16 sps:$4 sm:$0xff]   ;;  %v3701_v26 = vld [vmem:[#allocation7 + $0x38c] ss:$16 sps:$4 sm:$0xff]  }
 0x12c   :  { %v245_v32 = vpack.c.bf16 %v241_v25, %v241_v25  ;;  %v3698_v25 = vld [vmem:[#allocation7 + $0x384] ss:$16 sps:$4 sm:$0xff]  }
 0x12d   :  { %v246_v28 = vpack.c.bf16 %v242_v27, %v242_v27  ;;  %v3696_v27 = vld [vmem:[#allocation7 + $0x380] ss:$16 sps:$4 sm:$0xff]  }
 0x12f   :  { %1071 = vmatprep.mubr.bf16.mxu0 %v246_v28  ;;  %1153 = vmatprep.mubr.bf16.mxu1 %v246_v28  ;;  %v4344_v35 = vpop.f32.mrb[4].mxu1  ;;  %v3699_v28 = vld [vmem:[#allocation7 + $0x388] ss:$16 sps:$4 sm:$0xff]  }
 0x130   :  { %1072 = vmatmul.mubr.bf16.vlgmr.msra.gmra.mrb[0].mxu0 %v245_v32  ;;  %1154 = vmatmul.mubr.bf16.vlgmr.msra.gmra.mrb[8].mxu1 %v245_v32  ;;  %v236_v36 = vpop.f32.mrb[5].mxu1  ;;  %v3702_v32 = vld [vmem:[#allocation7 + $0x3a0] ss:$16 sps:$4 sm:$0xff]  }
 0x131   :  { %1081 = vmatpush1.bf16.msra.mxu0 %v3624_v29  ;;  %1163 = vmatpush1.bf16.msra.mxu1 %v3627_v30  ;;  %v237_v39 = vadd.f32 %v236_v36, %v110_v31  ;;  %v238_v40 = vpop.f32.mrb[6].mxu1  ;;  %v4347_v29 = vsub.s32 2, %v4322_v13  ;;  %v3704_v30 = vld [vmem:[#allocation7 + $0x3a4] ss:$16 sps:$4 sm:$0xff]   ;;  %v3707_v31 = vld [vmem:[#allocation7 + $0x3ac] ss:$16 sps:$4 sm:$0xff]  }
 0x132   :  { %1082 = vmatprep.subr.bf16.mxu0 %v3632_v33  ;;  %1164 = vmatprep.subr.bf16.mxu1 %v3635_v34  ;;  %v239_v43 = vpop.f32.mrb[7].mxu1  ;;  %v3705_v33 = vld [vmem:[#allocation7 + $0x3a8] ss:$16 sps:$4 sm:$0xff]   ;;  %v3710_v36 = vld [vmem:[#allocation7 + $0x3c4] ss:$16 sps:$4 sm:$0xff]  }
 0x133   :  { %v244_v44 = vmax.f32 %v237_v39, 0.0  ;;  %v106_v34 = vrot.slane %v4330_v15, %v4347_v29  ;;  %v3711_v39 = vld [vmem:[#allocation7 + $0x3c8] ss:$16 sps:$4 sm:$0xff]   ;;  %v3714_v43 = vld [vmem:[#allocation7 + $0x3e0] ss:$16 sps:$4 sm:$0xff]  }
 0x134   :  { %v3722_v15 = vld [vmem:[#allocation8 + $0x4] ss:$28 sps:$4 sm:$0xff]  }
 0x135   :  { %1083 = vmatpush1.bf16.msra.mxu0 %v3630_v37  ;;  %1165 = vmatpush1.bf16.msra.mxu1 %v3633_v38  ;;  %v248_v47 = vpack.c.bf16 %v244_v44, %v244_v44  ;;  %v3713_v37 = vld [vmem:[#allocation7 + $0x3cc] ss:$16 sps:$4 sm:$0xff]   ;;  %v3708_v38 = vld [vmem:[#allocation7 + $0x3c0] ss:$16 sps:$4 sm:$0xff]   ;;  %v235_v40 = vadd.f32 %v4344_v35, %v106_v34  ;;  %v3717_v44 = vld [vmem:[#allocation7 + $0x3e8] ss:$16 sps:$4 sm:$0xff]  }
 0x136   :  { %1084 = vmatprep.subr.bf16.mxu0 %v3638_v41  ;;  %1166 = vmatprep.subr.bf16.mxu1 %v3641_v42  ;;  %v3716_v41 = vld [vmem:[#allocation7 + $0x3e4] ss:$16 sps:$4 sm:$0xff]   ;;  %v3719_v42 = vld [vmem:[#allocation7 + $0x3ec] ss:$16 sps:$4 sm:$0xff]  }
 0x137   :  { %1112 = vmatprep.mubr.bf16.mxu0 %v248_v47  ;;  %1194 = vmatprep.mubr.bf16.mxu1 %v248_v47  ;;  %v3720_v47 = vld [vmem:[#allocation8] ss:$28 sps:$4 sm:$0xff]   ;;  %v3789_v34 = vld [vmem:[#allocation8 + $0x270] ss:$28 sps:$4 sm:$0xff]  }
 0x138   :  { %v3728_v35 = vld [vmem:[#allocation8 + $0x3c] ss:$28 sps:$4 sm:$0xff]  }
 0x139   :  { %1085 = vmatpush1.bf16.msra.mxu0 %v3636_v45  ;;  %1167 = vmatpush1.bf16.msra.mxu1 %v3639_v46  ;;  %v243_v45 = vmax.f32 %v235_v40, 0.0  ;;  %v3725_v46 = vld [vmem:[#allocation8 + $0xc] ss:$28 sps:$4 sm:$0xff]   ;;  %v3800_v40 = vld [vmem:[#allocation8 + $0x2dc] ss:$28 sps:$4 sm:$0xff]  }
 0x13a   :  { %1086 = vmatprep.subr.bf16.mxu0 %v3644_v48  ;;  %1168 = vmatprep.subr.bf16.mxu1 %v3647_v49  ;;  %v3723_v48 = vld [vmem:[#allocation8 + $0x8] ss:$28 sps:$4 sm:$0xff]  }
 0x13b   :  { %v247_v49 = vpack.c.bf16 %v243_v45, %v243_v45  ;;  %v3809_v45 = vld [vmem:[#allocation8 + $0x31c] ss:$28 sps:$4 sm:$0xff]  }
 0x13d   :  { %1087 = vmatpush1.bf16.msra.mxu0 %v3642_v50  ;;  %1169 = vmatpush1.bf16.msra.mxu1 %v3645_v51  ;;  %v3731_v50 = vld [vmem:[#allocation8 + $0x44] ss:$28 sps:$4 sm:$0xff]   ;;  %v3726_v51 = vld [vmem:[#allocation8 + $0x38] ss:$28 sps:$4 sm:$0xff]  }
 0x13e   :  { %1088 = vmatprep.subr.bf16.mxu0 %v3650_v52  ;;  %1170 = vmatprep.subr.bf16.mxu1 %v3653_v53  ;;  %v3729_v52 = vld [vmem:[#allocation8 + $0x40] ss:$28 sps:$4 sm:$0xff]   ;;  %v3734_v53 = vld [vmem:[#allocation8 + $0x74] ss:$28 sps:$4 sm:$0xff]  }
 0x141   :  { %1089 = vmatpush1.bf16.msra.mxu0 %v3648_v54  ;;  %1171 = vmatpush1.bf16.msra.mxu1 %v3651_v55  ;;  %v3737_v54 = vld [vmem:[#allocation8 + $0x7c] ss:$28 sps:$4 sm:$0xff]   ;;  %v3732_v55 = vld [vmem:[#allocation8 + $0x70] ss:$28 sps:$4 sm:$0xff]  }
 0x142   :  { %1090 = vmatprep.subr.bf16.mxu0 %v3656_v56  ;;  %1172 = vmatprep.subr.bf16.mxu1 %v3659_v57  ;;  %v3735_v56 = vld [vmem:[#allocation8 + $0x78] ss:$28 sps:$4 sm:$0xff]   ;;  %v3740_v57 = vld [vmem:[#allocation8 + $0xac] ss:$28 sps:$4 sm:$0xff]  }
 0x145   :  { %1091 = vmatpush1.bf16.msra.mxu0 %v3654_v58  ;;  %1173 = vmatpush1.bf16.msra.mxu1 %v3657_v59  ;;  %v3743_v58 = vld [vmem:[#allocation8 + $0xb4] ss:$28 sps:$4 sm:$0xff]   ;;  %v3738_v59 = vld [vmem:[#allocation8 + $0xa8] ss:$28 sps:$4 sm:$0xff]  }
 0x146   :  { %1092 = vmatprep.subr.bf16.mxu0 %v3662_v60  ;;  %1174 = vmatprep.subr.bf16.mxu1 %v3665_v61  ;;  %v3741_v60 = vld [vmem:[#allocation8 + $0xb0] ss:$28 sps:$4 sm:$0xff]   ;;  %v3746_v61 = vld [vmem:[#allocation8 + $0xe4] ss:$28 sps:$4 sm:$0xff]  }
 0x149   :  { %1093 = vmatpush1.bf16.msra.mxu0 %v3660_v62  ;;  %1175 = vmatpush1.bf16.msra.mxu1 %v3663_v63  ;;  %v3749_v62 = vld [vmem:[#allocation8 + $0xec] ss:$28 sps:$4 sm:$0xff]   ;;  %v3744_v63 = vld [vmem:[#allocation8 + $0xe0] ss:$28 sps:$4 sm:$0xff]  }
 0x14a   :  { %1094 = vmatprep.subr.bf16.mxu0 %v3668_v0  ;;  %1176 = vmatprep.subr.bf16.mxu1 %v3671_v1  ;;  %v3747_v0 = vld [vmem:[#allocation8 + $0xe8] ss:$28 sps:$4 sm:$0xff]   ;;  %v3752_v1 = vld [vmem:[#allocation8 + $0x11c] ss:$28 sps:$4 sm:$0xff]  }
 0x14d   :  { %1095 = vmatpush1.bf16.msra.mxu0 %v3666_v2  ;;  %1177 = vmatpush1.bf16.msra.mxu1 %v3669_v3  ;;  %v3755_v2 = vld [vmem:[#allocation8 + $0x124] ss:$28 sps:$4 sm:$0xff]   ;;  %v3750_v3 = vld [vmem:[#allocation8 + $0x118] ss:$28 sps:$4 sm:$0xff]  }
 0x14e   :  { %1096 = vmatprep.subr.bf16.mxu0 %v3674_v4  ;;  %1178 = vmatprep.subr.bf16.mxu1 %v3677_v5  ;;  %v3753_v4 = vld [vmem:[#allocation8 + $0x120] ss:$28 sps:$4 sm:$0xff]   ;;  %v3758_v5 = vld [vmem:[#allocation8 + $0x154] ss:$28 sps:$4 sm:$0xff]  }
 0x151   :  { %1097 = vmatpush1.bf16.msra.mxu0 %v3672_v6  ;;  %1179 = vmatpush1.bf16.msra.mxu1 %v3675_v7  ;;  %v3761_v6 = vld [vmem:[#allocation8 + $0x15c] ss:$28 sps:$4 sm:$0xff]   ;;  %v3756_v7 = vld [vmem:[#allocation8 + $0x150] ss:$28 sps:$4 sm:$0xff]  }
 0x152   :  { %1098 = vmatprep.subr.bf16.mxu0 %v3680_v8  ;;  %1180 = vmatprep.subr.bf16.mxu1 %v3683_v9  ;;  %v3759_v8 = vld [vmem:[#allocation8 + $0x158] ss:$28 sps:$4 sm:$0xff]   ;;  %v3764_v9 = vld [vmem:[#allocation8 + $0x18c] ss:$28 sps:$4 sm:$0xff]  }
 0x155   :  { %1099 = vmatpush1.bf16.msra.mxu0 %v3678_v10  ;;  %1181 = vmatpush1.bf16.msra.mxu1 %v3681_v11  ;;  %v3767_v10 = vld [vmem:[#allocation8 + $0x194] ss:$28 sps:$4 sm:$0xff]   ;;  %v3762_v11 = vld [vmem:[#allocation8 + $0x188] ss:$28 sps:$4 sm:$0xff]  }
 0x156   :  { %1100 = vmatprep.subr.bf16.mxu0 %v3686_v12  ;;  %1182 = vmatprep.subr.bf16.mxu1 %v3689_v17  ;;  %v3765_v12 = vld [vmem:[#allocation8 + $0x190] ss:$28 sps:$4 sm:$0xff]   ;;  %v3770_v17 = vld [vmem:[#allocation8 + $0x1c4] ss:$28 sps:$4 sm:$0xff]  }
 0x159   :  { %1101 = vmatpush1.bf16.msra.mxu0 %v3684_v18  ;;  %1183 = vmatpush1.bf16.msra.mxu1 %v3687_v19  ;;  %v3773_v18 = vld [vmem:[#allocation8 + $0x1cc] ss:$28 sps:$4 sm:$0xff]   ;;  %v3768_v19 = vld [vmem:[#allocation8 + $0x1c0] ss:$28 sps:$4 sm:$0xff]  }
 0x15a   :  { %1102 = vmatprep.subr.bf16.mxu0 %v3692_v20  ;;  %1184 = vmatprep.subr.bf16.mxu1 %v3695_v21  ;;  %v3771_v20 = vld [vmem:[#allocation8 + $0x1c8] ss:$28 sps:$4 sm:$0xff]   ;;  %v3776_v21 = vld [vmem:[#allocation8 + $0x1fc] ss:$28 sps:$4 sm:$0xff]  }
 0x15d   :  { %1103 = vmatpush1.bf16.msra.mxu0 %v3690_v22  ;;  %1185 = vmatpush1.bf16.msra.mxu1 %v3693_v23  ;;  %v3779_v22 = vld [vmem:[#allocation8 + $0x204] ss:$28 sps:$4 sm:$0xff]   ;;  %v3774_v23 = vld [vmem:[#allocation8 + $0x1f8] ss:$28 sps:$4 sm:$0xff]  }
 0x15e   :  { %1104 = vmatprep.subr.bf16.mxu0 %v3698_v25  ;;  %1186 = vmatprep.subr.bf16.mxu1 %v3701_v26  ;;  %v3777_v25 = vld [vmem:[#allocation8 + $0x200] ss:$28 sps:$4 sm:$0xff]   ;;  %v3782_v26 = vld [vmem:[#allocation8 + $0x234] ss:$28 sps:$4 sm:$0xff]  }
 0x161   :  { %1105 = vmatpush1.bf16.msra.mxu0 %v3696_v27  ;;  %1187 = vmatpush1.bf16.msra.mxu1 %v3699_v28  ;;  %v3785_v27 = vld [vmem:[#allocation8 + $0x23c] ss:$28 sps:$4 sm:$0xff]   ;;  %v3780_v28 = vld [vmem:[#allocation8 + $0x230] ss:$28 sps:$4 sm:$0xff]  }
 0x162   :  { %1106 = vmatprep.subr.bf16.mxu0 %v3704_v30  ;;  %1188 = vmatprep.subr.bf16.mxu1 %v3707_v31  ;;  %v3783_v30 = vld [vmem:[#allocation8 + $0x238] ss:$28 sps:$4 sm:$0xff]   ;;  %v3788_v31 = vld [vmem:[#allocation8 + $0x26c] ss:$28 sps:$4 sm:$0xff]  }
 0x165   :  { %1107 = vmatpush1.bf16.msra.mxu0 %v3702_v32  ;;  %1189 = vmatpush1.bf16.msra.mxu1 %v3705_v33  ;;  %v3791_v32 = vld [vmem:[#allocation8 + $0x274] ss:$28 sps:$4 sm:$0xff]   ;;  %v3786_v33 = vld [vmem:[#allocation8 + $0x268] ss:$28 sps:$4 sm:$0xff]  }
 0x166   :  { %1108 = vmatprep.subr.bf16.mxu0 %v3710_v36  ;;  %1190 = vmatprep.subr.bf16.mxu1 %v3713_v37  ;;  %v3794_v36 = vld [vmem:[#allocation8 + $0x2a4] ss:$28 sps:$4 sm:$0xff]   ;;  %v3797_v37 = vld [vmem:[#allocation8 + $0x2ac] ss:$28 sps:$4 sm:$0xff]  }
 0x169   :  { %1109 = vmatpush1.bf16.msra.mxu0 %v3708_v38  ;;  %1191 = vmatpush1.bf16.msra.mxu1 %v3711_v39  ;;  %v3792_v38 = vld [vmem:[#allocation8 + $0x2a0] ss:$28 sps:$4 sm:$0xff]   ;;  %v3795_v39 = vld [vmem:[#allocation8 + $0x2a8] ss:$28 sps:$4 sm:$0xff]  }
 0x16a   :  { %1110 = vmatprep.subr.bf16.mxu0 %v3716_v41  ;;  %1192 = vmatprep.subr.bf16.mxu1 %v3719_v42  ;;  %v3803_v41 = vld [vmem:[#allocation8 + $0x2e4] ss:$28 sps:$4 sm:$0xff]   ;;  %v3798_v42 = vld [vmem:[#allocation8 + $0x2d8] ss:$28 sps:$4 sm:$0xff]  }
 0x16d   :  { %1111 = vmatpush1.bf16.msra.mxu0 %v3714_v43  ;;  %1193 = vmatpush1.bf16.msra.mxu1 %v3717_v44  ;;  %v3801_v43 = vld [vmem:[#allocation8 + $0x2e0] ss:$28 sps:$4 sm:$0xff]   ;;  %v3806_v44 = vld [vmem:[#allocation8 + $0x314] ss:$28 sps:$4 sm:$0xff]  }
 0x16e   :  { %2656 = vmatprep.subr.bf16.mxu0 %v3722_v15  ;;  %2738 = vmatprep.subr.bf16.mxu1 %v3725_v46  ;;  %v3804_v15 = vld [vmem:[#allocation8 + $0x310] ss:$28 sps:$4 sm:$0xff]   ;;  %v3807_v46 = vld [vmem:[#allocation8 + $0x318] ss:$28 sps:$4 sm:$0xff]  }
 0x170   :  { %1113 = vmatmul.mubr.bf16.vlgmr.msra.gmra.mrb[0].mxu0 %v247_v49  ;;  %1195 = vmatmul.mubr.bf16.vlgmr.msra.gmra.mrb[8].mxu1 %v247_v49  ;;  %v3810_v49 = vld [vmem:[#allocation8 + $0x348] ss:$28 sps:$4 sm:$0xff]  }
 0x171   :  { %2657 = vmatpush1.bf16.msra.mxu0 %v3720_v47  ;;  %2739 = vmatpush1.bf16.msra.mxu1 %v3723_v48  ;;  %v3812_v47 = vld [vmem:[#allocation8 + $0x34c] ss:$28 sps:$4 sm:$0xff]   ;;  %v3815_v48 = vld [vmem:[#allocation8 + $0x354] ss:$28 sps:$4 sm:$0xff]  }
 0x172   :  { %2658 = vmatprep.subr.bf16.mxu0 %v3728_v35  ;;  %2740 = vmatprep.subr.bf16.mxu1 %v3731_v50  ;;  %v3813_v35 = vld [vmem:[#allocation8 + $0x350] ss:$28 sps:$4 sm:$0xff]   ;;  %v3818_v50 = vld [vmem:[#allocation8 + $0x384] ss:$28 sps:$4 sm:$0xff]  }
 0x175   :  { %2659 = vmatpush1.bf16.msra.mxu0 %v3726_v51  ;;  %2741 = vmatpush1.bf16.msra.mxu1 %v3729_v52  ;;  %v3821_v51 = vld [vmem:[#allocation8 + $0x38c] ss:$28 sps:$4 sm:$0xff]   ;;  %v4355_v52 = vld [vmem:[%s4439_s4] sm:$0xf] }
 0x176   :  { %2660 = vmatprep.subr.bf16.mxu0 %v3734_v53  ;;  %2742 = vmatprep.subr.bf16.mxu1 %v3737_v54  ;;  %v382_v53 = vrot.slane %v4355_v52, %v4325_v14  ;;  %v386_v54 = vrot.slane %v4355_v52, %v4333_v16 }
 0x179   :  { %2661 = vmatpush1.bf16.msra.mxu0 %v3732_v55  ;;  %2743 = vmatpush1.bf16.msra.mxu1 %v3735_v56  ;;  %v394_v55 = vrot.slane %v4355_v52, %v4340_v24 }
 0x17a   :  { %2662 = vmatprep.subr.bf16.mxu0 %v3740_v57  ;;  %2744 = vmatprep.subr.bf16.mxu1 %v3743_v58 }
 0x17d   :  { %2663 = vmatpush1.bf16.msra.mxu0 %v3738_v59  ;;  %2745 = vmatpush1.bf16.msra.mxu1 %v3741_v60 }
 0x17e   :  { %2664 = vmatprep.subr.bf16.mxu0 %v3746_v61  ;;  %2746 = vmatprep.subr.bf16.mxu1 %v3749_v62 }
 0x181   :  { %2665 = vmatpush1.bf16.msra.mxu0 %v3744_v63  ;;  %2747 = vmatpush1.bf16.msra.mxu1 %v3747_v0 }
 0x182   :  { %2666 = vmatprep.subr.bf16.mxu0 %v3752_v1  ;;  %2748 = vmatprep.subr.bf16.mxu1 %v3755_v2 }
 0x185   :  { %2667 = vmatpush1.bf16.msra.mxu0 %v3750_v3  ;;  %2749 = vmatpush1.bf16.msra.mxu1 %v3753_v4 }
 0x186   :  { %2668 = vmatprep.subr.bf16.mxu0 %v3758_v5  ;;  %2750 = vmatprep.subr.bf16.mxu1 %v3761_v6 }
 0x189   :  { %2669 = vmatpush1.bf16.msra.mxu0 %v3756_v7  ;;  %2751 = vmatpush1.bf16.msra.mxu1 %v3759_v8  ;;  %v3816_v7 = vld [vmem:[#allocation8 + $0x380] ss:$28 sps:$4 sm:$0xff]   ;;  %v3819_v8 = vld [vmem:[#allocation8 + $0x388] ss:$28 sps:$4 sm:$0xff]  }
 0x18a   :  { %2670 = vmatprep.subr.bf16.mxu0 %v3764_v9  ;;  %2752 = vmatprep.subr.bf16.mxu1 %v3767_v10  ;;  %v3824_v10 = vld [vmem:[#allocation8 + $0x3bc] ss:$28 sps:$4 sm:$0xff]  }
 0x18d   :  { %2671 = vmatpush1.bf16.msra.mxu0 %v3762_v11  ;;  %2753 = vmatpush1.bf16.msra.mxu1 %v3765_v12  ;;  %v3827_v11 = vld [vmem:[#allocation8 + $0x3c4] ss:$28 sps:$4 sm:$0xff]  }
 0x18e   :  { %2672 = vmatprep.subr.bf16.mxu0 %v3770_v17  ;;  %2754 = vmatprep.subr.bf16.mxu1 %v3773_v18  ;;  %v3822_v17 = vld [vmem:[#allocation8 + $0x3b8] ss:$28 sps:$4 sm:$0xff]   ;;  %v3825_v18 = vld [vmem:[#allocation8 + $0x3c0] ss:$28 sps:$4 sm:$0xff]  }
 0x191   :  { %2673 = vmatpush1.bf16.msra.mxu0 %v3768_v19  ;;  %2755 = vmatpush1.bf16.msra.mxu1 %v3771_v20  ;;  %v3830_v19 = vld [vmem:[#allocation8 + $0x3f4] ss:$28 sps:$4 sm:$0xff]   ;;  %v3833_v20 = vld [vmem:[#allocation8 + $0x3fc] ss:$28 sps:$4 sm:$0xff]  }
 0x192   :  { %2674 = vmatprep.subr.bf16.mxu0 %v3776_v21  ;;  %2756 = vmatprep.subr.bf16.mxu1 %v3779_v22  ;;  %v3828_v21 = vld [vmem:[#allocation8 + $0x3f0] ss:$28 sps:$4 sm:$0xff]   ;;  %v3831_v22 = vld [vmem:[#allocation8 + $0x3f8] ss:$28 sps:$4 sm:$0xff]  }
 0x195   :  { %2675 = vmatpush1.bf16.msra.mxu0 %v3774_v23  ;;  %2757 = vmatpush1.bf16.msra.mxu1 %v3777_v25  ;;  %v3836_v23 = vld [vmem:[#allocation8 + $0x42c] ss:$28 sps:$4 sm:$0xff]   ;;  %v3839_v25 = vld [vmem:[#allocation8 + $0x434] ss:$28 sps:$4 sm:$0xff]  }
 0x196   :  { %2676 = vmatprep.subr.bf16.mxu0 %v3782_v26  ;;  %2758 = vmatprep.subr.bf16.mxu1 %v3785_v27  ;;  %v3834_v26 = vld [vmem:[#allocation8 + $0x428] ss:$28 sps:$4 sm:$0xff]   ;;  %v3837_v27 = vld [vmem:[#allocation8 + $0x430] ss:$28 sps:$4 sm:$0xff]  }
 0x199   :  { %2677 = vmatpush1.bf16.msra.mxu0 %v3780_v28  ;;  %2759 = vmatpush1.bf16.msra.mxu1 %v3783_v30  ;;  %v3842_v28 = vld [vmem:[#allocation8 + $0x464] ss:$28 sps:$4 sm:$0xff]   ;;  %v3845_v30 = vld [vmem:[#allocation8 + $0x46c] ss:$28 sps:$4 sm:$0xff]  }
 0x19a   :  { %2678 = vmatprep.subr.bf16.mxu0 %v3788_v31  ;;  %2760 = vmatprep.subr.bf16.mxu1 %v3791_v32  ;;  %v3840_v31 = vld [vmem:[#allocation8 + $0x460] ss:$28 sps:$4 sm:$0xff]   ;;  %v3843_v32 = vld [vmem:[#allocation8 + $0x468] ss:$28 sps:$4 sm:$0xff]  }
 0x19d   :  { %2679 = vmatpush1.bf16.msra.mxu0 %v3786_v33  ;;  %2761 = vmatpush1.bf16.msra.mxu1 %v3789_v34  ;;  %v3848_v33 = vld [vmem:[#allocation8 + $0x49c] ss:$28 sps:$4 sm:$0xff]   ;;  %v3851_v34 = vld [vmem:[#allocation8 + $0x4a4] ss:$28 sps:$4 sm:$0xff]  }
 0x19e   :  { %2680 = vmatprep.subr.bf16.mxu0 %v3794_v36  ;;  %2762 = vmatprep.subr.bf16.mxu1 %v3797_v37  ;;  %v3846_v36 = vld [vmem:[#allocation8 + $0x498] ss:$28 sps:$4 sm:$0xff]   ;;  %v3849_v37 = vld [vmem:[#allocation8 + $0x4a0] ss:$28 sps:$4 sm:$0xff]  }
 0x1a1   :  { %2681 = vmatpush1.bf16.msra.mxu0 %v3792_v38  ;;  %2763 = vmatpush1.bf16.msra.mxu1 %v3795_v39  ;;  %v3854_v38 = vld [vmem:[#allocation8 + $0x4d4] ss:$28 sps:$4 sm:$0xff]   ;;  %v3857_v39 = vld [vmem:[#allocation8 + $0x4dc] ss:$28 sps:$4 sm:$0xff]  }
 0x1a2   :  { %2682 = vmatprep.subr.bf16.mxu0 %v3800_v40  ;;  %2764 = vmatprep.subr.bf16.mxu1 %v3803_v41  ;;  %v3852_v40 = vld [vmem:[#allocation8 + $0x4d0] ss:$28 sps:$4 sm:$0xff]   ;;  %v3855_v41 = vld [vmem:[#allocation8 + $0x4d8] ss:$28 sps:$4 sm:$0xff]  }
 0x1a5   :  { %2683 = vmatpush1.bf16.msra.mxu0 %v3798_v42  ;;  %2765 = vmatpush1.bf16.msra.mxu1 %v3801_v43  ;;  %v3860_v42 = vld [vmem:[#allocation8 + $0x50c] ss:$28 sps:$4 sm:$0xff]   ;;  %v3863_v43 = vld [vmem:[#allocation8 + $0x514] ss:$28 sps:$4 sm:$0xff]  }
 0x1a6   :  { %2684 = vmatprep.subr.bf16.mxu0 %v3806_v44  ;;  %2766 = vmatprep.subr.bf16.mxu1 %v3809_v45  ;;  %v3858_v44 = vld [vmem:[#allocation8 + $0x508] ss:$28 sps:$4 sm:$0xff]   ;;  %v3861_v45 = vld [vmem:[#allocation8 + $0x510] ss:$28 sps:$4 sm:$0xff]  }
 0x1a9   :  { %2685 = vmatpush1.bf16.msra.mxu0 %v3804_v15  ;;  %2767 = vmatpush1.bf16.msra.mxu1 %v3807_v46  ;;  %v3866_v15 = vld [vmem:[#allocation8 + $0x544] ss:$28 sps:$4 sm:$0xff]   ;;  %v3869_v46 = vld [vmem:[#allocation8 + $0x54c] ss:$28 sps:$4 sm:$0xff]  }
 0x1aa   :  { %2686 = vmatprep.subr.bf16.mxu0 %v3812_v47  ;;  %2768 = vmatprep.subr.bf16.mxu1 %v3815_v48  ;;  %v3864_v47 = vld [vmem:[#allocation8 + $0x540] ss:$28 sps:$4 sm:$0xff]   ;;  %v3867_v48 = vld [vmem:[#allocation8 + $0x548] ss:$28 sps:$4 sm:$0xff]  }
 0x1ad   :  { %2687 = vmatpush1.bf16.msra.mxu0 %v3810_v49  ;;  %2769 = vmatpush1.bf16.msra.mxu1 %v3813_v35  ;;  %v3872_v49 = vld [vmem:[#allocation8 + $0x57c] ss:$28 sps:$4 sm:$0xff]   ;;  %v3875_v35 = vld [vmem:[#allocation8 + $0x584] ss:$28 sps:$4 sm:$0xff]  }
 0x1ae   :  { %2697 = vmatprep.subr.bf16.mxu0 %v3818_v50  ;;  %2779 = vmatprep.subr.bf16.mxu1 %v3821_v51  ;;  %v3870_v50 = vld [vmem:[#allocation8 + $0x578] ss:$28 sps:$4 sm:$0xff]   ;;  %v3873_v51 = vld [vmem:[#allocation8 + $0x580] ss:$28 sps:$4 sm:$0xff]  }
 0x243   :  { %v1114_v56 = vpop.f32.mrb[0].mxu0  ;;  %v4363_v57 = vpop.f32.mrb[8].mxu1 }
 0x244   :  { %v3475_v58 = vadd.f32 %v1114_v56, %v382_v53  ;;  %v1116_v59 = vpop.f32.mrb[1].mxu0  ;;  %v1198_v60 = vpop.f32.mrb[9].mxu1  ;;  %v3878_v53 = vld [vmem:[#allocation8 + $0x5b4] ss:$28 sps:$4 sm:$0xff]  }
 0x245   :  { %v3476_v61 = vadd.f32 %v1116_v59, %v386_v54  ;;  %v3478_v62 = vadd.f32 %v1198_v60, %v394_v55  ;;  %v1118_v63 = vpop.f32.mrb[2].mxu0  ;;  %v1200_v0 = vpop.f32.mrb[10].mxu1  ;;  %v3881_v54 = vld [vmem:[#allocation8 + $0x5bc] ss:$28 sps:$4 sm:$0xff]   ;;  %v3876_v55 = vld [vmem:[#allocation8 + $0x5b0] ss:$28 sps:$4 sm:$0xff]  }
 0x246   :  { %v1203_v1 = vmax.f32 %v3475_v58, 0.0  ;;  %v1119_v2 = vpop.f32.mrb[3].mxu0  ;;  %v1201_v3 = vpop.f32.mrb[11].mxu1  ;;  %v3879_v56 = vld [vmem:[#allocation8 + $0x5b8] ss:$28 sps:$4 sm:$0xff]  }
 0x247   :  { %v1204_v4 = vmax.f32 %v3476_v61, 0.0  ;;  %v1206_v5 = vmax.f32 %v3478_v62, 0.0  ;;  %v3884_v58 = vld [vmem:[#allocation8 + $0x5ec] ss:$28 sps:$4 sm:$0xff]   ;;  %v3887_v59 = vld [vmem:[#allocation8 + $0x5f4] ss:$28 sps:$4 sm:$0xff]  }
 0x248   :  { %v4367_v9 = vpack.c.bf16 %v1203_v1, %v1203_v1  ;;  %v3882_v60 = vld [vmem:[#allocation8 + $0x5e8] ss:$28 sps:$4 sm:$0xff]   ;;  %v3885_v61 = vld [vmem:[#allocation8 + $0x5f0] ss:$28 sps:$4 sm:$0xff]   ;;  %v3888_v0 = vld [vmem:[#allocation8 + $0x620] ss:$28 sps:$4 sm:$0xff]  }
 0x249   :  { %v4365_v6 = vpack.c.bf16 %v1204_v4, %v1204_v4  ;;  %v4371_v12 = vpack.c.bf16 %v1206_v5, %v1206_v5  ;;  %v3890_v62 = vld [vmem:[#allocation8 + $0x624] ss:$28 sps:$4 sm:$0xff]   ;;  %v3893_v63 = vld [vmem:[#allocation8 + $0x62c] ss:$28 sps:$4 sm:$0xff]   ;;  %v3896_v2 = vld [vmem:[#allocation8 + $0x65c] ss:$28 sps:$4 sm:$0xff]  }
 0x24a   :  { %v3891_v1 = vld [vmem:[#allocation8 + $0x628] ss:$28 sps:$4 sm:$0xff]   ;;  %v3894_v4 = vld [vmem:[#allocation8 + $0x658] ss:$28 sps:$4 sm:$0xff]   ;;  %v3897_v5 = vld [vmem:[#allocation8 + $0x660] ss:$28 sps:$4 sm:$0xff]  }
 0x24b   :  { %2688 = vmatprep.mubr.bf16.mxu0 %v4365_v6  ;;  %2770 = vmatprep.mubr.bf16.mxu1 %v4365_v6  ;;  %v3899_v3 = vld [vmem:[#allocation8 + $0x664] ss:$28 sps:$4 sm:$0xff]  }
 0x24c   :  { %2689 = vmatmul.mubr.bf16.vlgmr.msra.gmra.mrb[4].mxu0 %v4367_v9  ;;  %2771 = vmatmul.mubr.bf16.vlgmr.msra.gmra.mrb[12].mxu1 %v4367_v9 }
 0x24d   :  { %2698 = vmatpush1.bf16.msra.mxu0 %v3816_v7  ;;  %2780 = vmatpush1.bf16.msra.mxu1 %v3819_v8  ;;  %v390_v7 = vrot.slane %v4355_v52, %v4347_v29  ;;  %v3902_v8 = vld [vmem:[#allocation8 + $0x694] ss:$28 sps:$4 sm:$0xff]  }
 0x24e   :  { %2729 = vmatprep.mubr.bf16.mxu0 %v4371_v12  ;;  %2811 = vmatprep.mubr.bf16.mxu1 %v4371_v12  ;;  %v3914_v52 = vld [vmem:[#allocation8 + $0x14] ss:$28 sps:$4 sm:$0xff]  }
 0x24f   :  { %2699 = vmatprep.subr.bf16.mxu0 %v3824_v10  ;;  %2781 = vmatprep.subr.bf16.mxu1 %v3827_v11  ;;  %v3905_v10 = vld [vmem:[#allocation8 + $0x69c] ss:$28 sps:$4 sm:$0xff]   ;;  %v3900_v11 = vld [vmem:[#allocation8 + $0x690] ss:$28 sps:$4 sm:$0xff]  }
 0x251   :  { %2700 = vmatpush1.bf16.msra.mxu0 %v3822_v17  ;;  %2782 = vmatpush1.bf16.msra.mxu1 %v3825_v18  ;;  %v3903_v17 = vld [vmem:[#allocation8 + $0x698] ss:$28 sps:$4 sm:$0xff]   ;;  %v3477_v18 = vadd.f32 %v4363_v57, %v390_v7  ;;  %v3970_v7 = vld [vmem:[#allocation8 + $0x600] ss:$28 sps:$4 sm:$0xff]  }
 0x252   :  { %2701 = vmatprep.subr.bf16.mxu0 %v3830_v19  ;;  %2783 = vmatprep.subr.bf16.mxu1 %v3833_v20  ;;  %v3908_v19 = vld [vmem:[#allocation8 + $0x6cc] ss:$28 sps:$4 sm:$0xff]   ;;  %v3911_v20 = vld [vmem:[#allocation8 + $0x6d4] ss:$28 sps:$4 sm:$0xff]  }
 0x253   :  { %v3916_v57 = vld [vmem:[#allocation8 + $0x18] ss:$28 sps:$4 sm:$0xff]  }
 0x255   :  { %2702 = vmatpush1.bf16.msra.mxu0 %v3828_v21  ;;  %2784 = vmatpush1.bf16.msra.mxu1 %v3831_v22  ;;  %v3906_v21 = vld [vmem:[#allocation8 + $0x6c8] ss:$28 sps:$4 sm:$0xff]   ;;  %v3909_v22 = vld [vmem:[#allocation8 + $0x6d0] ss:$28 sps:$4 sm:$0xff]  }
 0x256   :  { %2703 = vmatprep.subr.bf16.mxu0 %v3836_v23  ;;  %2785 = vmatprep.subr.bf16.mxu1 %v3839_v25  ;;  %v1205_v23 = vmax.f32 %v3477_v18, 0.0  ;;  %v3915_v25 = vld [vmem:[#allocation8 + $0x1d8] ss:$28 sps:$4 sm:$0xff]   ;;  %v3972_v18 = vld [vmem:[#allocation8 + $0x2b0] ss:$28 sps:$4 sm:$0xff]  }
 0x259   :  { %2704 = vmatpush1.bf16.msra.mxu0 %v3834_v26  ;;  %2786 = vmatpush1.bf16.msra.mxu1 %v3837_v27  ;;  %v3912_v26 = vld [vmem:[#allocation8 + $0x10] ss:$28 sps:$4 sm:$0xff]   ;;  %v4380_v27 = vpack.c.bf16 %v1205_v23, %v1205_v23 }
 0x25a   :  { %2705 = vmatprep.subr.bf16.mxu0 %v3842_v28  ;;  %2787 = vmatprep.subr.bf16.mxu1 %v3845_v30  ;;  %v3919_v28 = vld [vmem:[#allocation8 + $0x4c] ss:$28 sps:$4 sm:$0xff]  }
 0x25b   :  { %v3920_v30 = vld [vmem:[#allocation8 + $0x210] ss:$28 sps:$4 sm:$0xff]  }
 0x25c   :  { %v3981_v23 = vld [vmem:[#allocation8 + $0x4b0] ss:$28 sps:$4 sm:$0xff]  }
 0x25d   :  { %2706 = vmatpush1.bf16.msra.mxu0 %v3840_v31  ;;  %2788 = vmatpush1.bf16.msra.mxu1 %v3843_v32  ;;  %v3917_v31 = vld [vmem:[#allocation8 + $0x48] ss:$28 sps:$4 sm:$0xff]   ;;  %v3921_v32 = vld [vmem:[#allocation8 + $0x50] ss:$28 sps:$4 sm:$0xff]  }
 0x25e   :  { %2707 = vmatprep.subr.bf16.mxu0 %v3848_v33  ;;  %2789 = vmatprep.subr.bf16.mxu1 %v3851_v34  ;;  %v3924_v33 = vld [vmem:[#allocation8 + $0x84] ss:$28 sps:$4 sm:$0xff]  }
 0x25f   :  { %v3925_v34 = vld [vmem:[#allocation8 + $0x248] ss:$28 sps:$4 sm:$0xff]  }
 0x261   :  { %2708 = vmatpush1.bf16.msra.mxu0 %v3846_v36  ;;  %2790 = vmatpush1.bf16.msra.mxu1 %v3849_v37  ;;  %v3922_v36 = vld [vmem:[#allocation8 + $0x80] ss:$28 sps:$4 sm:$0xff]   ;;  %v3926_v37 = vld [vmem:[#allocation8 + $0x88] ss:$28 sps:$4 sm:$0xff]  }
 0x262   :  { %2709 = vmatprep.subr.bf16.mxu0 %v3854_v38  ;;  %2791 = vmatprep.subr.bf16.mxu1 %v3857_v39  ;;  %v3929_v38 = vld [vmem:[#allocation8 + $0xbc] ss:$28 sps:$4 sm:$0xff]  }
 0x263   :  { %v3930_v39 = vld [vmem:[#allocation8 + $0x280] ss:$28 sps:$4 sm:$0xff]  }
 0x265   :  { %2710 = vmatpush1.bf16.msra.mxu0 %v3852_v40  ;;  %2792 = vmatpush1.bf16.msra.mxu1 %v3855_v41  ;;  %v3927_v40 = vld [vmem:[#allocation8 + $0xb8] ss:$28 sps:$4 sm:$0xff]   ;;  %v3931_v41 = vld [vmem:[#allocation8 + $0xc0] ss:$28 sps:$4 sm:$0xff]  }
 0x266   :  { %2711 = vmatprep.subr.bf16.mxu0 %v3860_v42  ;;  %2793 = vmatprep.subr.bf16.mxu1 %v3863_v43  ;;  %v3934_v42 = vld [vmem:[#allocation8 + $0xf4] ss:$28 sps:$4 sm:$0xff]  }
 0x267   :  { %v3932_v43 = vld [vmem:[#allocation8 + $0xf0] ss:$28 sps:$4 sm:$0xff]  }
 0x269   :  { %2712 = vmatpush1.bf16.msra.mxu0 %v3858_v44  ;;  %2794 = vmatpush1.bf16.msra.mxu1 %v3861_v45  ;;  %v3936_v44 = vld [vmem:[#allocation8 + $0xf8] ss:$28 sps:$4 sm:$0xff]   ;;  %v3939_v45 = vld [vmem:[#allocation8 + $0x12c] ss:$28 sps:$4 sm:$0xff]  }
 0x26a   :  { %2713 = vmatprep.subr.bf16.mxu0 %v3866_v15  ;;  %2795 = vmatprep.subr.bf16.mxu1 %v3869_v46  ;;  %v3940_v15 = vld [vmem:[#allocation8 + $0x2f0] ss:$28 sps:$4 sm:$0xff]   ;;  %v3937_v46 = vld [vmem:[#allocation8 + $0x128] ss:$28 sps:$4 sm:$0xff]  }
 0x26d   :  { %2714 = vmatpush1.bf16.msra.mxu0 %v3864_v47  ;;  %2796 = vmatpush1.bf16.msra.mxu1 %v3867_v48  ;;  %v3941_v47 = vld [vmem:[#allocation8 + $0x130] ss:$28 sps:$4 sm:$0xff]   ;;  %v3944_v48 = vld [vmem:[#allocation8 + $0x164] ss:$28 sps:$4 sm:$0xff]  }
 0x26e   :  { %2715 = vmatprep.subr.bf16.mxu0 %v3872_v49  ;;  %2797 = vmatprep.subr.bf16.mxu1 %v3875_v35  ;;  %v3945_v49 = vld [vmem:[#allocation8 + $0x328] ss:$28 sps:$4 sm:$0xff]   ;;  %v3942_v35 = vld [vmem:[#allocation8 + $0x160] ss:$28 sps:$4 sm:$0xff]  }
 0x271   :  { %2716 = vmatpush1.bf16.msra.mxu0 %v3870_v50  ;;  %2798 = vmatpush1.bf16.msra.mxu1 %v3873_v51  ;;  %v3946_v50 = vld [vmem:[#allocation8 + $0x168] ss:$28 sps:$4 sm:$0xff]   ;;  %v3949_v51 = vld [vmem:[#allocation8 + $0x19c] ss:$28 sps:$4 sm:$0xff]  }
 0x272   :  { %2717 = vmatprep.subr.bf16.mxu0 %v3878_v53  ;;  %2799 = vmatprep.subr.bf16.mxu1 %v3881_v54  ;;  %v3950_v53 = vld [vmem:[#allocation8 + $0x360] ss:$28 sps:$4 sm:$0xff]   ;;  %v3947_v54 = vld [vmem:[#allocation8 + $0x198] ss:$28 sps:$4 sm:$0xff]  }
 0x275   :  { %2718 = vmatpush1.bf16.msra.mxu0 %v3876_v55  ;;  %2800 = vmatpush1.bf16.msra.mxu1 %v3879_v56  ;;  %v3951_v55 = vld [vmem:[#allocation8 + $0x1a0] ss:$28 sps:$4 sm:$0xff]   ;;  %v3954_v56 = vld [vmem:[#allocation8 + $0x1d4] ss:$28 sps:$4 sm:$0xff]  }
 0x276   :  { %2719 = vmatprep.subr.bf16.mxu0 %v3884_v58  ;;  %2801 = vmatprep.subr.bf16.mxu1 %v3887_v59  ;;  %v3955_v58 = vld [vmem:[#allocation8 + $0x558] ss:$28 sps:$4 sm:$0xff]   ;;  %v3952_v59 = vld [vmem:[#allocation8 + $0x1d0] ss:$28 sps:$4 sm:$0xff]  }
 0x279   :  { %2720 = vmatpush1.bf16.msra.mxu0 %v3882_v60  ;;  %2802 = vmatpush1.bf16.msra.mxu1 %v3885_v61  ;;  %v3956_v60 = vld [vmem:[#allocation8 + $0x398] ss:$28 sps:$4 sm:$0xff]   ;;  %v3959_v61 = vld [vmem:[#allocation8 + $0x20c] ss:$28 sps:$4 sm:$0xff]  }
 0x27a   :  { %2721 = vmatprep.subr.bf16.mxu0 %v3890_v62  ;;  %2803 = vmatprep.subr.bf16.mxu1 %v3893_v63  ;;  %v3960_v62 = vld [vmem:[#allocation8 + $0x590] ss:$28 sps:$4 sm:$0xff]   ;;  %v3957_v63 = vld [vmem:[#allocation8 + $0x208] ss:$28 sps:$4 sm:$0xff]  }
 0x27d   :  { %2722 = vmatpush1.bf16.msra.mxu0 %v3888_v0  ;;  %2804 = vmatpush1.bf16.msra.mxu1 %v3891_v1  ;;  %v3961_v0 = vld [vmem:[#allocation8 + $0x3d0] ss:$28 sps:$4 sm:$0xff]   ;;  %v3964_v1 = vld [vmem:[#allocation8 + $0x244] ss:$28 sps:$4 sm:$0xff]  }
 0x27e   :  { %2723 = vmatprep.subr.bf16.mxu0 %v3896_v2  ;;  %2805 = vmatprep.subr.bf16.mxu1 %v3899_v3  ;;  %v3965_v2 = vld [vmem:[#allocation8 + $0x5c8] ss:$28 sps:$4 sm:$0xff]   ;;  %v3962_v3 = vld [vmem:[#allocation8 + $0x240] ss:$28 sps:$4 sm:$0xff]  }
 0x281   :  { %2724 = vmatpush1.bf16.msra.mxu0 %v3894_v4  ;;  %2806 = vmatpush1.bf16.msra.mxu1 %v3897_v5  ;;  %v3966_v4 = vld [vmem:[#allocation8 + $0x408] ss:$28 sps:$4 sm:$0xff]   ;;  %v3969_v5 = vld [vmem:[#allocation8 + $0x27c] ss:$28 sps:$4 sm:$0xff]  }
 0x282   :  { %2725 = vmatprep.subr.bf16.mxu0 %v3902_v8  ;;  %2807 = vmatprep.subr.bf16.mxu1 %v3905_v10  ;;  %v3967_v8 = vld [vmem:[#allocation8 + $0x278] ss:$28 sps:$4 sm:$0xff]   ;;  %v3971_v10 = vld [vmem:[#allocation8 + $0x440] ss:$28 sps:$4 sm:$0xff]  }
 0x285   :  { %2726 = vmatpush1.bf16.msra.mxu0 %v3900_v11  ;;  %2808 = vmatpush1.bf16.msra.mxu1 %v3903_v17  ;;  %v3974_v11 = vld [vmem:[#allocation8 + $0x2b4] ss:$28 sps:$4 sm:$0xff]  }
 0x286   :  { %2727 = vmatprep.subr.bf16.mxu0 %v3908_v19  ;;  %2809 = vmatprep.subr.bf16.mxu1 %v3911_v20  ;;  %v3975_v17 = vld [vmem:[#allocation8 + $0x638] ss:$28 sps:$4 sm:$0xff]   ;;  %v3979_v20 = vld [vmem:[#allocation8 + $0x2ec] ss:$28 sps:$4 sm:$0xff]  }
 0x287   :  { %v3976_v19 = vld [vmem:[#allocation8 + $0x478] ss:$28 sps:$4 sm:$0xff]  }
 0x289   :  { %2728 = vmatpush1.bf16.msra.mxu0 %v3906_v21  ;;  %2810 = vmatpush1.bf16.msra.mxu1 %v3909_v22  ;;  %v3980_v21 = vld [vmem:[#allocation8 + $0x670] ss:$28 sps:$4 sm:$0xff]   ;;  %v3977_v22 = vld [vmem:[#allocation8 + $0x2e8] ss:$28 sps:$4 sm:$0xff]  }
 0x28a   :  { %2820 = vmatprep.subr.bf16.mxu0 %v3914_v52  ;;  %3431 = vmatprep.subr.bf16.mxu1 %v3915_v25  ;;  %v3984_v52 = vld [vmem:[#allocation8 + $0x324] ss:$28 sps:$4 sm:$0xff]  }
 0x28b   :  { %v3985_v25 = vld [vmem:[#allocation8 + $0x6a8] ss:$28 sps:$4 sm:$0xff]  }
 0x28c   :  { %2730 = vmatmul.mubr.bf16.vlgmr.msra.gmra.mrb[4].mxu0 %v4380_v27  ;;  %2812 = vmatmul.mubr.bf16.vlgmr.msra.gmra.mrb[12].mxu1 %v4380_v27 }
 0x28d   :  { %2821 = vmatpush1.bf16.msra.mxu0 %v3912_v26  ;;  %2852 = vmatprep.mubr.bf16.mxu0 %v4365_v6  ;;  %v3982_v26 = vld [vmem:[#allocation8 + $0x320] ss:$28 sps:$4 sm:$0xff]  }
 0x28e   :  { %3432 = vmatpush3.bf16.msra.mxu1 %v3916_v57  ;;  %2934 = vmatprep.mubr.bf16.mxu1 %v4365_v6  ;;  %v3935_v6 = vld [vmem:[#allocation8 + $0x2b8] ss:$28 sps:$4 sm:$0xff]   ;;  %v3986_v57 = vld [vmem:[#allocation8 + $0x4e8] ss:$28 sps:$4 sm:$0xff]  }
 0x28f   :  { %2822 = vmatprep.subr.bf16.mxu0 %v3919_v28  ;;  %3433 = vmatprep.subr.bf16.mxu1 %v3920_v30  ;;  %v3989_v28 = vld [vmem:[#allocation8 + $0x35c] ss:$28 sps:$4 sm:$0xff]  }
 0x290   :  { %v3990_v30 = vld [vmem:[#allocation8 + $0x6e0] ss:$28 sps:$4 sm:$0xff]  }
 0x291   :  { %2823 = vmatpush1.bf16.msra.mxu0 %v3917_v31  ;;  %v3987_v31 = vld [vmem:[#allocation8 + $0x358] ss:$28 sps:$4 sm:$0xff]  }
 0x292   :  { %3434 = vmatpush3.bf16.msra.mxu1 %v3921_v32  ;;  %2824 = vmatprep.subr.bf16.mxu0 %v3924_v33  ;;  %v3991_v32 = vld [vmem:[#allocation8 + $0x520] ss:$28 sps:$4 sm:$0xff]   ;;  %v3994_v33 = vld [vmem:[#allocation8 + $0x394] ss:$28 sps:$4 sm:$0xff]  }
 0x293   :  { %3435 = vmatprep.subr.bf16.mxu1 %v3925_v34  ;;  %v3992_v34 = vld [vmem:[#allocation8 + $0x390] ss:$28 sps:$4 sm:$0xff]  }
 0x295   :  { %2825 = vmatpush1.bf16.msra.mxu0 %v3922_v36  ;;  %v3997_v36 = vld [vmem:[#allocation8 + $0x3cc] ss:$28 sps:$4 sm:$0xff]  }
 0x296   :  { %3436 = vmatpush3.bf16.msra.mxu1 %v3926_v37  ;;  %2826 = vmatprep.subr.bf16.mxu0 %v3929_v38  ;;  %v3995_v37 = vld [vmem:[#allocation8 + $0x3c8] ss:$28 sps:$4 sm:$0xff]  }
 0x297   :  { %3437 = vmatprep.subr.bf16.mxu1 %v3930_v39  ;;  %v4000_v38 = vld [vmem:[#allocation8 + $0x404] ss:$28 sps:$4 sm:$0xff]  }
 0x298   :  { %v3998_v39 = vld [vmem:[#allocation8 + $0x400] ss:$28 sps:$4 sm:$0xff]  }
 0x299   :  { %2827 = vmatpush1.bf16.msra.mxu0 %v3927_v40  ;;  %v4003_v40 = vld [vmem:[#allocation8 + $0x43c] ss:$28 sps:$4 sm:$0xff]  }
 0x29a   :  { %3438 = vmatpush3.bf16.msra.mxu1 %v3931_v41  ;;  %2828 = vmatprep.subr.bf16.mxu0 %v3934_v42  ;;  %v4001_v41 = vld [vmem:[#allocation8 + $0x438] ss:$28 sps:$4 sm:$0xff]  }
 0x29b   :  { %3439 = vmatprep.subr.bf16.mxu1 %v3935_v6  ;;  %v4006_v42 = vld [vmem:[#allocation8 + $0x474] ss:$28 sps:$4 sm:$0xff]  }
 0x29c   :  { %v4004_v6 = vld [vmem:[#allocation8 + $0x470] ss:$28 sps:$4 sm:$0xff]  }
 0x29d   :  { %2829 = vmatpush1.bf16.msra.mxu0 %v3932_v43  ;;  %v4007_v43 = vld [vmem:[#allocation8 + $0x4a8] ss:$28 sps:$4 sm:$0xff]  }
 0x29e   :  { %3440 = vmatpush3.bf16.msra.mxu1 %v3936_v44  ;;  %2830 = vmatprep.subr.bf16.mxu0 %v3939_v45  ;;  %v4012_v44 = vld [vmem:[#allocation8 + $0x4e4] ss:$28 sps:$4 sm:$0xff]   ;;  %v4015_v45 = vld [vmem:[#allocation8 + $0x51c] ss:$28 sps:$4 sm:$0xff]  }
 0x29f   :  { %3441 = vmatprep.subr.bf16.mxu1 %v3940_v15  ;;  %v4013_v15 = vld [vmem:[#allocation8 + $0x518] ss:$28 sps:$4 sm:$0xff]  }
 0x2a1   :  { %2831 = vmatpush1.bf16.msra.mxu0 %v3937_v46  ;;  %v4018_v46 = vld [vmem:[#allocation8 + $0x554] ss:$28 sps:$4 sm:$0xff]  }
 0x2a2   :  { %3442 = vmatpush3.bf16.msra.mxu1 %v3941_v47  ;;  %2832 = vmatprep.subr.bf16.mxu0 %v3944_v48  ;;  %v4016_v47 = vld [vmem:[#allocation8 + $0x550] ss:$28 sps:$4 sm:$0xff]  }
 0x2a3   :  { %3443 = vmatprep.subr.bf16.mxu1 %v3945_v49  ;;  %v4021_v48 = vld [vmem:[#allocation8 + $0x58c] ss:$28 sps:$4 sm:$0xff]  }
 0x2a4   :  { %v4019_v49 = vld [vmem:[#allocation8 + $0x588] ss:$28 sps:$4 sm:$0xff]  }
 0x2a5   :  { %2833 = vmatpush1.bf16.msra.mxu0 %v3942_v35  ;;  %v4024_v35 = vld [vmem:[#allocation8 + $0x5c4] ss:$28 sps:$4 sm:$0xff]  }
 0x2a6   :  { %3444 = vmatpush3.bf16.msra.mxu1 %v3946_v50  ;;  %2834 = vmatprep.subr.bf16.mxu0 %v3949_v51  ;;  %v4022_v50 = vld [vmem:[#allocation8 + $0x5c0] ss:$28 sps:$4 sm:$0xff]  }
 0x2a7   :  { %3445 = vmatprep.subr.bf16.mxu1 %v3950_v53  ;;  %v4027_v51 = vld [vmem:[#allocation8 + $0x5fc] ss:$28 sps:$4 sm:$0xff]  }
 0x2a8   :  { %v4025_v53 = vld [vmem:[#allocation8 + $0x5f8] ss:$28 sps:$4 sm:$0xff]  }
 0x2a9   :  { %2835 = vmatpush1.bf16.msra.mxu0 %v3947_v54  ;;  %v4030_v54 = vld [vmem:[#allocation8 + $0x634] ss:$28 sps:$4 sm:$0xff]  }
 0x2aa   :  { %3446 = vmatpush3.bf16.msra.mxu1 %v3951_v55  ;;  %2836 = vmatprep.subr.bf16.mxu0 %v3954_v56  ;;  %v4028_v55 = vld [vmem:[#allocation8 + $0x630] ss:$28 sps:$4 sm:$0xff]  }
 0x2ab   :  { %3453 = vmatprep.subr.bf16.mxu1 %v3955_v58  ;;  %v4033_v56 = vld [vmem:[#allocation8 + $0x66c] ss:$28 sps:$4 sm:$0xff]  }
 0x2ac   :  { %v4031_v58 = vld [vmem:[#allocation8 + $0x668] ss:$28 sps:$4 sm:$0xff]  }
 0x2ad   :  { %2935 = vmatmul.mubr.bf16.vlgmr.msra.gmra.mrb[16].mxu1 %v4367_v9  ;;  %2837 = vmatpush1.bf16.msra.mxu0 %v3952_v59  ;;  %v4036_v59 = vld [vmem:[#allocation8 + $0x6a4] ss:$28 sps:$4 sm:$0xff]  }
 0x2ae   :  { %3454 = vmatpush3.bf16.msra.mxu1 %v3956_v60  ;;  %2974 = vmatprep.mubr.bf16.mxu1 %v4371_v12  ;;  %v4034_v60 = vld [vmem:[#allocation8 + $0x6a0] ss:$28 sps:$4 sm:$0xff]  }
 0x2af   :  { %2838 = vmatprep.subr.bf16.mxu0 %v3959_v61  ;;  %3455 = vmatprep.subr.bf16.mxu1 %v3960_v62  ;;  %v4039_v61 = vld [vmem:[#allocation8 + $0x6dc] ss:$28 sps:$4 sm:$0xff]  }
 0x2b0   :  { %v4037_v62 = vld [vmem:[#allocation8 + $0x6d8] ss:$28 sps:$4 sm:$0xff]  }
 0x2b1   :  { %2839 = vmatpush1.bf16.msra.mxu0 %v3957_v63  ;;  %v4395_v63 = vld [vmem:[%s4441_s6] sm:$0xff]  ;;  %s4219_s6 = smov [#allocation10]  }
 0x2b2   :  { %3456 = vmatpush3.bf16.msra.mxu1 %v3961_v0  ;;  %2840 = vmatprep.subr.bf16.mxu0 %v3964_v1  ;;  %v1472_v0 = vrot.slane %v4395_v63, %v4325_v14  ;;  %v1480_v1 = vrot.slane %v4395_v63, %v4347_v29  ;;  %s3044_s12 = sshll.u32 %s4219_s6, 4  ;;  %s3045_s12 = int_to_ptr.vmem [resolvable:$true] %s3044_s12 }
 0x2b3   :  { %3457 = vmatprep.subr.bf16.mxu1 %v3965_v2  ;;  %v1476_v2 = vrot.slane %v4395_v63, %v4333_v16  ;;  %s4156_s13 = scalar_lea.vmem %s3045_s12, 896  ;;  %p4161_p5 = scmp.lt.s32.totalorder %s3045_s12, %s3045_s12 }
 0x2b4   :  { %p4157_p4 = scmp.ne.s32.totalorder %s3045_s12, %s4156_s13  ;;  %p4162_p6 = scmp.lt.s32.totalorder %s4156_s13, %s4156_s13 }
 0x2b5   :  { %2841 = vmatpush1.bf16.msra.mxu0 %v3962_v3  ;;  %v1484_v3 = vrot.slane %v4395_v63, %v4340_v24 }
 0x2b6   :  { %3458 = vmatpush3.bf16.msra.mxu1 %v3966_v4  ;;  %2842 = vmatprep.subr.bf16.mxu0 %v3969_v5  ;;  %p4163_p7 = por %p4162_p6, %p4161_p5 }
 0x2b7   :  { %3459 = vmatprep.subr.bf16.mxu1 %v3970_v7 }
 0x2b8   :  { %p4164_p8 = pnand %p4163_p7, %p4157_p4 }
 0x2b9   :  { %2843 = vmatpush1.bf16.msra.mxu0 %v3967_v8 }
 0x2ba   :  { %3460 = vmatpush3.bf16.msra.mxu1 %v3971_v10  ;;  %2844 = vmatprep.subr.bf16.mxu0 %v3974_v11 }
 0x2bb   :  { %3461 = vmatprep.subr.bf16.mxu1 %v3975_v17 }
 0x2bd   :  { %2845 = vmatpush1.bf16.msra.mxu0 %v3972_v18 }
 0x2be   :  { %3462 = vmatpush3.bf16.msra.mxu1 %v3976_v19  ;;  %2846 = vmatprep.subr.bf16.mxu0 %v3979_v20 }
 0x2bf   :  { %3463 = vmatprep.subr.bf16.mxu1 %v3980_v21 }
 0x2c1   :  { %2847 = vmatpush1.bf16.msra.mxu0 %v3977_v22 }
 0x2c2   :  { %3464 = vmatpush3.bf16.msra.mxu1 %v3981_v23  ;;  %2848 = vmatprep.subr.bf16.mxu0 %v3984_v52 }
 0x2c3   :  { %3465 = vmatprep.subr.bf16.mxu1 %v3985_v25 }
 0x2c5   :  { %2849 = vmatpush1.bf16.msra.mxu0 %v3982_v26 }
 0x2c6   :  { %3466 = vmatpush3.bf16.msra.mxu1 %v3986_v57  ;;  %2850 = vmatprep.subr.bf16.mxu0 %v3989_v28 }
 0x2c7   :  { %3467 = vmatprep.subr.bf16.mxu1 %v3990_v30 }
 0x2c9   :  { %2851 = vmatpush1.bf16.msra.mxu0 %v3987_v31 }
 0x2ca   :  { %3468 = vmatpush3.bf16.msra.mxu1 %v3991_v32  ;;  %2861 = vmatprep.subr.bf16.mxu0 %v3994_v33 }
 0x2cc   :  { %2853 = vmatmul.mubr.bf16.vlgmr.msra.gmra.mrb[8].mxu0 %v4367_v9  ;;  %v4009_v9 = vld [vmem:[#allocation8 + $0x4ac] ss:$28 sps:$4 sm:$0xff]  }
 0x2cd   :  { %2975 = vmatmul.mubr.bf16.vlgmr.msra.gmra.mrb[20].mxu1 %v4380_v27  ;;  %2862 = vmatpush1.bf16.msra.mxu0 %v3992_v34 }
 0x2ce   :  { %2893 = vmatprep.mubr.bf16.mxu0 %v4371_v12  ;;  %2863 = vmatprep.subr.bf16.mxu0 %v3997_v36  ;;  %v4010_v12 = vld [vmem:[#allocation8 + $0x4e0] ss:$28 sps:$4 sm:$0xff]  }
 0x2d1   :  { %2864 = vmatpush1.bf16.msra.mxu0 %v3995_v37 }
 0x2d2   :  { %2865 = vmatprep.subr.bf16.mxu0 %v4000_v38 }
 0x2d5   :  { %2866 = vmatpush1.bf16.msra.mxu0 %v3998_v39 }
 0x2d6   :  { %2867 = vmatprep.subr.bf16.mxu0 %v4003_v40 }
 0x2d9   :  { %2868 = vmatpush1.bf16.msra.mxu0 %v4001_v41 }
 0x2da   :  { %2869 = vmatprep.subr.bf16.mxu0 %v4006_v42 }
 0x2dd   :  { %2870 = vmatpush1.bf16.msra.mxu0 %v4004_v6 }
 0x2de   :  { %2871 = vmatprep.subr.bf16.mxu0 %v4009_v9 }
 0x2e1   :  { %2872 = vmatpush1.bf16.msra.mxu0 %v4007_v43  ;;  %v1495_v43 = vsub.s32 6, %v4322_v13 }
 0x2e2   :  { %2873 = vmatprep.subr.bf16.mxu0 %v4012_v44 }
 0x2e3   :  { %v1496_v44 = vrot.slane %v4395_v63, %v1495_v43 }
 0x2e5   :  { %2874 = vmatpush1.bf16.msra.mxu0 %v4010_v12 }
 0x2e6   :  { %2875 = vmatprep.subr.bf16.mxu0 %v4015_v45 }
 0x2e9   :  { %2876 = vmatpush1.bf16.msra.mxu0 %v4013_v15 }
 0x2ea   :  { %2877 = vmatprep.subr.bf16.mxu0 %v4018_v46 }
 0x2ed   :  { %2878 = vmatpush1.bf16.msra.mxu0 %v4016_v47 }
 0x2ee   :  { %2879 = vmatprep.subr.bf16.mxu0 %v4021_v48 }
 0x2f1   :  { %2880 = vmatpush1.bf16.msra.mxu0 %v4019_v49 }
 0x2f2   :  { %2881 = vmatprep.subr.bf16.mxu0 %v4024_v35 }
 0x2f5   :  { %2882 = vmatpush1.bf16.msra.mxu0 %v4022_v50 }
 0x2f6   :  { %2883 = vmatprep.subr.bf16.mxu0 %v4027_v51 }
 0x2f9   :  { %2884 = vmatpush1.bf16.msra.mxu0 %v4025_v53 }
 0x2fa   :  { %2885 = vmatprep.subr.bf16.mxu0 %v4030_v54 }
 0x2fd   :  { %2886 = vmatpush1.bf16.msra.mxu0 %v4028_v55  ;;  %v1487_v55 = vsub.s32 4, %v4322_v13 }
 0x2fe   :  { %2887 = vmatprep.subr.bf16.mxu0 %v4033_v56  ;;  %v1491_v56 = vsub.s32 5, %v4322_v13 }
 0x301   :  { %2888 = vmatpush1.bf16.msra.mxu0 %v4031_v58  ;;  %v1488_v58 = vrot.slane %v4395_v63, %v1487_v55 }
 0x302   :  { %2889 = vmatprep.subr.bf16.mxu0 %v4036_v59  ;;  %v1492_v59 = vrot.slane %v4395_v63, %v1491_v56 }
 0x305   :  { %2890 = vmatpush1.bf16.msra.mxu0 %v4034_v60 }
 0x306   :  { %2891 = vmatprep.subr.bf16.mxu0 %v4039_v61 }
 0x309   :  { %2892 = vmatpush1.bf16.msra.mxu0 %v4037_v62 }
 0x30c   :  { %2894 = vmatmul.mubr.bf16.vlgmr.msra.gmra.mrb[8].mxu0 %v4380_v27 }
 0x35f   :  { %v2731_v4 = vpop.f32.mrb[4].mxu0  ;;  %v2813_v5 = vpop.f32.mrb[12].mxu1 }
 0x360   :  { %v3479_v27 = vadd.f32 %v2731_v4, %v1472_v0  ;;  %v3481_v7 = vadd.f32 %v2813_v5, %v1480_v1  ;;  %v2733_v8 = vpop.f32.mrb[5].mxu0  ;;  %v2815_v10 = vpop.f32.mrb[13].mxu1 }
 0x361   :  { %v3480_v11 = vadd.f32 %v2733_v8, %v1476_v2  ;;  %v3482_v17 = vadd.f32 %v2815_v10, %v1484_v3  ;;  %v2735_v18 = vpop.f32.mrb[6].mxu0  ;;  %v2817_v19 = vpop.f32.mrb[14].mxu1 }
 0x362   :  { %2982 = vst [vmem:[#allocation10] sm:$0xff] %v3479_v27  ;;  %v2989_v14 = vsub.f32 0.0, %v3479_v27  ;;  %2984 = vst [vmem:[#allocation10 + $0x10] sm:$0xff] %v3481_v7  ;;  %v2991_v29 = vsub.f32 0.0, %v3481_v7  ;;  %v2736_v20 = vpop.f32.mrb[7].mxu0  ;;  %v2818_v21 = vpop.f32.mrb[15].mxu1 }
 0x363   :  { %2983 = vst [vmem:[#allocation10 + $0x8] sm:$0xff] %v3480_v11  ;;  %v2990_v16 = vsub.f32 0.0, %v3480_v11  ;;  %2985 = vst [vmem:[#allocation10 + $0x18] sm:$0xff] %v3482_v17  ;;  %v2992_v24 = vsub.f32 0.0, %v3482_v17 }
 0x364   :  { %v2996_v22 = vmul.f32 1.442695, %v2989_v14  ;;  %v3000_v23 = vmul.f32 1.442695, %v2991_v29 }
 0x365   :  { %v2998_v52 = vmul.f32 1.442695, %v2990_v16  ;;  %v3002_v25 = vmul.f32 1.442695, %v2992_v24 }
 0x366   :  { %4040 = vpow2.f32 %v2996_v22 }
 0x367   :  { %4042 = vpow2.f32 %v3000_v23 }
 0x368   :  { %4044 = vpow2.f32 %v2998_v52 }
 0x369   :  { %4046 = vpow2.f32 %v3002_v25 }
 0x370   :  { %v4041_v26 = vpop.eup %4040 }
 0x371   :  { %v4043_v57 = vpop.eup %4042  ;;  %v3010_v28 = vadd.f32 1.0, %v4041_v26 }
 0x372   :  { %v4045_v30 = vpop.eup %4044  ;;  %v3012_v31 = vadd.f32 1.0, %v4043_v57 }
 0x373   :  { %v4047_v32 = vpop.eup %4046  ;;  %4048 = vrcp.f32 %v3010_v28  ;;  %v3011_v33 = vadd.f32 1.0, %v4045_v30 }
 0x374   :  { %4050 = vrcp.f32 %v3012_v31  ;;  %v3013_v34 = vadd.f32 1.0, %v4047_v32 }
 0x375   :  { %4052 = vrcp.f32 %v3011_v33 }
 0x376   :  { %4054 = vrcp.f32 %v3013_v34 }
 0x37d   :  { %v4049_v36 = vpop.eup %4048 }
 0x37e   :  { %v4051_v37 = vpop.eup %4050  ;;  %3031 = vst [vmem:[#allocation11] sm:$0xff] %v4049_v36 }
 0x37f   :  { %v4053_v38 = vpop.eup %4052  ;;  %3033 = vst [vmem:[#allocation11 + $0x10] sm:$0xff] %v4051_v37 }
 0x380   :  { %v4055_v39 = vpop.eup %4054  ;;  %3032 = vst [vmem:[#allocation11 + $0x8] sm:$0xff] %v4053_v38  ;;  %v3447_v40 = vpop.f32.mrb[16].mxu1 }
 0x381   :  { %3034 = vst [vmem:[#allocation11 + $0x18] sm:$0xff] %v4055_v39  ;;  %v3448_v41 = vpop.f32.mrb[17].mxu1 }
 0x382   :  { %v3449_v42 = vadd.f32 %v3448_v41, %v3447_v40  ;;  %v3450_v6 = vpop.f32.mrb[18].mxu1 }
 0x383   :  { %v3451_v9 = vpop.f32.mrb[19].mxu1 }
 0x384   :  { %v2937_v15 = vadd.f32 %v3449_v42, %v1496_v44 }
 0x3a0   :  { %v3469_v12 = vpop.f32.mrb[20].mxu1 }
 0x3a1   :  { %v3470_v45 = vpop.f32.mrb[21].mxu1 }
 0x3a2   :  { %v3471_v46 = vadd.f32 %v3470_v45, %v3469_v12  ;;  %v3472_v47 = vpop.f32.mrb[22].mxu1 }
 0x3a3   :  { %v3473_v48 = vpop.f32.mrb[23].mxu1 }
 0x3a4   :  { %v2977_v49 = vadd.f32 %v3471_v46, %v2937_v15 }
 0x3a6   :  { %2988 = vst [vmem:[#allocation10 + $0x30] sm:$0xff] %v2977_v49  ;;  %v2995_v35 = vsub.f32 0.0, %v2977_v49 }
 0x3a8   :  { %v3008_v50 = vmul.f32 1.442695, %v2995_v35 }
 0x3aa   :  { %4056 = vpow2.f32 %v3008_v50 }
 0x3b4   :  { %v4057_v51 = vpop.eup %4056 }
 0x3b5   :  { %v3016_v53 = vadd.f32 1.0, %v4057_v51 }
 0x3b7   :  { %4058 = vrcp.f32 %v3016_v53 }
 0x3c1   :  { %v4059_v54 = vpop.eup %4058 }
 0x3c2   :  { %3037 = vst [vmem:[#allocation11 + $0x30] sm:$0xff] %v4059_v54 }
 0x3df   :  { %v2895_v60 = vpop.f32.mrb[8].mxu0 }
 0x3e0   :  { %v3483_v61 = vadd.f32 %v2895_v60, %v1488_v58  ;;  %v2897_v62 = vpop.f32.mrb[9].mxu0 }
 0x3e1   :  { %v3484_v0 = vadd.f32 %v2897_v62, %v1492_v59  ;;  %v2899_v1 = vpop.f32.mrb[10].mxu0 }
 0x3e2   :  { %2986 = vst [vmem:[#allocation10 + $0x20] sm:$0xff] %v3483_v61  ;;  %v2993_v2 = vsub.f32 0.0, %v3483_v61  ;;  %v2900_v3 = vpop.f32.mrb[11].mxu0 }
 0x3e3   :  { %2987 = vst [vmem:[#allocation10 + $0x28] sm:$0xff] %v3484_v0  ;;  %v2994_v4 = vsub.f32 0.0, %v3484_v0 }
 0x3e4   :  { %v3004_v5 = vmul.f32 1.442695, %v2993_v2 }
 0x3e5   :  { %4167 = shalt.err (!%p4164_p8)
}
 0x3e6   :  { %s4168_s18 = scalar_lea.hbm %s4442_s7, 896 }
 0x3e7   :  { %p4169_p9 = scmp.ne.s32.totalorder %s4442_s7, %s4168_s18  ;;  %p4172_p10 = scmp.lt.u32.totalorder %s4168_s18, %s4442_s7 }
 0x3e9   :  { %p4174_p11 = pnand %p4172_p10, %p4169_p9 }
 0x3eb   :  { %4177 = shalt.err (!%p4174_p11)
}
 0x3ec   :  { %3047 = dma.vmem_to_hbm [thread:$0]  %s3045_s12, 896, %s4442_s7, [#allocation4]   ;;  %v3006_v13 = vmul.f32 1.442695, %v2994_v4  ;;  %4060 = vpow2.f32 %v3004_v5 }
 0x3ed   :  { %s4220_s25 = smov [#allocation11]  }
 0x3ee   :  { %4062 = vpow2.f32 %v3006_v13  ;;  %s3054_s26 = sshll.u32 %s4220_s25, 4  ;;  %s3055_s26 = int_to_ptr.vmem [resolvable:$true] %s3054_s26 }
 0x3ef   :  { %s4178_s27 = scalar_lea.vmem %s3055_s26, 896  ;;  %p4183_p13 = scmp.lt.s32.totalorder %s3055_s26, %s3055_s26 }
 0x3f0   :  { %p4179_p12 = scmp.ne.s32.totalorder %s3055_s26, %s4178_s27  ;;  %p4184_p0 = scmp.lt.s32.totalorder %s4178_s27, %s4178_s27 }
 0x3f2   :  { %p4185_p1 = por %p4184_p0, %p4183_p13 }
 0x3f4   :  { %p4186_p2 = pnand %p4185_p1, %p4179_p12 }
 0x3f6   :  { %v4061_v63 = vpop.eup %4060 }
 0x3f7   :  { %v3014_v7 = vadd.f32 1.0, %v4061_v63 }
 0x3f8   :  { %v4063_v27 = vpop.eup %4062 }
 0x3f9   :  { %v3015_v8 = vadd.f32 1.0, %v4063_v27  ;;  %4064 = vrcp.f32 %v3014_v7 }
 0x3fb   :  { %4066 = vrcp.f32 %v3015_v8 }
 0x403   :  { %v4065_v10 = vpop.eup %4064 }
 0x404   :  { %3035 = vst [vmem:[#allocation11 + $0x20] sm:$0xff] %v4065_v10 }
 0x405   :  { %v4067_v11 = vpop.eup %4066 }
 0x406   :  { %3036 = vst [vmem:[#allocation11 + $0x28] sm:$0xff] %v4067_v11 }
 0x407   :  { %4189 = shalt.err (!%p4186_p2)
}
 0x408   :  { %s4190_s30 = scalar_lea.hbm %s4443_s8, 896 }
 0x409   :  { %p4191_p3 = scmp.ne.s32.totalorder %s4443_s8, %s4190_s30  ;;  %p4194_p4 = scmp.lt.u32.totalorder %s4190_s30, %s4443_s8 }
 0x40b   :  { %p4196_p5 = pnand %p4194_p4, %p4191_p3 }
 0x40d   :  { %4199 = shalt.err (!%p4196_p5)
}
 0x40e   :  { %3057 = dma.vmem_to_hbm [thread:$0]  %s3055_s26, 896, %s4443_s8, [#allocation12]  }
 0x40f   :  { %4206 = dma.done.wait [#allocation4], 896  }
 0x410   :  { %4207 = vsyncadd [#allocation4], 4294966400 }
 0x411   :  { %4208 = dma.done.wait [#allocation12], 896  }
 0x412   :  { %4209 = vsyncadd [#allocation12], 4294966400 }
 0x413   :  { %3064 = vsyncpa [#allocation3], 1 }
 0x414   :  { %3065 = vsyncpa [#allocation6], 1 }
 0x415   :  { %3066 = vsyncpa [#allocation9], 1 }
 0x416   :  { %3067 = vsyncpa [#allocation4], 1 }
 0x417   :  { %3068 = vsyncpa [#allocation12], 1 }

// kernel: tpu_custom_call.1
= control target key start
LH: loop header
LB: loop body
LE: loop exit
PB: predicated region body
PF: predicated region fallthrough
CT: control target
= control target key end

     0   :  { %14 = vsyncpa [#allocation3], 0  ;;  %s4435_s0 = inlined_call_operand.hbm [shape: bf16[8,32], index: 0, kind: input, shape index: {}]   ;;  %s4436_s1 = inlined_call_operand.hbm [shape: bf16[32,512], index: 1, kind: input, shape index: {}]   ;;  %s4437_s2 = inlined_call_operand.vmem [shape: f32[1,512], index: 2, kind: input, shape index: {}]   ;;  %s4438_s3 = inlined_call_operand.hbm [shape: bf16[512,512], index: 3, kind: input, shape index: {}]   ;;  %s4439_s4 = inlined_call_operand.vmem [shape: f32[1,512], index: 4, kind: input, shape index: {}]   ;;  %s4440_s5 = inlined_call_operand.hbm [shape: bf16[512,896], index: 5, kind: input, shape index: {}]   ;;  %s4441_s6 = inlined_call_operand.vmem [shape: f32[1,896], index: 6, kind: input, shape index: {}]   ;;  %s4442_s7 = inlined_call_operand.hbm [shape: f32[8,896], index: 7, kind: output, shape index: {0}]   ;;  %s4443_s8 = inlined_call_operand.hbm [shape: f32[8,896], index: 8, kind: output, shape index: {1}]  }
   0x1   :  { %15 = vsyncpa [#allocation6], 0 }
   0x2   :  { %16 = vsyncpa [#allocation9], 0 }
   0x3   :  { %17 = vsyncpa [#allocation4], 0 }
   0x4   :  { %18 = vsyncpa [#allocation12], 0  ;;  %s4210_s27 = smov [#allocation5]   ;;  %s4068_s9 = scalar_lea.hbm %s4436_s1, 1024 }
   0x5   :  { %s34_s28 = sshll.u32 %s4210_s27, 4  ;;  %p4069_p0 = scmp.ne.s32.totalorder %s4436_s1, %s4068_s9  ;;  %s35_s28 = int_to_ptr.vmem [resolvable:$true] %s34_s28 }
   0x6   :  { %p4072_p1 = scmp.lt.u32.totalorder %s4068_s9, %s4436_s1 }
   0x8   :  { %p4074_p2 = pnand %p4072_p1, %p4069_p0 }
   0xa   :  { %4077 = shalt.err (!%p4074_p2)
}
   0xb   :  { %s4078_s14 = scalar_lea.vmem %s35_s28, 1024  ;;  %p4083_p4 = scmp.lt.s32.totalorder %s35_s28, %s35_s28 }
   0xc   :  { %p4079_p3 = scmp.ne.s32.totalorder %s35_s28, %s4078_s14  ;;  %p4084_p5 = scmp.lt.s32.totalorder %s4078_s14, %s4078_s14 }
   0xe   :  { %p4085_p6 = por %p4084_p5, %p4083_p4 }
  0x10   :  { %p4086_p7 = pnand %p4085_p6, %p4079_p3 }
  0x12   :  { %4089 = shalt.err (!%p4086_p7)
}
  0x13   :  { %s4211_s15 = smov 256   ;;  %s4212_s16 = smov 16  }
  0x14   :  { %40 = dma.hbm_to_vmem [thread:$0]  %s4436_s1, 1024, %s35_s28, [#allocation6], %s4211_s15, %s4211_s15, %s4212_s16  }
  0x15   :  { %s4213_s19 = smov [#allocation2]   ;;  %s4214_s21 = smov [#allocation7]  }
  0x16   :  { %s25_s20 = sshll.u32 %s4213_s19, 4  ;;  %s48_s22 = sshll.u32 %s4214_s21, 4  ;;  %s26_s20 = int_to_ptr.vmem [resolvable:$true] %s25_s20  ;;  %s49_s22 = int_to_ptr.vmem [resolvable:$true] %s48_s22 }
  0x17   :  { %s4090_s25 = scalar_lea.hbm %s4435_s0, 64 }
  0x18   :  { %p4091_p8 = scmp.ne.s32.totalorder %s4435_s0, %s4090_s25  ;;  %p4094_p9 = scmp.lt.u32.totalorder %s4090_s25, %s4435_s0 }
  0x1a   :  { %p4096_p10 = pnand %p4094_p9, %p4091_p8 }
  0x1c   :  { %4099 = shalt.err (!%p4096_p10)
}
  0x1d   :  { %s4100_s1 = scalar_lea.vmem %s26_s20, 64  ;;  %p4105_p12 = scmp.lt.s32.totalorder %s26_s20, %s26_s20 }
  0x1e   :  { %p4101_p11 = scmp.ne.s32.totalorder %s26_s20, %s4100_s1  ;;  %p4106_p13 = scmp.lt.s32.totalorder %s4100_s1, %s4100_s1 }
  0x20   :  { %p4107_p0 = por %p4106_p13, %p4105_p12 }
  0x22   :  { %p4108_p1 = pnand %p4107_p0, %p4101_p11 }
  0x24   :  { %4111 = shalt.err (!%p4108_p1)
}
  0x25   :  { %28 = dma.hbm_to_vmem [thread:$0]  %s4435_s0, 64, %s26_s20, [#allocation3]  }
  0x26   :  { %s4112_s12 = scalar_lea.hbm %s4438_s3, 16384 }
  0x27   :  { %p4113_p2 = scmp.ne.s32.totalorder %s4438_s3, %s4112_s12  ;;  %p4116_p3 = scmp.lt.u32.totalorder %s4112_s12, %s4438_s3 }
  0x29   :  { %p4118_p4 = pnand %p4116_p3, %p4113_p2 }
  0x2b   :  { %4121 = shalt.err (!%p4118_p4)
}
  0x2c   :  { %s4122_s19 = scalar_lea.vmem %s49_s22, 16384  ;;  %p4127_p6 = scmp.lt.s32.totalorder %s49_s22, %s49_s22 }
  0x2d   :  { %p4123_p5 = scmp.ne.s32.totalorder %s49_s22, %s4122_s19  ;;  %p4128_p7 = scmp.lt.s32.totalorder %s4122_s19, %s4122_s19 }
  0x2f   :  { %p4129_p8 = por %p4128_p7, %p4127_p6 }
  0x31   :  { %p4130_p9 = pnand %p4129_p8, %p4123_p5 }
  0x33   :  { %4133 = shalt.err (!%p4130_p9)
}
  0x34   :  { %54 = dma.hbm_to_vmem [thread:$0]  %s4438_s3, 16384, %s49_s22, [#allocation6], %s4211_s15, %s4211_s15, %s4212_s16  }
  0x35   :  { %s4215_s21 = smov [#allocation8]   ;;  %s4134_s26 = scalar_lea.hbm %s4440_s5, 28672 }
  0x36   :  { %s62_s23 = sshll.u32 %s4215_s21, 4  ;;  %p4135_p10 = scmp.ne.s32.totalorder %s4440_s5, %s4134_s26  ;;  %s63_s23 = int_to_ptr.vmem [resolvable:$true] %s62_s23 }
  0x37   :  { %p4138_p11 = scmp.lt.u32.totalorder %s4134_s26, %s4440_s5 }
  0x39   :  { %p4140_p12 = pnand %p4138_p11, %p4135_p10 }
  0x3b   :  { %4143 = shalt.err (!%p4140_p12)
}
  0x3c   :  { %s4144_s28 = scalar_lea.vmem %s63_s23, 28672  ;;  %p4149_p0 = scmp.lt.s32.totalorder %s63_s23, %s63_s23 }
  0x3d   :  { %p4145_p13 = scmp.ne.s32.totalorder %s63_s23, %s4144_s28  ;;  %p4150_p1 = scmp.lt.s32.totalorder %s4144_s28, %s4144_s28 }
  0x3f   :  { %p4151_p2 = por %p4150_p1, %p4149_p0 }
  0x41   :  { %p4152_p3 = pnand %p4151_p2, %p4145_p13 }
  0x43   :  { %4155 = shalt.err (!%p4152_p3)
}
  0x44   :  { %s4216_s3 = smov 448   ;;  %s4217_s15 = smov 28  }
  0x45   :  { %68 = dma.hbm_to_vmem [thread:$0]  %s4440_s5, 28672, %s63_s23, [#allocation9], %s4216_s3, %s4216_s3, %s4217_s15  }
  0x46   :  { %4200 = dma.done.wait [#allocation3], 64  }
  0x47   :  { %4201 = vsyncadd [#allocation3], 4294967232 }
  0x48   :  { %4202 = dma.done.wait [#allocation6], 17408  }
  0x49   :  { %4203 = vsyncadd [#allocation6], 4294949888 }
  0x4a   :  { %4204 = dma.done.wait [#allocation9], 28672  }
  0x4b   :  { %4205 = vsyncadd [#allocation9], 4294938624  ;;  %v4218_v0 = vmov 0   ;;  %v3516_v1 = vld [vmem:[#allocation5 + $0x4] ss:$16 sps:$4 sm:$0xff]   ;;  %vm155_vm0 = vcmask 261120  }
  0x4c   :  { %191 = vmatprep.mubr.bf16.mxu1 %v4218_v0  ;;  %v3518_v2 = vld [vmem:[#allocation5] ss:$16 sps:$4 sm:$0xff]   ;;  %159 = vmatprep.subr.bf16.mxu1 %v3516_v1  ;;  %v3519_v3 = vld [vmem:[#allocation5 + $0x24] ss:$16 sps:$4 sm:$0xff]   ;;  %v3524_v5 = vld [vmem:[#allocation5 + $0xc] ss:$16 sps:$4 sm:$0xff]  }
  0x4d   :  { %160 = vmatpush1.bf16.msra.mxu1 %v3518_v2  ;;  %v3521_v4 = vld [vmem:[#allocation5 + $0x20] ss:$16 sps:$4 sm:$0xff]   ;;  %v84_v6 = vld [vmem:[#allocation2] sm:$0xf]  ;;  %v3528_v7 = vld [vmem:[#allocation7 + $0x4] ss:$16 sps:$4 sm:$0xff]  }
  0x4e   :  { %161 = vmatprep.subr.bf16.mxu1 %v3519_v3  ;;  %v3522_v8 = vld [vmem:[#allocation5 + $0x8] ss:$16 sps:$4 sm:$0xff]   ;;  %v3527_v9 = vld [vmem:[#allocation5 + $0x2c] ss:$16 sps:$4 sm:$0xff]   ;;  %1039 = vmatprep.subr.bf16.mxu0 %v3528_v7  ;;  %v3533_v10 = vld [vmem:[#allocation7] ss:$16 sps:$4 sm:$0xff]  }
  0x4f   :  { %v3534_v11 = vld [vmem:[#allocation7 + $0x24] ss:$16 sps:$4 sm:$0xff]   ;;  %v3525_v12 = vld [vmem:[#allocation5 + $0x28] ss:$16 sps:$4 sm:$0xff]   ;;  %1040 = vmatpush1.bf16.msra.mxu0 %v3533_v10  ;;  %v3539_v13 = vld [vmem:[#allocation7 + $0x20] ss:$16 sps:$4 sm:$0xff]  }
  0x50   :  { %v3540_v14 = vld [vmem:[#allocation7 + $0x44] ss:$16 sps:$4 sm:$0xff]   ;;  %v3532_v15 = vld [vmem:[#allocation7 + $0xc] ss:$16 sps:$4 sm:$0xff]   ;;  %1041 = vmatprep.subr.bf16.mxu0 %v3534_v11  ;;  %v3545_v16 = vld [vmem:[#allocation7 + $0x40] ss:$16 sps:$4 sm:$0xff]  }
  0x51   :  { %162 = vmatpush1.bf16.msra.mxu1 %v3521_v4  ;;  %v3530_v17 = vld [vmem:[#allocation7 + $0x8] ss:$16 sps:$4 sm:$0xff]   ;;  %v3546_v18 = vld [vmem:[#allocation7 + $0x64] ss:$16 sps:$4 sm:$0xff]   ;;  %v3538_v19 = vld [vmem:[#allocation7 + $0x2c] ss:$16 sps:$4 sm:$0xff]  }
  0x52   :  { %200 = vmatprep.subr.bf16.mxu1 %v3524_v5  ;;  %v3536_v20 = vld [vmem:[#allocation7 + $0x28] ss:$16 sps:$4 sm:$0xff]   ;;  %v3551_v21 = vld [vmem:[#allocation7 + $0x60] ss:$16 sps:$4 sm:$0xff]   ;;  %v3552_v22 = vld [vmem:[#allocation7 + $0x84] ss:$16 sps:$4 sm:$0xff]  }
  0x53   :  { %1042 = vmatpush1.bf16.msra.mxu0 %v3539_v13  ;;  %v3544_v23 = vld [vmem:[#allocation7 + $0x4c] ss:$16 sps:$4 sm:$0xff]   ;;  %v3557_v24 = vld [vmem:[#allocation7 + $0x80] ss:$16 sps:$4 sm:$0xff]   ;;  %v3542_v25 = vld [vmem:[#allocation7 + $0x48] ss:$16 sps:$4 sm:$0xff]  }
  0x54   :  { %3077 = vmatmul.mubr.msk.bf16.vlgmr.msra.gmra.mrb[0].mxu1 %vm155_vm0, %v84_v6  ;;  %1043 = vmatprep.subr.bf16.mxu0 %v3540_v14  ;;  %v3558_v26 = vld [vmem:[#allocation7 + $0xa4] ss:$16 sps:$4 sm:$0xff]   ;;  %v3550_v27 = vld [vmem:[#allocation7 + $0x6c] ss:$16 sps:$4 sm:$0xff]   ;;  %v3548_v28 = vld [vmem:[#allocation7 + $0x68] ss:$16 sps:$4 sm:$0xff]  }
  0x55   :  { %201 = vmatpush1.bf16.msra.mxu1 %v3522_v8  ;;  %232 = vmatprep.mubr.bf16.mxu1 %v4218_v0  ;;  %v3563_v29 = vld [vmem:[#allocation7 + $0xa0] ss:$16 sps:$4 sm:$0xff]   ;;  %v3564_v30 = vld [vmem:[#allocation7 + $0xc4] ss:$16 sps:$4 sm:$0xff]   ;;  %v3556_v31 = vld [vmem:[#allocation7 + $0x8c] ss:$16 sps:$4 sm:$0xff]  }
  0x56   :  { %202 = vmatprep.subr.bf16.mxu1 %v3527_v9  ;;  %v3569_v32 = vld [vmem:[#allocation7 + $0xc0] ss:$16 sps:$4 sm:$0xff]   ;;  %v3554_v33 = vld [vmem:[#allocation7 + $0x88] ss:$16 sps:$4 sm:$0xff]   ;;  %v3570_v34 = vld [vmem:[#allocation7 + $0xe4] ss:$16 sps:$4 sm:$0xff]  }
  0x57   :  { %1044 = vmatpush1.bf16.msra.mxu0 %v3545_v16  ;;  %v3562_v35 = vld [vmem:[#allocation7 + $0xac] ss:$16 sps:$4 sm:$0xff]   ;;  %v3560_v36 = vld [vmem:[#allocation7 + $0xa8] ss:$16 sps:$4 sm:$0xff]   ;;  %v3575_v37 = vld [vmem:[#allocation7 + $0xe0] ss:$16 sps:$4 sm:$0xff]  }
  0x58   :  { %1045 = vmatprep.subr.bf16.mxu0 %v3546_v18  ;;  %v3576_v38 = vld [vmem:[#allocation7 + $0x104] ss:$16 sps:$4 sm:$0xff]   ;;  %v3568_v39 = vld [vmem:[#allocation7 + $0xcc] ss:$16 sps:$4 sm:$0xff]   ;;  %v3581_v40 = vld [vmem:[#allocation7 + $0x100] ss:$16 sps:$4 sm:$0xff]  }
  0x59   :  { %203 = vmatpush1.bf16.msra.mxu1 %v3525_v12  ;;  %v3566_v41 = vld [vmem:[#allocation7 + $0xc8] ss:$16 sps:$4 sm:$0xff]   ;;  %v3582_v42 = vld [vmem:[#allocation7 + $0x124] ss:$16 sps:$4 sm:$0xff]   ;;  %v3574_v43 = vld [vmem:[#allocation7 + $0xec] ss:$16 sps:$4 sm:$0xff]   ;;  %v95_v12 = vlaneseq }
  0x5a   :  { %1121 = vmatprep.subr.bf16.mxu1 %v3532_v15  ;;  %v3572_v44 = vld [vmem:[#allocation7 + $0xe8] ss:$16 sps:$4 sm:$0xff]   ;;  %v3580_v45 = vld [vmem:[#allocation7 + $0x10c] ss:$16 sps:$4 sm:$0xff]   ;;  %v3587_v46 = vld [vmem:[#allocation7 + $0x120] ss:$16 sps:$4 sm:$0xff]  }
  0x5b   :  { %1046 = vmatpush1.bf16.msra.mxu0 %v3551_v21  ;;  %v3588_v47 = vld [vmem:[#allocation7 + $0x144] ss:$16 sps:$4 sm:$0xff]   ;;  %v3593_v48 = vld [vmem:[#allocation7 + $0x140] ss:$16 sps:$4 sm:$0xff]   ;;  %v3578_v49 = vld [vmem:[#allocation7 + $0x108] ss:$16 sps:$4 sm:$0xff]  }
  0x5c   :  { %3078 = vmatmul.mubr.msk.bf16.vlgmr.msra.gmra.mrb[4].mxu1 %vm155_vm0, %v84_v6  ;;  %1047 = vmatprep.subr.bf16.mxu0 %v3552_v22  ;;  %v3594_v50 = vld [vmem:[#allocation7 + $0x164] ss:$16 sps:$4 sm:$0xff]   ;;  %v3586_v51 = vld [vmem:[#allocation7 + $0x12c] ss:$16 sps:$4 sm:$0xff]   ;;  %v3599_v52 = vld [vmem:[#allocation7 + $0x160] ss:$16 sps:$4 sm:$0xff]  }
  0x5d   :  { %1122 = vmatpush1.bf16.msra.mxu1 %v3530_v17  ;;  %v3584_v53 = vld [vmem:[#allocation7 + $0x128] ss:$16 sps:$4 sm:$0xff]   ;;  %v3600_v54 = vld [vmem:[#allocation7 + $0x184] ss:$16 sps:$4 sm:$0xff]   ;;  %v3592_v55 = vld [vmem:[#allocation7 + $0x14c] ss:$16 sps:$4 sm:$0xff]  }
  0x5e   :  { %1123 = vmatprep.subr.bf16.mxu1 %v3538_v19  ;;  %v3605_v56 = vld [vmem:[#allocation7 + $0x180] ss:$16 sps:$4 sm:$0xff]   ;;  %v3590_v57 = vld [vmem:[#allocation7 + $0x148] ss:$16 sps:$4 sm:$0xff]   ;;  %v3606_v58 = vld [vmem:[#allocation7 + $0x1a4] ss:$16 sps:$4 sm:$0xff]  }
  0x5f   :  { %1048 = vmatpush1.bf16.msra.mxu0 %v3557_v24  ;;  %v3598_v59 = vld [vmem:[#allocation7 + $0x16c] ss:$16 sps:$4 sm:$0xff]   ;;  %v3611_v60 = vld [vmem:[#allocation7 + $0x1a0] ss:$16 sps:$4 sm:$0xff]   ;;  %v3596_v61 = vld [vmem:[#allocation7 + $0x168] ss:$16 sps:$4 sm:$0xff]  }
  0x60   :  { %1049 = vmatprep.subr.bf16.mxu0 %v3558_v26  ;;  %v3604_v62 = vld [vmem:[#allocation7 + $0x18c] ss:$16 sps:$4 sm:$0xff]   ;;  %v3602_v63 = vld [vmem:[#allocation7 + $0x188] ss:$16 sps:$4 sm:$0xff]   ;;  %v3612_v2 = vld [vmem:[#allocation7 + $0x1c4] ss:$16 sps:$4 sm:$0xff]  }
  0x61   :  { %1124 = vmatpush1.bf16.msra.mxu1 %v3536_v20  ;;  %v3610_v0 = vld [vmem:[#allocation7 + $0x1ac] ss:$16 sps:$4 sm:$0xff]   ;;  %v3608_v1 = vld [vmem:[#allocation7 + $0x1a8] ss:$16 sps:$4 sm:$0xff]   ;;  %v3617_v5 = vld [vmem:[#allocation7 + $0x1c0] ss:$16 sps:$4 sm:$0xff]  }
  0x62   :  { %1125 = vmatprep.subr.bf16.mxu1 %v3544_v23  ;;  %v3616_v3 = vld [vmem:[#allocation7 + $0x1cc] ss:$16 sps:$4 sm:$0xff]   ;;  %v3614_v4 = vld [vmem:[#allocation7 + $0x1c8] ss:$16 sps:$4 sm:$0xff]   ;;  %v3618_v6 = vld [vmem:[#allocation7 + $0x1e4] ss:$16 sps:$4 sm:$0xff]  }
  0x63   :  { %1050 = vmatpush1.bf16.msra.mxu0 %v3563_v29  ;;  %v3622_v7 = vld [vmem:[#allocation7 + $0x1ec] ss:$16 sps:$4 sm:$0xff]   ;;  %v3620_v8 = vld [vmem:[#allocation7 + $0x1e8] ss:$16 sps:$4 sm:$0xff]   ;;  %v3623_v9 = vld [vmem:[#allocation7 + $0x1e0] ss:$16 sps:$4 sm:$0xff]  }
  0x64   :  { %1051 = vmatprep.subr.bf16.mxu0 %v3564_v30  ;;  %v3626_v10 = vld [vmem:[#allocation7 + $0x204] ss:$16 sps:$4 sm:$0xff]   ;;  %v3629_v11 = vld [vmem:[#allocation7 + $0x20c] ss:$16 sps:$4 sm:$0xff]   ;;  %v4322_v13 = vshrl.u32 %v95_v12, 7 }
  0x65   :  { %1126 = vmatpush1.bf16.msra.mxu1 %v3542_v25  ;;  %v4330_v15 = vld [vmem:[%s4437_s2] sm:$0xf]  ;;  %v3624_v29 = vld [vmem:[#allocation7 + $0x200] ss:$16 sps:$4 sm:$0xff]   ;;  %v3627_v30 = vld [vmem:[#allocation7 + $0x208] ss:$16 sps:$4 sm:$0xff]  }
  0x66   :  { %1127 = vmatprep.subr.bf16.mxu1 %v3550_v27  ;;  %v4325_v14 = vsub.s32 0, %v4322_v13  ;;  %v4333_v16 = vsub.s32 1, %v4322_v13  ;;  %v4340_v24 = vsub.s32 3, %v4322_v13  ;;  %v3686_v12 = vld [vmem:[#allocation7 + $0x344] ss:$16 sps:$4 sm:$0xff]  }
  0x67   :  { %1052 = vmatpush1.bf16.msra.mxu0 %v3569_v32 }
  0x68   :  { %1053 = vmatprep.subr.bf16.mxu0 %v3570_v34  ;;  %v98_v17 = vrot.slane %v4330_v15, %v4325_v14  ;;  %v102_v18 = vrot.slane %v4330_v15, %v4333_v16  ;;  %v3635_v34 = vld [vmem:[#allocation7 + $0x22c] ss:$16 sps:$4 sm:$0xff]  }
  0x69   :  { %1128 = vmatpush1.bf16.msra.mxu1 %v3548_v28 }
  0x6a   :  { %1129 = vmatprep.subr.bf16.mxu1 %v3556_v31  ;;  %v110_v31 = vrot.slane %v4330_v15, %v4340_v24 }
  0x6b   :  { %1054 = vmatpush1.bf16.msra.mxu0 %v3575_v37  ;;  %v3630_v37 = vld [vmem:[#allocation7 + $0x220] ss:$16 sps:$4 sm:$0xff]  }
  0x6c   :  { %1055 = vmatprep.subr.bf16.mxu0 %v3576_v38  ;;  %v3633_v38 = vld [vmem:[#allocation7 + $0x228] ss:$16 sps:$4 sm:$0xff]  }
  0x6d   :  { %1130 = vmatpush1.bf16.msra.mxu1 %v3554_v33  ;;  %v3632_v33 = vld [vmem:[#allocation7 + $0x224] ss:$16 sps:$4 sm:$0xff]  }
  0x6e   :  { %1131 = vmatprep.subr.bf16.mxu1 %v3562_v35 }
  0x6f   :  { %1056 = vmatpush1.bf16.msra.mxu0 %v3581_v40 }
  0x70   :  { %1057 = vmatprep.subr.bf16.mxu0 %v3582_v42  ;;  %v3641_v42 = vld [vmem:[#allocation7 + $0x24c] ss:$16 sps:$4 sm:$0xff]  }
  0x71   :  { %1132 = vmatpush1.bf16.msra.mxu1 %v3560_v36 }
  0x72   :  { %1133 = vmatprep.subr.bf16.mxu1 %v3568_v39 }
  0x73   :  { %1058 = vmatpush1.bf16.msra.mxu0 %v3587_v46  ;;  %v3639_v46 = vld [vmem:[#allocation7 + $0x248] ss:$16 sps:$4 sm:$0xff]  }
  0x74   :  { %1059 = vmatprep.subr.bf16.mxu0 %v3588_v47 }
  0x75   :  { %1134 = vmatpush1.bf16.msra.mxu1 %v3566_v41  ;;  %v3638_v41 = vld [vmem:[#allocation7 + $0x244] ss:$16 sps:$4 sm:$0xff]  }
  0x76   :  { %1135 = vmatprep.subr.bf16.mxu1 %v3574_v43 }
  0x77   :  { %1060 = vmatpush1.bf16.msra.mxu0 %v3593_v48  ;;  %v3644_v48 = vld [vmem:[#allocation7 + $0x264] ss:$16 sps:$4 sm:$0xff]  }
  0x78   :  { %1061 = vmatprep.subr.bf16.mxu0 %v3594_v50  ;;  %v3642_v50 = vld [vmem:[#allocation7 + $0x260] ss:$16 sps:$4 sm:$0xff]  }
  0x79   :  { %1136 = vmatpush1.bf16.msra.mxu1 %v3572_v44 }
  0x7a   :  { %1137 = vmatprep.subr.bf16.mxu1 %v3580_v45  ;;  %v3636_v45 = vld [vmem:[#allocation7 + $0x240] ss:$16 sps:$4 sm:$0xff]  }
  0x7b   :  { %1062 = vmatpush1.bf16.msra.mxu0 %v3599_v52  ;;  %v3650_v52 = vld [vmem:[#allocation7 + $0x284] ss:$16 sps:$4 sm:$0xff]  }
  0x7c   :  { %1063 = vmatprep.subr.bf16.mxu0 %v3600_v54  ;;  %v3648_v54 = vld [vmem:[#allocation7 + $0x280] ss:$16 sps:$4 sm:$0xff]  }
  0x7d   :  { %1138 = vmatpush1.bf16.msra.mxu1 %v3578_v49  ;;  %v3647_v49 = vld [vmem:[#allocation7 + $0x26c] ss:$16 sps:$4 sm:$0xff]  }
  0x7e   :  { %1139 = vmatprep.subr.bf16.mxu1 %v3586_v51  ;;  %v3645_v51 = vld [vmem:[#allocation7 + $0x268] ss:$16 sps:$4 sm:$0xff]  }
  0x7f   :  { %1064 = vmatpush1.bf16.msra.mxu0 %v3605_v56  ;;  %v3656_v56 = vld [vmem:[#allocation7 + $0x2a4] ss:$16 sps:$4 sm:$0xff]  }
  0x80   :  { %1065 = vmatprep.subr.bf16.mxu0 %v3606_v58  ;;  %v3654_v58 = vld [vmem:[#allocation7 + $0x2a0] ss:$16 sps:$4 sm:$0xff]  }
  0x81   :  { %1140 = vmatpush1.bf16.msra.mxu1 %v3584_v53  ;;  %v3653_v53 = vld [vmem:[#allocation7 + $0x28c] ss:$16 sps:$4 sm:$0xff]  }
  0x82   :  { %1141 = vmatprep.subr.bf16.mxu1 %v3592_v55  ;;  %v3651_v55 = vld [vmem:[#allocation7 + $0x288] ss:$16 sps:$4 sm:$0xff]  }
  0x83   :  { %1066 = vmatpush1.bf16.msra.mxu0 %v3611_v60  ;;  %v3662_v60 = vld [vmem:[#allocation7 + $0x2c4] ss:$16 sps:$4 sm:$0xff]  }
  0x84   :  { %1067 = vmatprep.subr.bf16.mxu0 %v3612_v2  ;;  %v3666_v2 = vld [vmem:[#allocation7 + $0x2e0] ss:$16 sps:$4 sm:$0xff]  }
  0x85   :  { %1142 = vmatpush1.bf16.msra.mxu1 %v3590_v57  ;;  %v3659_v57 = vld [vmem:[#allocation7 + $0x2ac] ss:$16 sps:$4 sm:$0xff]  }
  0x86   :  { %1143 = vmatprep.subr.bf16.mxu1 %v3598_v59  ;;  %v3657_v59 = vld [vmem:[#allocation7 + $0x2a8] ss:$16 sps:$4 sm:$0xff]  }
  0x87   :  { %1068 = vmatpush1.bf16.msra.mxu0 %v3617_v5  ;;  %v3677_v5 = vld [vmem:[#allocation7 + $0x30c] ss:$16 sps:$4 sm:$0xff]  }
  0x88   :  { %1069 = vmatprep.subr.bf16.mxu0 %v3618_v6  ;;  %v3672_v6 = vld [vmem:[#allocation7 + $0x300] ss:$16 sps:$4 sm:$0xff]  }
  0x89   :  { %1144 = vmatpush1.bf16.msra.mxu1 %v3596_v61  ;;  %v3665_v61 = vld [vmem:[#allocation7 + $0x2cc] ss:$16 sps:$4 sm:$0xff]  }
  0x8a   :  { %1145 = vmatprep.subr.bf16.mxu1 %v3604_v62  ;;  %v3660_v62 = vld [vmem:[#allocation7 + $0x2c0] ss:$16 sps:$4 sm:$0xff]  }
  0x8b   :  { %1070 = vmatpush1.bf16.msra.mxu0 %v3623_v9  ;;  %v3683_v9 = vld [vmem:[#allocation7 + $0x32c] ss:$16 sps:$4 sm:$0xff]  }
  0x8c   :  { %1080 = vmatprep.subr.bf16.mxu0 %v3626_v10  ;;  %v3678_v10 = vld [vmem:[#allocation7 + $0x320] ss:$16 sps:$4 sm:$0xff]  }
  0x8d   :  { %1146 = vmatpush1.bf16.msra.mxu1 %v3602_v63  ;;  %v3663_v63 = vld [vmem:[#allocation7 + $0x2c8] ss:$16 sps:$4 sm:$0xff]  }
  0x8e   :  { %1147 = vmatprep.subr.bf16.mxu1 %v3610_v0  ;;  %v3668_v0 = vld [vmem:[#allocation7 + $0x2e4] ss:$16 sps:$4 sm:$0xff]  }
  0x91   :  { %1148 = vmatpush1.bf16.msra.mxu1 %v3608_v1  ;;  %v3671_v1 = vld [vmem:[#allocation7 + $0x2ec] ss:$16 sps:$4 sm:$0xff]  }
  0x92   :  { %1149 = vmatprep.subr.bf16.mxu1 %v3616_v3  ;;  %v3669_v3 = vld [vmem:[#allocation7 + $0x2e8] ss:$16 sps:$4 sm:$0xff]  }
  0x95   :  { %1150 = vmatpush1.bf16.msra.mxu1 %v3614_v4  ;;  %v3674_v4 = vld [vmem:[#allocation7 + $0x304] ss:$16 sps:$4 sm:$0xff]  }
  0x96   :  { %1151 = vmatprep.subr.bf16.mxu1 %v3622_v7  ;;  %v3675_v7 = vld [vmem:[#allocation7 + $0x308] ss:$16 sps:$4 sm:$0xff]  }
  0x99   :  { %1152 = vmatpush1.bf16.msra.mxu1 %v3620_v8  ;;  %v3680_v8 = vld [vmem:[#allocation7 + $0x324] ss:$16 sps:$4 sm:$0xff]  }
  0x9a   :  { %1162 = vmatprep.subr.bf16.mxu1 %v3629_v11  ;;  %v3681_v11 = vld [vmem:[#allocation7 + $0x328] ss:$16 sps:$4 sm:$0xff]  }
 0x127   :  { %v193_v19 = vpop.f32.mrb[0].mxu1 }
 0x128   :  { %v194_v20 = vadd.f32 %v193_v19, %v98_v17  ;;  %v195_v21 = vpop.f32.mrb[1].mxu1  ;;  %v3689_v17 = vld [vmem:[#allocation7 + $0x34c] ss:$16 sps:$4 sm:$0xff]   ;;  %v3687_v19 = vld [vmem:[#allocation7 + $0x348] ss:$16 sps:$4 sm:$0xff]  }
 0x129   :  { %v196_v22 = vadd.f32 %v195_v21, %v102_v18  ;;  %v197_v23 = vpop.f32.mrb[2].mxu1  ;;  %v3684_v18 = vld [vmem:[#allocation7 + $0x340] ss:$16 sps:$4 sm:$0xff]   ;;  %v3695_v21 = vld [vmem:[#allocation7 + $0x36c] ss:$16 sps:$4 sm:$0xff]  }
 0x12a   :  { %v241_v25 = vmax.f32 %v194_v20, 0.0  ;;  %v198_v26 = vpop.f32.mrb[3].mxu1  ;;  %v3692_v20 = vld [vmem:[#allocation7 + $0x364] ss:$16 sps:$4 sm:$0xff]   ;;  %v3693_v23 = vld [vmem:[#allocation7 + $0x368] ss:$16 sps:$4 sm:$0xff]  }
 0x12b   :  { %v242_v27 = vmax.f32 %v196_v22, 0.0  ;;  %v3690_v22 = vld [vmem:[#allocation7 + $0x360] ss:$16 sps:$4 sm:$0xff]   ;;  %v3701_v26 = vld [vmem:[#allocation7 + $0x38c] ss:$16 sps:$4 sm:$0xff]  }
 0x12c   :  { %v245_v32 = vpack.c.bf16 %v241_v25, %v241_v25  ;;  %v3698_v25 = vld [vmem:[#allocation7 + $0x384] ss:$16 sps:$4 sm:$0xff]  }
 0x12d   :  { %v246_v28 = vpack.c.bf16 %v242_v27, %v242_v27  ;;  %v3696_v27 = vld [vmem:[#allocation7 + $0x380] ss:$16 sps:$4 sm:$0xff]  }
 0x12f   :  { %1071 = vmatprep.mubr.bf16.mxu0 %v246_v28  ;;  %1153 = vmatprep.mubr.bf16.mxu1 %v246_v28  ;;  %v4344_v35 = vpop.f32.mrb[4].mxu1  ;;  %v3699_v28 = vld [vmem:[#allocation7 + $0x388] ss:$16 sps:$4 sm:$0xff]  }
 0x130   :  { %1072 = vmatmul.mubr.bf16.vlgmr.msra.gmra.mrb[0].mxu0 %v245_v32  ;;  %1154 = vmatmul.mubr.bf16.vlgmr.msra.gmra.mrb[8].mxu1 %v245_v32  ;;  %v236_v36 = vpop.f32.mrb[5].mxu1  ;;  %v3702_v32 = vld [vmem:[#allocation7 + $0x3a0] ss:$16 sps:$4 sm:$0xff]  }
 0x131   :  { %1081 = vmatpush1.bf16.msra.mxu0 %v3624_v29  ;;  %1163 = vmatpush1.bf16.msra.mxu1 %v3627_v30  ;;  %v237_v39 = vadd.f32 %v236_v36, %v110_v31  ;;  %v238_v40 = vpop.f32.mrb[6].mxu1  ;;  %v4347_v29 = vsub.s32 2, %v4322_v13  ;;  %v3704_v30 = vld [vmem:[#allocation7 + $0x3a4] ss:$16 sps:$4 sm:$0xff]   ;;  %v3707_v31 = vld [vmem:[#allocation7 + $0x3ac] ss:$16 sps:$4 sm:$0xff]  }
 0x132   :  { %1082 = vmatprep.subr.bf16.mxu0 %v3632_v33  ;;  %1164 = vmatprep.subr.bf16.mxu1 %v3635_v34  ;;  %v239_v43 = vpop.f32.mrb[7].mxu1  ;;  %v3705_v33 = vld [vmem:[#allocation7 + $0x3a8] ss:$16 sps:$4 sm:$0xff]   ;;  %v3710_v36 = vld [vmem:[#allocation7 + $0x3c4] ss:$16 sps:$4 sm:$0xff]  }
 0x133   :  { %v244_v44 = vmax.f32 %v237_v39, 0.0  ;;  %v106_v34 = vrot.slane %v4330_v15, %v4347_v29  ;;  %v3711_v39 = vld [vmem:[#allocation7 + $0x3c8] ss:$16 sps:$4 sm:$0xff]   ;;  %v3714_v43 = vld [vmem:[#allocation7 + $0x3e0] ss:$16 sps:$4 sm:$0xff]  }
 0x134   :  { %v3722_v15 = vld [vmem:[#allocation8 + $0x4] ss:$28 sps:$4 sm:$0xff]  }
 0x135   :  { %1083 = vmatpush1.bf16.msra.mxu0 %v3630_v37  ;;  %1165 = vmatpush1.bf16.msra.mxu1 %v3633_v38  ;;  %v248_v47 = vpack.c.bf16 %v244_v44, %v244_v44  ;;  %v3713_v37 = vld [vmem:[#allocation7 + $0x3cc] ss:$16 sps:$4 sm:$0xff]   ;;  %v3708_v38 = vld [vmem:[#allocation7 + $0x3c0] ss:$16 sps:$4 sm:$0xff]   ;;  %v235_v40 = vadd.f32 %v4344_v35, %v106_v34  ;;  %v3717_v44 = vld [vmem:[#allocation7 + $0x3e8] ss:$16 sps:$4 sm:$0xff]  }
 0x136   :  { %1084 = vmatprep.subr.bf16.mxu0 %v3638_v41  ;;  %1166 = vmatprep.subr.bf16.mxu1 %v3641_v42  ;;  %v3716_v41 = vld [vmem:[#allocation7 + $0x3e4] ss:$16 sps:$4 sm:$0xff]   ;;  %v3719_v42 = vld [vmem:[#allocation7 + $0x3ec] ss:$16 sps:$4 sm:$0xff]  }
 0x137   :  { %1112 = vmatprep.mubr.bf16.mxu0 %v248_v47  ;;  %1194 = vmatprep.mubr.bf16.mxu1 %v248_v47  ;;  %v3720_v47 = vld [vmem:[#allocation8] ss:$28 sps:$4 sm:$0xff]   ;;  %v3789_v34 = vld [vmem:[#allocation8 + $0x270] ss:$28 sps:$4 sm:$0xff]  }
 0x138   :  { %v3728_v35 = vld [vmem:[#allocation8 + $0x3c] ss:$28 sps:$4 sm:$0xff]  }
 0x139   :  { %1085 = vmatpush1.bf16.msra.mxu0 %v3636_v45  ;;  %1167 = vmatpush1.bf16.msra.mxu1 %v3639_v46  ;;  %v243_v45 = vmax.f32 %v235_v40, 0.0  ;;  %v3725_v46 = vld [vmem:[#allocation8 + $0xc] ss:$28 sps:$4 sm:$0xff]   ;;  %v3800_v40 = vld [vmem:[#allocation8 + $0x2dc] ss:$28 sps:$4 sm:$0xff]  }
 0x13a   :  { %1086 = vmatprep.subr.bf16.mxu0 %v3644_v48  ;;  %1168 = vmatprep.subr.bf16.mxu1 %v3647_v49  ;;  %v3723_v48 = vld [vmem:[#allocation8 + $0x8] ss:$28 sps:$4 sm:$0xff]  }
 0x13b   :  { %v247_v49 = vpack.c.bf16 %v243_v45, %v243_v45  ;;  %v3809_v45 = vld [vmem:[#allocation8 + $0x31c] ss:$28 sps:$4 sm:$0xff]  }
 0x13d   :  { %1087 = vmatpush1.bf16.msra.mxu0 %v3642_v50  ;;  %1169 = vmatpush1.bf16.msra.mxu1 %v3645_v51  ;;  %v3731_v50 = vld [vmem:[#allocation8 + $0x44] ss:$28 sps:$4 sm:$0xff]   ;;  %v3726_v51 = vld [vmem:[#allocation8 + $0x38] ss:$28 sps:$4 sm:$0xff]  }
 0x13e   :  { %1088 = vmatprep.subr.bf16.mxu0 %v3650_v52  ;;  %1170 = vmatprep.subr.bf16.mxu1 %v3653_v53  ;;  %v3729_v52 = vld [vmem:[#allocation8 + $0x40] ss:$28 sps:$4 sm:$0xff]   ;;  %v3734_v53 = vld [vmem:[#allocation8 + $0x74] ss:$28 sps:$4 sm:$0xff]  }
 0x141   :  { %1089 = vmatpush1.bf16.msra.mxu0 %v3648_v54  ;;  %1171 = vmatpush1.bf16.msra.mxu1 %v3651_v55  ;;  %v3737_v54 = vld [vmem:[#allocation8 + $0x7c] ss:$28 sps:$4 sm:$0xff]   ;;  %v3732_v55 = vld [vmem:[#allocation8 + $0x70] ss:$28 sps:$4 sm:$0xff]  }
 0x142   :  { %1090 = vmatprep.subr.bf16.mxu0 %v3656_v56  ;;  %1172 = vmatprep.subr.bf16.mxu1 %v3659_v57  ;;  %v3735_v56 = vld [vmem:[#allocation8 + $0x78] ss:$28 sps:$4 sm:$0xff]   ;;  %v3740_v57 = vld [vmem:[#allocation8 + $0xac] ss:$28 sps:$4 sm:$0xff]  }
 0x145   :  { %1091 = vmatpush1.bf16.msra.mxu0 %v3654_v58  ;;  %1173 = vmatpush1.bf16.msra.mxu1 %v3657_v59  ;;  %v3743_v58 = vld [vmem:[#allocation8 + $0xb4] ss:$28 sps:$4 sm:$0xff]   ;;  %v3738_v59 = vld [vmem:[#allocation8 + $0xa8] ss:$28 sps:$4 sm:$0xff]  }
 0x146   :  { %1092 = vmatprep.subr.bf16.mxu0 %v3662_v60  ;;  %1174 = vmatprep.subr.bf16.mxu1 %v3665_v61  ;;  %v3741_v60 = vld [vmem:[#allocation8 + $0xb0] ss:$28 sps:$4 sm:$0xff]   ;;  %v3746_v61 = vld [vmem:[#allocation8 + $0xe4] ss:$28 sps:$4 sm:$0xff]  }
 0x149   :  { %1093 = vmatpush1.bf16.msra.mxu0 %v3660_v62  ;;  %1175 = vmatpush1.bf16.msra.mxu1 %v3663_v63  ;;  %v3749_v62 = vld [vmem:[#allocation8 + $0xec] ss:$28 sps:$4 sm:$0xff]   ;;  %v3744_v63 = vld [vmem:[#allocation8 + $0xe0] ss:$28 sps:$4 sm:$0xff]  }
 0x14a   :  { %1094 = vmatprep.subr.bf16.mxu0 %v3668_v0  ;;  %1176 = vmatprep.subr.bf16.mxu1 %v3671_v1  ;;  %v3747_v0 = vld [vmem:[#allocation8 + $0xe8] ss:$28 sps:$4 sm:$0xff]   ;;  %v3752_v1 = vld [vmem:[#allocation8 + $0x11c] ss:$28 sps:$4 sm:$0xff]  }
 0x14d   :  { %1095 = vmatpush1.bf16.msra.mxu0 %v3666_v2  ;;  %1177 = vmatpush1.bf16.msra.mxu1 %v3669_v3  ;;  %v3755_v2 = vld [vmem:[#allocation8 + $0x124] ss:$28 sps:$4 sm:$0xff]   ;;  %v3750_v3 = vld [vmem:[#allocation8 + $0x118] ss:$28 sps:$4 sm:$0xff]  }
 0x14e   :  { %1096 = vmatprep.subr.bf16.mxu0 %v3674_v4  ;;  %1178 = vmatprep.subr.bf16.mxu1 %v3677_v5  ;;  %v3753_v4 = vld [vmem:[#allocation8 + $0x120] ss:$28 sps:$4 sm:$0xff]   ;;  %v3758_v5 = vld [vmem:[#allocation8 + $0x154] ss:$28 sps:$4 sm:$0xff]  }
 0x151   :  { %1097 = vmatpush1.bf16.msra.mxu0 %v3672_v6  ;;  %1179 = vmatpush1.bf16.msra.mxu1 %v3675_v7  ;;  %v3761_v6 = vld [vmem:[#allocation8 + $0x15c] ss:$28 sps:$4 sm:$0xff]   ;;  %v3756_v7 = vld [vmem:[#allocation8 + $0x150] ss:$28 sps:$4 sm:$0xff]  }
 0x152   :  { %1098 = vmatprep.subr.bf16.mxu0 %v3680_v8  ;;  %1180 = vmatprep.subr.bf16.mxu1 %v3683_v9  ;;  %v3759_v8 = vld [vmem:[#allocation8 + $0x158] ss:$28 sps:$4 sm:$0xff]   ;;  %v3764_v9 = vld [vmem:[#allocation8 + $0x18c] ss:$28 sps:$4 sm:$0xff]  }
 0x155   :  { %1099 = vmatpush1.bf16.msra.mxu0 %v3678_v10  ;;  %1181 = vmatpush1.bf16.msra.mxu1 %v3681_v11  ;;  %v3767_v10 = vld [vmem:[#allocation8 + $0x194] ss:$28 sps:$4 sm:$0xff]   ;;  %v3762_v11 = vld [vmem:[#allocation8 + $0x188] ss:$28 sps:$4 sm:$0xff]  }
 0x156   :  { %1100 = vmatprep.subr.bf16.mxu0 %v3686_v12  ;;  %1182 = vmatprep.subr.bf16.mxu1 %v3689_v17  ;;  %v3765_v12 = vld [vmem:[#allocation8 + $0x190] ss:$28 sps:$4 sm:$0xff]   ;;  %v3770_v17 = vld [vmem:[#allocation8 + $0x1c4] ss:$28 sps:$4 sm:$0xff]  }
 0x159   :  { %1101 = vmatpush1.bf16.msra.mxu0 %v3684_v18  ;;  %1183 = vmatpush1.bf16.msra.mxu1 %v3687_v19  ;;  %v3773_v18 = vld [vmem:[#allocation8 + $0x1cc] ss:$28 sps:$4 sm:$0xff]   ;;  %v3768_v19 = vld [vmem:[#allocation8 + $0x1c0] ss:$28 sps:$4 sm:$0xff]  }
 0x15a   :  { %1102 = vmatprep.subr.bf16.mxu0 %v3692_v20  ;;  %1184 = vmatprep.subr.bf16.mxu1 %v3695_v21  ;;  %v3771_v20 = vld [vmem:[#allocation8 + $0x1c8] ss:$28 sps:$4 sm:$0xff]   ;;  %v3776_v21 = vld [vmem:[#allocation8 + $0x1fc] ss:$28 sps:$4 sm:$0xff]  }
 0x15d   :  { %1103 = vmatpush1.bf16.msra.mxu0 %v3690_v22  ;;  %1185 = vmatpush1.bf16.msra.mxu1 %v3693_v23  ;;  %v3779_v22 = vld [vmem:[#allocation8 + $0x204] ss:$28 sps:$4 sm:$0xff]   ;;  %v3774_v23 = vld [vmem:[#allocation8 + $0x1f8] ss:$28 sps:$4 sm:$0xff]  }
 0x15e   :  { %1104 = vmatprep.subr.bf16.mxu0 %v3698_v25  ;;  %1186 = vmatprep.subr.bf16.mxu1 %v3701_v26  ;;  %v3777_v25 = vld [vmem:[#allocation8 + $0x200] ss:$28 sps:$4 sm:$0xff]   ;;  %v3782_v26 = vld [vmem:[#allocation8 + $0x234] ss:$28 sps:$4 sm:$0xff]  }
 0x161   :  { %1105 = vmatpush1.bf16.msra.mxu0 %v3696_v27  ;;  %1187 = vmatpush1.bf16.msra.mxu1 %v3699_v28  ;;  %v3785_v27 = vld [vmem:[#allocation8 + $0x23c] ss:$28 sps:$4 sm:$0xff]   ;;  %v3780_v28 = vld [vmem:[#allocation8 + $0x230] ss:$28 sps:$4 sm:$0xff]  }
 0x162   :  { %1106 = vmatprep.subr.bf16.mxu0 %v3704_v30  ;;  %1188 = vmatprep.subr.bf16.mxu1 %v3707_v31  ;;  %v3783_v30 = vld [vmem:[#allocation8 + $0x238] ss:$28 sps:$4 sm:$0xff]   ;;  %v3788_v31 = vld [vmem:[#allocation8 + $0x26c] ss:$28 sps:$4 sm:$0xff]  }
 0x165   :  { %1107 = vmatpush1.bf16.msra.mxu0 %v3702_v32  ;;  %1189 = vmatpush1.bf16.msra.mxu1 %v3705_v33  ;;  %v3791_v32 = vld [vmem:[#allocation8 + $0x274] ss:$28 sps:$4 sm:$0xff]   ;;  %v3786_v33 = vld [vmem:[#allocation8 + $0x268] ss:$28 sps:$4 sm:$0xff]  }
 0x166   :  { %1108 = vmatprep.subr.bf16.mxu0 %v3710_v36  ;;  %1190 = vmatprep.subr.bf16.mxu1 %v3713_v37  ;;  %v3794_v36 = vld [vmem:[#allocation8 + $0x2a4] ss:$28 sps:$4 sm:$0xff]   ;;  %v3797_v37 = vld [vmem:[#allocation8 + $0x2ac] ss:$28 sps:$4 sm:$0xff]  }
 0x169   :  { %1109 = vmatpush1.bf16.msra.mxu0 %v3708_v38  ;;  %1191 = vmatpush1.bf16.msra.mxu1 %v3711_v39  ;;  %v3792_v38 = vld [vmem:[#allocation8 + $0x2a0] ss:$28 sps:$4 sm:$0xff]   ;;  %v3795_v39 = vld [vmem:[#allocation8 + $0x2a8] ss:$28 sps:$4 sm:$0xff]  }
 0x16a   :  { %1110 = vmatprep.subr.bf16.mxu0 %v3716_v41  ;;  %1192 = vmatprep.subr.bf16.mxu1 %v3719_v42  ;;  %v3803_v41 = vld [vmem:[#allocation8 + $0x2e4] ss:$28 sps:$4 sm:$0xff]   ;;  %v3798_v42 = vld [vmem:[#allocation8 + $0x2d8] ss:$28 sps:$4 sm:$0xff]  }
 0x16d   :  { %1111 = vmatpush1.bf16.msra.mxu0 %v3714_v43  ;;  %1193 = vmatpush1.bf16.msra.mxu1 %v3717_v44  ;;  %v3801_v43 = vld [vmem:[#allocation8 + $0x2e0] ss:$28 sps:$4 sm:$0xff]   ;;  %v3806_v44 = vld [vmem:[#allocation8 + $0x314] ss:$28 sps:$4 sm:$0xff]  }
 0x16e   :  { %2656 = vmatprep.subr.bf16.mxu0 %v3722_v15  ;;  %2738 = vmatprep.subr.bf16.mxu1 %v3725_v46  ;;  %v3804_v15 = vld [vmem:[#allocation8 + $0x310] ss:$28 sps:$4 sm:$0xff]   ;;  %v3807_v46 = vld [vmem:[#allocation8 + $0x318] ss:$28 sps:$4 sm:$0xff]  }
 0x170   :  { %1113 = vmatmul.mubr.bf16.vlgmr.msra.gmra.mrb[0].mxu0 %v247_v49  ;;  %1195 = vmatmul.mubr.bf16.vlgmr.msra.gmra.mrb[8].mxu1 %v247_v49  ;;  %v3810_v49 = vld [vmem:[#allocation8 + $0x348] ss:$28 sps:$4 sm:$0xff]  }
 0x171   :  { %2657 = vmatpush1.bf16.msra.mxu0 %v3720_v47  ;;  %2739 = vmatpush1.bf16.msra.mxu1 %v3723_v48  ;;  %v3812_v47 = vld [vmem:[#allocation8 + $0x34c] ss:$28 sps:$4 sm:$0xff]   ;;  %v3815_v48 = vld [vmem:[#allocation8 + $0x354] ss:$28 sps:$4 sm:$0xff]  }
 0x172   :  { %2658 = vmatprep.subr.bf16.mxu0 %v3728_v35  ;;  %2740 = vmatprep.subr.bf16.mxu1 %v3731_v50  ;;  %v3813_v35 = vld [vmem:[#allocation8 + $0x350] ss:$28 sps:$4 sm:$0xff]   ;;  %v3818_v50 = vld [vmem:[#allocation8 + $0x384] ss:$28 sps:$4 sm:$0xff]  }
 0x175   :  { %2659 = vmatpush1.bf16.msra.mxu0 %v3726_v51  ;;  %2741 = vmatpush1.bf16.msra.mxu1 %v3729_v52  ;;  %v3821_v51 = vld [vmem:[#allocation8 + $0x38c] ss:$28 sps:$4 sm:$0xff]   ;;  %v4355_v52 = vld [vmem:[%s4439_s4] sm:$0xf] }
 0x176   :  { %2660 = vmatprep.subr.bf16.mxu0 %v3734_v53  ;;  %2742 = vmatprep.subr.bf16.mxu1 %v3737_v54  ;;  %v382_v53 = vrot.slane %v4355_v52, %v4325_v14  ;;  %v386_v54 = vrot.slane %v4355_v52, %v4333_v16 }
 0x179   :  { %2661 = vmatpush1.bf16.msra.mxu0 %v3732_v55  ;;  %2743 = vmatpush1.bf16.msra.mxu1 %v3735_v56  ;;  %v394_v55 = vrot.slane %v4355_v52, %v4340_v24 }
 0x17a   :  { %2662 = vmatprep.subr.bf16.mxu0 %v3740_v57  ;;  %2744 = vmatprep.subr.bf16.mxu1 %v3743_v58 }
 0x17d   :  { %2663 = vmatpush1.bf16.msra.mxu0 %v3738_v59  ;;  %2745 = vmatpush1.bf16.msra.mxu1 %v3741_v60 }
 0x17e   :  { %2664 = vmatprep.subr.bf16.mxu0 %v3746_v61  ;;  %2746 = vmatprep.subr.bf16.mxu1 %v3749_v62 }
 0x181   :  { %2665 = vmatpush1.bf16.msra.mxu0 %v3744_v63  ;;  %2747 = vmatpush1.bf16.msra.mxu1 %v3747_v0 }
 0x182   :  { %2666 = vmatprep.subr.bf16.mxu0 %v3752_v1  ;;  %2748 = vmatprep.subr.bf16.mxu1 %v3755_v2 }
 0x185   :  { %2667 = vmatpush1.bf16.msra.mxu0 %v3750_v3  ;;  %2749 = vmatpush1.bf16.msra.mxu1 %v3753_v4 }
 0x186   :  { %2668 = vmatprep.subr.bf16.mxu0 %v3758_v5  ;;  %2750 = vmatprep.subr.bf16.mxu1 %v3761_v6 }
 0x189   :  { %2669 = vmatpush1.bf16.msra.mxu0 %v3756_v7  ;;  %2751 = vmatpush1.bf16.msra.mxu1 %v3759_v8  ;;  %v3816_v7 = vld [vmem:[#allocation8 + $0x380] ss:$28 sps:$4 sm:$0xff]   ;;  %v3819_v8 = vld [vmem:[#allocation8 + $0x388] ss:$28 sps:$4 sm:$0xff]  }
 0x18a   :  { %2670 = vmatprep.subr.bf16.mxu0 %v3764_v9  ;;  %2752 = vmatprep.subr.bf16.mxu1 %v3767_v10  ;;  %v3824_v10 = vld [vmem:[#allocation8 + $0x3bc] ss:$28 sps:$4 sm:$0xff]  }
 0x18d   :  { %2671 = vmatpush1.bf16.msra.mxu0 %v3762_v11  ;;  %2753 = vmatpush1.bf16.msra.mxu1 %v3765_v12  ;;  %v3827_v11 = vld [vmem:[#allocation8 + $0x3c4] ss:$28 sps:$4 sm:$0xff]  }
 0x18e   :  { %2672 = vmatprep.subr.bf16.mxu0 %v3770_v17  ;;  %2754 = vmatprep.subr.bf16.mxu1 %v3773_v18  ;;  %v3822_v17 = vld [vmem:[#allocation8 + $0x3b8] ss:$28 sps:$4 sm:$0xff]   ;;  %v3825_v18 = vld [vmem:[#allocation8 + $0x3c0] ss:$28 sps:$4 sm:$0xff]  }
 0x191   :  { %2673 = vmatpush1.bf16.msra.mxu0 %v3768_v19  ;;  %2755 = vmatpush1.bf16.msra.mxu1 %v3771_v20  ;;  %v3830_v19 = vld [vmem:[#allocation8 + $0x3f4] ss:$28 sps:$4 sm:$0xff]   ;;  %v3833_v20 = vld [vmem:[#allocation8 + $0x3fc] ss:$28 sps:$4 sm:$0xff]  }
 0x192   :  { %2674 = vmatprep.subr.bf16.mxu0 %v3776_v21  ;;  %2756 = vmatprep.subr.bf16.mxu1 %v3779_v22  ;;  %v3828_v21 = vld [vmem:[#allocation8 + $0x3f0] ss:$28 sps:$4 sm:$0xff]   ;;  %v3831_v22 = vld [vmem:[#allocation8 + $0x3f8] ss:$28 sps:$4 sm:$0xff]  }
 0x195   :  { %2675 = vmatpush1.bf16.msra.mxu0 %v3774_v23  ;;  %2757 = vmatpush1.bf16.msra.mxu1 %v3777_v25  ;;  %v3836_v23 = vld [vmem:[#allocation8 + $0x42c] ss:$28 sps:$4 sm:$0xff]   ;;  %v3839_v25 = vld [vmem:[#allocation8 + $0x434] ss:$28 sps:$4 sm:$0xff]  }
 0x196   :  { %2676 = vmatprep.subr.bf16.mxu0 %v3782_v26  ;;  %2758 = vmatprep.subr.bf16.mxu1 %v3785_v27  ;;  %v3834_v26 = vld [vmem:[#allocation8 + $0x428] ss:$28 sps:$4 sm:$0xff]   ;;  %v3837_v27 = vld [vmem:[#allocation8 + $0x430] ss:$28 sps:$4 sm:$0xff]  }
 0x199   :  { %2677 = vmatpush1.bf16.msra.mxu0 %v3780_v28  ;;  %2759 = vmatpush1.bf16.msra.mxu1 %v3783_v30  ;;  %v3842_v28 = vld [vmem:[#allocation8 + $0x464] ss:$28 sps:$4 sm:$0xff]   ;;  %v3845_v30 = vld [vmem:[#allocation8 + $0x46c] ss:$28 sps:$4 sm:$0xff]  }
 0x19a   :  { %2678 = vmatprep.subr.bf16.mxu0 %v3788_v31  ;;  %2760 = vmatprep.subr.bf16.mxu1 %v3791_v32  ;;  %v3840_v31 = vld [vmem:[#allocation8 + $0x460] ss:$28 sps:$4 sm:$0xff]   ;;  %v3843_v32 = vld [vmem:[#allocation8 + $0x468] ss:$28 sps:$4 sm:$0xff]  }
 0x19d   :  { %2679 = vmatpush1.bf16.msra.mxu0 %v3786_v33  ;;  %2761 = vmatpush1.bf16.msra.mxu1 %v3789_v34  ;;  %v3848_v33 = vld [vmem:[#allocation8 + $0x49c] ss:$28 sps:$4 sm:$0xff]   ;;  %v3851_v34 = vld [vmem:[#allocation8 + $0x4a4] ss:$28 sps:$4 sm:$0xff]  }
 0x19e   :  { %2680 = vmatprep.subr.bf16.mxu0 %v3794_v36  ;;  %2762 = vmatprep.subr.bf16.mxu1 %v3797_v37  ;;  %v3846_v36 = vld [vmem:[#allocation8 + $0x498] ss:$28 sps:$4 sm:$0xff]   ;;  %v3849_v37 = vld [vmem:[#allocation8 + $0x4a0] ss:$28 sps:$4 sm:$0xff]  }
 0x1a1   :  { %2681 = vmatpush1.bf16.msra.mxu0 %v3792_v38  ;;  %2763 = vmatpush1.bf16.msra.mxu1 %v3795_v39  ;;  %v3854_v38 = vld [vmem:[#allocation8 + $0x4d4] ss:$28 sps:$4 sm:$0xff]   ;;  %v3857_v39 = vld [vmem:[#allocation8 + $0x4dc] ss:$28 sps:$4 sm:$0xff]  }
 0x1a2   :  { %2682 = vmatprep.subr.bf16.mxu0 %v3800_v40  ;;  %2764 = vmatprep.subr.bf16.mxu1 %v3803_v41  ;;  %v3852_v40 = vld [vmem:[#allocation8 + $0x4d0] ss:$28 sps:$4 sm:$0xff]   ;;  %v3855_v41 = vld [vmem:[#allocation8 + $0x4d8] ss:$28 sps:$4 sm:$0xff]  }
 0x1a5   :  { %2683 = vmatpush1.bf16.msra.mxu0 %v3798_v42  ;;  %2765 = vmatpush1.bf16.msra.mxu1 %v3801_v43  ;;  %v3860_v42 = vld [vmem:[#allocation8 + $0x50c] ss:$28 sps:$4 sm:$0xff]   ;;  %v3863_v43 = vld [vmem:[#allocation8 + $0x514] ss:$28 sps:$4 sm:$0xff]  }
 0x1a6   :  { %2684 = vmatprep.subr.bf16.mxu0 %v3806_v44  ;;  %2766 = vmatprep.subr.bf16.mxu1 %v3809_v45  ;;  %v3858_v44 = vld [vmem:[#allocation8 + $0x508] ss:$28 sps:$4 sm:$0xff]   ;;  %v3861_v45 = vld [vmem:[#allocation8 + $0x510] ss:$28 sps:$4 sm:$0xff]  }
 0x1a9   :  { %2685 = vmatpush1.bf16.msra.mxu0 %v3804_v15  ;;  %2767 = vmatpush1.bf16.msra.mxu1 %v3807_v46  ;;  %v3866_v15 = vld [vmem:[#allocation8 + $0x544] ss:$28 sps:$4 sm:$0xff]   ;;  %v3869_v46 = vld [vmem:[#allocation8 + $0x54c] ss:$28 sps:$4 sm:$0xff]  }
 0x1aa   :  { %2686 = vmatprep.subr.bf16.mxu0 %v3812_v47  ;;  %2768 = vmatprep.subr.bf16.mxu1 %v3815_v48  ;;  %v3864_v47 = vld [vmem:[#allocation8 + $0x540] ss:$28 sps:$4 sm:$0xff]   ;;  %v3867_v48 = vld [vmem:[#allocation8 + $0x548] ss:$28 sps:$4 sm:$0xff]  }
 0x1ad   :  { %2687 = vmatpush1.bf16.msra.mxu0 %v3810_v49  ;;  %2769 = vmatpush1.bf16.msra.mxu1 %v3813_v35  ;;  %v3872_v49 = vld [vmem:[#allocation8 + $0x57c] ss:$28 sps:$4 sm:$0xff]   ;;  %v3875_v35 = vld [vmem:[#allocation8 + $0x584] ss:$28 sps:$4 sm:$0xff]  }
 0x1ae   :  { %2697 = vmatprep.subr.bf16.mxu0 %v3818_v50  ;;  %2779 = vmatprep.subr.bf16.mxu1 %v3821_v51  ;;  %v3870_v50 = vld [vmem:[#allocation8 + $0x578] ss:$28 sps:$4 sm:$0xff]   ;;  %v3873_v51 = vld [vmem:[#allocation8 + $0x580] ss:$28 sps:$4 sm:$0xff]  }
 0x243   :  { %v1114_v56 = vpop.f32.mrb[0].mxu0  ;;  %v4363_v57 = vpop.f32.mrb[8].mxu1 }
 0x244   :  { %v3475_v58 = vadd.f32 %v1114_v56, %v382_v53  ;;  %v1116_v59 = vpop.f32.mrb[1].mxu0  ;;  %v1198_v60 = vpop.f32.mrb[9].mxu1  ;;  %v3878_v53 = vld [vmem:[#allocation8 + $0x5b4] ss:$28 sps:$4 sm:$0xff]  }
 0x245   :  { %v3476_v61 = vadd.f32 %v1116_v59, %v386_v54  ;;  %v3478_v62 = vadd.f32 %v1198_v60, %v394_v55  ;;  %v1118_v63 = vpop.f32.mrb[2].mxu0  ;;  %v1200_v0 = vpop.f32.mrb[10].mxu1  ;;  %v3881_v54 = vld [vmem:[#allocation8 + $0x5bc] ss:$28 sps:$4 sm:$0xff]   ;;  %v3876_v55 = vld [vmem:[#allocation8 + $0x5b0] ss:$28 sps:$4 sm:$0xff]  }
 0x246   :  { %v1203_v1 = vmax.f32 %v3475_v58, 0.0  ;;  %v1119_v2 = vpop.f32.mrb[3].mxu0  ;;  %v1201_v3 = vpop.f32.mrb[11].mxu1  ;;  %v3879_v56 = vld [vmem:[#allocation8 + $0x5b8] ss:$28 sps:$4 sm:$0xff]  }
 0x247   :  { %v1204_v4 = vmax.f32 %v3476_v61, 0.0  ;;  %v1206_v5 = vmax.f32 %v3478_v62, 0.0  ;;  %v3884_v58 = vld [vmem:[#allocation8 + $0x5ec] ss:$28 sps:$4 sm:$0xff]   ;;  %v3887_v59 = vld [vmem:[#allocation8 + $0x5f4] ss:$28 sps:$4 sm:$0xff]  }
 0x248   :  { %v4367_v9 = vpack.c.bf16 %v1203_v1, %v1203_v1  ;;  %v3882_v60 = vld [vmem:[#allocation8 + $0x5e8] ss:$28 sps:$4 sm:$0xff]   ;;  %v3885_v61 = vld [vmem:[#allocation8 + $0x5f0] ss:$28 sps:$4 sm:$0xff]   ;;  %v3888_v0 = vld [vmem:[#allocation8 + $0x620] ss:$28 sps:$4 sm:$0xff]  }
 0x249   :  { %v4365_v6 = vpack.c.bf16 %v1204_v4, %v1204_v4  ;;  %v4371_v12 = vpack.c.bf16 %v1206_v5, %v1206_v5  ;;  %v3890_v62 = vld [vmem:[#allocation8 + $0x624] ss:$28 sps:$4 sm:$0xff]   ;;  %v3893_v63 = vld [vmem:[#allocation8 + $0x62c] ss:$28 sps:$4 sm:$0xff]   ;;  %v3896_v2 = vld [vmem:[#allocation8 + $0x65c] ss:$28 sps:$4 sm:$0xff]  }
 0x24a   :  { %v3891_v1 = vld [vmem:[#allocation8 + $0x628] ss:$28 sps:$4 sm:$0xff]   ;;  %v3894_v4 = vld [vmem:[#allocation8 + $0x658] ss:$28 sps:$4 sm:$0xff]   ;;  %v3897_v5 = vld [vmem:[#allocation8 + $0x660] ss:$28 sps:$4 sm:$0xff]  }
 0x24b   :  { %2688 = vmatprep.mubr.bf16.mxu0 %v4365_v6  ;;  %2770 = vmatprep.mubr.bf16.mxu1 %v4365_v6  ;;  %v3899_v3 = vld [vmem:[#allocation8 + $0x664] ss:$28 sps:$4 sm:$0xff]  }
 0x24c   :  { %2689 = vmatmul.mubr.bf16.vlgmr.msra.gmra.mrb[4].mxu0 %v4367_v9  ;;  %2771 = vmatmul.mubr.bf16.vlgmr.msra.gmra.mrb[12].mxu1 %v4367_v9 }
 0x24d   :  { %2698 = vmatpush1.bf16.msra.mxu0 %v3816_v7  ;;  %2780 = vmatpush1.bf16.msra.mxu1 %v3819_v8  ;;  %v390_v7 = vrot.slane %v4355_v52, %v4347_v29  ;;  %v3902_v8 = vld [vmem:[#allocation8 + $0x694] ss:$28 sps:$4 sm:$0xff]  }
 0x24e   :  { %2729 = vmatprep.mubr.bf16.mxu0 %v4371_v12  ;;  %2811 = vmatprep.mubr.bf16.mxu1 %v4371_v12  ;;  %v3914_v52 = vld [vmem:[#allocation8 + $0x14] ss:$28 sps:$4 sm:$0xff]  }
 0x24f   :  { %2699 = vmatprep.subr.bf16.mxu0 %v3824_v10  ;;  %2781 = vmatprep.subr.bf16.mxu1 %v3827_v11  ;;  %v3905_v10 = vld [vmem:[#allocation8 + $0x69c] ss:$28 sps:$4 sm:$0xff]   ;;  %v3900_v11 = vld [vmem:[#allocation8 + $0x690] ss:$28 sps:$4 sm:$0xff]  }
 0x251   :  { %2700 = vmatpush1.bf16.msra.mxu0 %v3822_v17  ;;  %2782 = vmatpush1.bf16.msra.mxu1 %v3825_v18  ;;  %v3903_v17 = vld [vmem:[#allocation8 + $0x698] ss:$28 sps:$4 sm:$0xff]   ;;  %v3477_v18 = vadd.f32 %v4363_v57, %v390_v7  ;;  %v3970_v7 = vld [vmem:[#allocation8 + $0x600] ss:$28 sps:$4 sm:$0xff]  }
 0x252   :  { %2701 = vmatprep.subr.bf16.mxu0 %v3830_v19  ;;  %2783 = vmatprep.subr.bf16.mxu1 %v3833_v20  ;;  %v3908_v19 = vld [vmem:[#allocation8 + $0x6cc] ss:$28 sps:$4 sm:$0xff]   ;;  %v3911_v20 = vld [vmem:[#allocation8 + $0x6d4] ss:$28 sps:$4 sm:$0xff]  }
 0x253   :  { %v3916_v57 = vld [vmem:[#allocation8 + $0x18] ss:$28 sps:$4 sm:$0xff]  }
 0x255   :  { %2702 = vmatpush1.bf16.msra.mxu0 %v3828_v21  ;;  %2784 = vmatpush1.bf16.msra.mxu1 %v3831_v22  ;;  %v3906_v21 = vld [vmem:[#allocation8 + $0x6c8] ss:$28 sps:$4 sm:$0xff]   ;;  %v3909_v22 = vld [vmem:[#allocation8 + $0x6d0] ss:$28 sps:$4 sm:$0xff]  }
 0x256   :  { %2703 = vmatprep.subr.bf16.mxu0 %v3836_v23  ;;  %2785 = vmatprep.subr.bf16.mxu1 %v3839_v25  ;;  %v1205_v23 = vmax.f32 %v3477_v18, 0.0  ;;  %v3915_v25 = vld [vmem:[#allocation8 + $0x1d8] ss:$28 sps:$4 sm:$0xff]   ;;  %v3972_v18 = vld [vmem:[#allocation8 + $0x2b0] ss:$28 sps:$4 sm:$0xff]  }
 0x259   :  { %2704 = vmatpush1.bf16.msra.mxu0 %v3834_v26  ;;  %2786 = vmatpush1.bf16.msra.mxu1 %v3837_v27  ;;  %v3912_v26 = vld [vmem:[#allocation8 + $0x10] ss:$28 sps:$4 sm:$0xff]   ;;  %v4380_v27 = vpack.c.bf16 %v1205_v23, %v1205_v23 }
 0x25a   :  { %2705 = vmatprep.subr.bf16.mxu0 %v3842_v28  ;;  %2787 = vmatprep.subr.bf16.mxu1 %v3845_v30  ;;  %v3919_v28 = vld [vmem:[#allocation8 + $0x4c] ss:$28 sps:$4 sm:$0xff]  }
 0x25b   :  { %v3920_v30 = vld [vmem:[#allocation8 + $0x210] ss:$28 sps:$4 sm:$0xff]  }
 0x25c   :  { %v3981_v23 = vld [vmem:[#allocation8 + $0x4b0] ss:$28 sps:$4 sm:$0xff]  }
 0x25d   :  { %2706 = vmatpush1.bf16.msra.mxu0 %v3840_v31  ;;  %2788 = vmatpush1.bf16.msra.mxu1 %v3843_v32  ;;  %v3917_v31 = vld [vmem:[#allocation8 + $0x48] ss:$28 sps:$4 sm:$0xff]   ;;  %v3921_v32 = vld [vmem:[#allocation8 + $0x50] ss:$28 sps:$4 sm:$0xff]  }
 0x25e   :  { %2707 = vmatprep.subr.bf16.mxu0 %v3848_v33  ;;  %2789 = vmatprep.subr.bf16.mxu1 %v3851_v34  ;;  %v3924_v33 = vld [vmem:[#allocation8 + $0x84] ss:$28 sps:$4 sm:$0xff]  }
 0x25f   :  { %v3925_v34 = vld [vmem:[#allocation8 + $0x248] ss:$28 sps:$4 sm:$0xff]  }
 0x261   :  { %2708 = vmatpush1.bf16.msra.mxu0 %v3846_v36  ;;  %2790 = vmatpush1.bf16.msra.mxu1 %v3849_v37  ;;  %v3922_v36 = vld [vmem:[#allocation8 + $0x80] ss:$28 sps:$4 sm:$0xff]   ;;  %v3926_v37 = vld [vmem:[#allocation8 + $0x88] ss:$28 sps:$4 sm:$0xff]  }
 0x262   :  { %2709 = vmatprep.subr.bf16.mxu0 %v3854_v38  ;;  %2791 = vmatprep.subr.bf16.mxu1 %v3857_v39  ;;  %v3929_v38 = vld [vmem:[#allocation8 + $0xbc] ss:$28 sps:$4 sm:$0xff]  }
 0x263   :  { %v3930_v39 = vld [vmem:[#allocation8 + $0x280] ss:$28 sps:$4 sm:$0xff]  }
 0x265   :  { %2710 = vmatpush1.bf16.msra.mxu0 %v3852_v40  ;;  %2792 = vmatpush1.bf16.msra.mxu1 %v3855_v41  ;;  %v3927_v40 = vld [vmem:[#allocation8 + $0xb8] ss:$28 sps:$4 sm:$0xff]   ;;  %v3931_v41 = vld [vmem:[#allocation8 + $0xc0] ss:$28 sps:$4 sm:$0xff]  }
 0x266   :  { %2711 = vmatprep.subr.bf16.mxu0 %v3860_v42  ;;  %2793 = vmatprep.subr.bf16.mxu1 %v3863_v43  ;;  %v3934_v42 = vld [vmem:[#allocation8 + $0xf4] ss:$28 sps:$4 sm:$0xff]  }
 0x267   :  { %v3932_v43 = vld [vmem:[#allocation8 + $0xf0] ss:$28 sps:$4 sm:$0xff]  }
 0x269   :  { %2712 = vmatpush1.bf16.msra.mxu0 %v3858_v44  ;;  %2794 = vmatpush1.bf16.msra.mxu1 %v3861_v45  ;;  %v3936_v44 = vld [vmem:[#allocation8 + $0xf8] ss:$28 sps:$4 sm:$0xff]   ;;  %v3939_v45 = vld [vmem:[#allocation8 + $0x12c] ss:$28 sps:$4 sm:$0xff]  }
 0x26a   :  { %2713 = vmatprep.subr.bf16.mxu0 %v3866_v15  ;;  %2795 = vmatprep.subr.bf16.mxu1 %v3869_v46  ;;  %v3940_v15 = vld [vmem:[#allocation8 + $0x2f0] ss:$28 sps:$4 sm:$0xff]   ;;  %v3937_v46 = vld [vmem:[#allocation8 + $0x128] ss:$28 sps:$4 sm:$0xff]  }
 0x26d   :  { %2714 = vmatpush1.bf16.msra.mxu0 %v3864_v47  ;;  %2796 = vmatpush1.bf16.msra.mxu1 %v3867_v48  ;;  %v3941_v47 = vld [vmem:[#allocation8 + $0x130] ss:$28 sps:$4 sm:$0xff]   ;;  %v3944_v48 = vld [vmem:[#allocation8 + $0x164] ss:$28 sps:$4 sm:$0xff]  }
 0x26e   :  { %2715 = vmatprep.subr.bf16.mxu0 %v3872_v49  ;;  %2797 = vmatprep.subr.bf16.mxu1 %v3875_v35  ;;  %v3945_v49 = vld [vmem:[#allocation8 + $0x328] ss:$28 sps:$4 sm:$0xff]   ;;  %v3942_v35 = vld [vmem:[#allocation8 + $0x160] ss:$28 sps:$4 sm:$0xff]  }
 0x271   :  { %2716 = vmatpush1.bf16.msra.mxu0 %v3870_v50  ;;  %2798 = vmatpush1.bf16.msra.mxu1 %v3873_v51  ;;  %v3946_v50 = vld [vmem:[#allocation8 + $0x168] ss:$28 sps:$4 sm:$0xff]   ;;  %v3949_v51 = vld [vmem:[#allocation8 + $0x19c] ss:$28 sps:$4 sm:$0xff]  }
 0x272   :  { %2717 = vmatprep.subr.bf16.mxu0 %v3878_v53  ;;  %2799 = vmatprep.subr.bf16.mxu1 %v3881_v54  ;;  %v3950_v53 = vld [vmem:[#allocation8 + $0x360] ss:$28 sps:$4 sm:$0xff]   ;;  %v3947_v54 = vld [vmem:[#allocation8 + $0x198] ss:$28 sps:$4 sm:$0xff]  }
 0x275   :  { %2718 = vmatpush1.bf16.msra.mxu0 %v3876_v55  ;;  %2800 = vmatpush1.bf16.msra.mxu1 %v3879_v56  ;;  %v3951_v55 = vld [vmem:[#allocation8 + $0x1a0] ss:$28 sps:$4 sm:$0xff]   ;;  %v3954_v56 = vld [vmem:[#allocation8 + $0x1d4] ss:$28 sps:$4 sm:$0xff]  }
 0x276   :  { %2719 = vmatprep.subr.bf16.mxu0 %v3884_v58  ;;  %2801 = vmatprep.subr.bf16.mxu1 %v3887_v59  ;;  %v3955_v58 = vld [vmem:[#allocation8 + $0x558] ss:$28 sps:$4 sm:$0xff]   ;;  %v3952_v59 = vld [vmem:[#allocation8 + $0x1d0] ss:$28 sps:$4 sm:$0xff]  }
 0x279   :  { %2720 = vmatpush1.bf16.msra.mxu0 %v3882_v60  ;;  %2802 = vmatpush1.bf16.msra.mxu1 %v3885_v61  ;;  %v3956_v60 = vld [vmem:[#allocation8 + $0x398] ss:$28 sps:$4 sm:$0xff]   ;;  %v3959_v61 = vld [vmem:[#allocation8 + $0x20c] ss:$28 sps:$4 sm:$0xff]  }
 0x27a   :  { %2721 = vmatprep.subr.bf16.mxu0 %v3890_v62  ;;  %2803 = vmatprep.subr.bf16.mxu1 %v3893_v63  ;;  %v3960_v62 = vld [vmem:[#allocation8 + $0x590] ss:$28 sps:$4 sm:$0xff]   ;;  %v3957_v63 = vld [vmem:[#allocation8 + $0x208] ss:$28 sps:$4 sm:$0xff]  }
 0x27d   :  { %2722 = vmatpush1.bf16.msra.mxu0 %v3888_v0  ;;  %2804 = vmatpush1.bf16.msra.mxu1 %v3891_v1  ;;  %v3961_v0 = vld [vmem:[#allocation8 + $0x3d0] ss:$28 sps:$4 sm:$0xff]   ;;  %v3964_v1 = vld [vmem:[#allocation8 + $0x244] ss:$28 sps:$4 sm:$0xff]  }
 0x27e   :  { %2723 = vmatprep.subr.bf16.mxu0 %v3896_v2  ;;  %2805 = vmatprep.subr.bf16.mxu1 %v3899_v3  ;;  %v3965_v2 = vld [vmem:[#allocation8 + $0x5c8] ss:$28 sps:$4 sm:$0xff]   ;;  %v3962_v3 = vld [vmem:[#allocation8 + $0x240] ss:$28 sps:$4 sm:$0xff]  }
 0x281   :  { %2724 = vmatpush1.bf16.msra.mxu0 %v3894_v4  ;;  %2806 = vmatpush1.bf16.msra.mxu1 %v3897_v5  ;;  %v3966_v4 = vld [vmem:[#allocation8 + $0x408] ss:$28 sps:$4 sm:$0xff]   ;;  %v3969_v5 = vld [vmem:[#allocation8 + $0x27c] ss:$28 sps:$4 sm:$0xff]  }
 0x282   :  { %2725 = vmatprep.subr.bf16.mxu0 %v3902_v8  ;;  %2807 = vmatprep.subr.bf16.mxu1 %v3905_v10  ;;  %v3967_v8 = vld [vmem:[#allocation8 + $0x278] ss:$28 sps:$4 sm:$0xff]   ;;  %v3971_v10 = vld [vmem:[#allocation8 + $0x440] ss:$28 sps:$4 sm:$0xff]  }
 0x285   :  { %2726 = vmatpush1.bf16.msra.mxu0 %v3900_v11  ;;  %2808 = vmatpush1.bf16.msra.mxu1 %v3903_v17  ;;  %v3974_v11 = vld [vmem:[#allocation8 + $0x2b4] ss:$28 sps:$4 sm:$0xff]  }
 0x286   :  { %2727 = vmatprep.subr.bf16.mxu0 %v3908_v19  ;;  %2809 = vmatprep.subr.bf16.mxu1 %v3911_v20  ;;  %v3975_v17 = vld [vmem:[#allocation8 + $0x638] ss:$28 sps:$4 sm:$0xff]   ;;  %v3979_v20 = vld [vmem:[#allocation8 + $0x2ec] ss:$28 sps:$4 sm:$0xff]  }
 0x287   :  { %v3976_v19 = vld [vmem:[#allocation8 + $0x478] ss:$28 sps:$4 sm:$0xff]  }
 0x289   :  { %2728 = vmatpush1.bf16.msra.mxu0 %v3906_v21  ;;  %2810 = vmatpush1.bf16.msra.mxu1 %v3909_v22  ;;  %v3980_v21 = vld [vmem:[#allocation8 + $0x670] ss:$28 sps:$4 sm:$0xff]   ;;  %v3977_v22 = vld [vmem:[#allocation8 + $0x2e8] ss:$28 sps:$4 sm:$0xff]  }
 0x28a   :  { %2820 = vmatprep.subr.bf16.mxu0 %v3914_v52  ;;  %3431 = vmatprep.subr.bf16.mxu1 %v3915_v25  ;;  %v3984_v52 = vld [vmem:[#allocation8 + $0x324] ss:$28 sps:$4 sm:$0xff]  }
 0x28b   :  { %v3985_v25 = vld [vmem:[#allocation8 + $0x6a8] ss:$28 sps:$4 sm:$0xff]  }
 0x28c   :  { %2730 = vmatmul.mubr.bf16.vlgmr.msra.gmra.mrb[4].mxu0 %v4380_v27  ;;  %2812 = vmatmul.mubr.bf16.vlgmr.msra.gmra.mrb[12].mxu1 %v4380_v27 }
 0x28d   :  { %2821 = vmatpush1.bf16.msra.mxu0 %v3912_v26  ;;  %2852 = vmatprep.mubr.bf16.mxu0 %v4365_v6  ;;  %v3982_v26 = vld [vmem:[#allocation8 + $0x320] ss:$28 sps:$4 sm:$0xff]  }
 0x28e   :  { %3432 = vmatpush3.bf16.msra.mxu1 %v3916_v57  ;;  %2934 = vmatprep.mubr.bf16.mxu1 %v4365_v6  ;;  %v3935_v6 = vld [vmem:[#allocation8 + $0x2b8] ss:$28 sps:$4 sm:$0xff]   ;;  %v3986_v57 = vld [vmem:[#allocation8 + $0x4e8] ss:$28 sps:$4 sm:$0xff]  }
 0x28f   :  { %2822 = vmatprep.subr.bf16.mxu0 %v3919_v28  ;;  %3433 = vmatprep.subr.bf16.mxu1 %v3920_v30  ;;  %v3989_v28 = vld [vmem:[#allocation8 + $0x35c] ss:$28 sps:$4 sm:$0xff]  }
 0x290   :  { %v3990_v30 = vld [vmem:[#allocation8 + $0x6e0] ss:$28 sps:$4 sm:$0xff]  }
 0x291   :  { %2823 = vmatpush1.bf16.msra.mxu0 %v3917_v31  ;;  %v3987_v31 = vld [vmem:[#allocation8 + $0x358] ss:$28 sps:$4 sm:$0xff]  }
 0x292   :  { %3434 = vmatpush3.bf16.msra.mxu1 %v3921_v32  ;;  %2824 = vmatprep.subr.bf16.mxu0 %v3924_v33  ;;  %v3991_v32 = vld [vmem:[#allocation8 + $0x520] ss:$28 sps:$4 sm:$0xff]   ;;  %v3994_v33 = vld [vmem:[#allocation8 + $0x394] ss:$28 sps:$4 sm:$0xff]  }
 0x293   :  { %3435 = vmatprep.subr.bf16.mxu1 %v3925_v34  ;;  %v3992_v34 = vld [vmem:[#allocation8 + $0x390] ss:$28 sps:$4 sm:$0xff]  }
 0x295   :  { %2825 = vmatpush1.bf16.msra.mxu0 %v3922_v36  ;;  %v3997_v36 = vld [vmem:[#allocation8 + $0x3cc] ss:$28 sps:$4 sm:$0xff]  }
 0x296   :  { %3436 = vmatpush3.bf16.msra.mxu1 %v3926_v37  ;;  %2826 = vmatprep.subr.bf16.mxu0 %v3929_v38  ;;  %v3995_v37 = vld [vmem:[#allocation8 + $0x3c8] ss:$28 sps:$4 sm:$0xff]  }
 0x297   :  { %3437 = vmatprep.subr.bf16.mxu1 %v3930_v39  ;;  %v4000_v38 = vld [vmem:[#allocation8 + $0x404] ss:$28 sps:$4 sm:$0xff]  }
 0x298   :  { %v3998_v39 = vld [vmem:[#allocation8 + $0x400] ss:$28 sps:$4 sm:$0xff]  }
 0x299   :  { %2827 = vmatpush1.bf16.msra.mxu0 %v3927_v40  ;;  %v4003_v40 = vld [vmem:[#allocation8 + $0x43c] ss:$28 sps:$4 sm:$0xff]  }
 0x29a   :  { %3438 = vmatpush3.bf16.msra.mxu1 %v3931_v41  ;;  %2828 = vmatprep.subr.bf16.mxu0 %v3934_v42  ;;  %v4001_v41 = vld [vmem:[#allocation8 + $0x438] ss:$28 sps:$4 sm:$0xff]  }
 0x29b   :  { %3439 = vmatprep.subr.bf16.mxu1 %v3935_v6  ;;  %v4006_v42 = vld [vmem:[#allocation8 + $0x474] ss:$28 sps:$4 sm:$0xff]  }
 0x29c   :  { %v4004_v6 = vld [vmem:[#allocation8 + $0x470] ss:$28 sps:$4 sm:$0xff]  }
 0x29d   :  { %2829 = vmatpush1.bf16.msra.mxu0 %v3932_v43  ;;  %v4007_v43 = vld [vmem:[#allocation8 + $0x4a8] ss:$28 sps:$4 sm:$0xff]  }
 0x29e   :  { %3440 = vmatpush3.bf16.msra.mxu1 %v3936_v44  ;;  %2830 = vmatprep.subr.bf16.mxu0 %v3939_v45  ;;  %v4012_v44 = vld [vmem:[#allocation8 + $0x4e4] ss:$28 sps:$4 sm:$0xff]   ;;  %v4015_v45 = vld [vmem:[#allocation8 + $0x51c] ss:$28 sps:$4 sm:$0xff]  }
 0x29f   :  { %3441 = vmatprep.subr.bf16.mxu1 %v3940_v15  ;;  %v4013_v15 = vld [vmem:[#allocation8 + $0x518] ss:$28 sps:$4 sm:$0xff]  }
 0x2a1   :  { %2831 = vmatpush1.bf16.msra.mxu0 %v3937_v46  ;;  %v4018_v46 = vld [vmem:[#allocation8 + $0x554] ss:$28 sps:$4 sm:$0xff]  }
 0x2a2   :  { %3442 = vmatpush3.bf16.msra.mxu1 %v3941_v47  ;;  %2832 = vmatprep.subr.bf16.mxu0 %v3944_v48  ;;  %v4016_v47 = vld [vmem:[#allocation8 + $0x550] ss:$28 sps:$4 sm:$0xff]  }
 0x2a3   :  { %3443 = vmatprep.subr.bf16.mxu1 %v3945_v49  ;;  %v4021_v48 = vld [vmem:[#allocation8 + $0x58c] ss:$28 sps:$4 sm:$0xff]  }
 0x2a4   :  { %v4019_v49 = vld [vmem:[#allocation8 + $0x588] ss:$28 sps:$4 sm:$0xff]  }
 0x2a5   :  { %2833 = vmatpush1.bf16.msra.mxu0 %v3942_v35  ;;  %v4024_v35 = vld [vmem:[#allocation8 + $0x5c4] ss:$28 sps:$4 sm:$0xff]  }
 0x2a6   :  { %3444 = vmatpush3.bf16.msra.mxu1 %v3946_v50  ;;  %2834 = vmatprep.subr.bf16.mxu0 %v3949_v51  ;;  %v4022_v50 = vld [vmem:[#allocation8 + $0x5c0] ss:$28 sps:$4 sm:$0xff]  }
 0x2a7   :  { %3445 = vmatprep.subr.bf16.mxu1 %v3950_v53  ;;  %v4027_v51 = vld [vmem:[#allocation8 + $0x5fc] ss:$28 sps:$4 sm:$0xff]  }
 0x2a8   :  { %v4025_v53 = vld [vmem:[#allocation8 + $0x5f8] ss:$28 sps:$4 sm:$0xff]  }
 0x2a9   :  { %2835 = vmatpush1.bf16.msra.mxu0 %v3947_v54  ;;  %v4030_v54 = vld [vmem:[#allocation8 + $0x634] ss:$28 sps:$4 sm:$0xff]  }
 0x2aa   :  { %3446 = vmatpush3.bf16.msra.mxu1 %v3951_v55  ;;  %2836 = vmatprep.subr.bf16.mxu0 %v3954_v56  ;;  %v4028_v55 = vld [vmem:[#allocation8 + $0x630] ss:$28 sps:$4 sm:$0xff]  }
 0x2ab   :  { %3453 = vmatprep.subr.bf16.mxu1 %v3955_v58  ;;  %v4033_v56 = vld [vmem:[#allocation8 + $0x66c] ss:$28 sps:$4 sm:$0xff]  }
 0x2ac   :  { %v4031_v58 = vld [vmem:[#allocation8 + $0x668] ss:$28 sps:$4 sm:$0xff]  }
 0x2ad   :  { %2935 = vmatmul.mubr.bf16.vlgmr.msra.gmra.mrb[16].mxu1 %v4367_v9  ;;  %2837 = vmatpush1.bf16.msra.mxu0 %v3952_v59  ;;  %v4036_v59 = vld [vmem:[#allocation8 + $0x6a4] ss:$28 sps:$4 sm:$0xff]  }
 0x2ae   :  { %3454 = vmatpush3.bf16.msra.mxu1 %v3956_v60  ;;  %2974 = vmatprep.mubr.bf16.mxu1 %v4371_v12  ;;  %v4034_v60 = vld [vmem:[#allocation8 + $0x6a0] ss:$28 sps:$4 sm:$0xff]  }
 0x2af   :  { %2838 = vmatprep.subr.bf16.mxu0 %v3959_v61  ;;  %3455 = vmatprep.subr.bf16.mxu1 %v3960_v62  ;;  %v4039_v61 = vld [vmem:[#allocation8 + $0x6dc] ss:$28 sps:$4 sm:$0xff]  }
 0x2b0   :  { %v4037_v62 = vld [vmem:[#allocation8 + $0x6d8] ss:$28 sps:$4 sm:$0xff]  }
 0x2b1   :  { %2839 = vmatpush1.bf16.msra.mxu0 %v3957_v63  ;;  %v4395_v63 = vld [vmem:[%s4441_s6] sm:$0xff]  ;;  %s4219_s6 = smov [#allocation10]  }
 0x2b2   :  { %3456 = vmatpush3.bf16.msra.mxu1 %v3961_v0  ;;  %2840 = vmatprep.subr.bf16.mxu0 %v3964_v1  ;;  %v1472_v0 = vrot.slane %v4395_v63, %v4325_v14  ;;  %v1480_v1 = vrot.slane %v4395_v63, %v4347_v29  ;;  %s3044_s12 = sshll.u32 %s4219_s6, 4  ;;  %s3045_s12 = int_to_ptr.vmem [resolvable:$true] %s3044_s12 }
 0x2b3   :  { %3457 = vmatprep.subr.bf16.mxu1 %v3965_v2  ;;  %v1476_v2 = vrot.slane %v4395_v63, %v4333_v16  ;;  %s4156_s13 = scalar_lea.vmem %s3045_s12, 896  ;;  %p4161_p5 = scmp.lt.s32.totalorder %s3045_s12, %s3045_s12 }
 0x2b4   :  { %p4157_p4 = scmp.ne.s32.totalorder %s3045_s12, %s4156_s13  ;;  %p4162_p6 = scmp.lt.s32.totalorder %s4156_s13, %s4156_s13 }
 0x2b5   :  { %2841 = vmatpush1.bf16.msra.mxu0 %v3962_v3  ;;  %v1484_v3 = vrot.slane %v4395_v63, %v4340_v24 }
 0x2b6   :  { %3458 = vmatpush3.bf16.msra.mxu1 %v3966_v4  ;;  %2842 = vmatprep.subr.bf16.mxu0 %v3969_v5  ;;  %p4163_p7 = por %p4162_p6, %p4161_p5 }
 0x2b7   :  { %3459 = vmatprep.subr.bf16.mxu1 %v3970_v7 }
 0x2b8   :  { %p4164_p8 = pnand %p4163_p7, %p4157_p4 }
 0x2b9   :  { %2843 = vmatpush1.bf16.msra.mxu0 %v3967_v8 }
 0x2ba   :  { %3460 = vmatpush3.bf16.msra.mxu1 %v3971_v10  ;;  %2844 = vmatprep.subr.bf16.mxu0 %v3974_v11 }
 0x2bb   :  { %3461 = vmatprep.subr.bf16.mxu1 %v3975_v17 }
 0x2bd   :  { %2845 = vmatpush1.bf16.msra.mxu0 %v3972_v18 }
 0x2be   :  { %3462 = vmatpush3.bf16.msra.mxu1 %v3976_v19  ;;  %2846 = vmatprep.subr.bf16.mxu0 %v3979_v20 }
 0x2bf   :  { %3463 = vmatprep.subr.bf16.mxu1 %v3980_v21 }
 0x2c1   :  { %2847 = vmatpush1.bf16.msra.mxu0 %v3977_v22 }
 0x2c2   :  { %3464 = vmatpush3.bf16.msra.mxu1 %v3981_v23  ;;  %2848 = vmatprep.subr.bf16.mxu0 %v3984_v52 }
 0x2c3   :  { %3465 = vmatprep.subr.bf16.mxu1 %v3985_v25 }
 0x2c5   :  { %2849 = vmatpush1.bf16.msra.mxu0 %v3982_v26 }
 0x2c6   :  { %3466 = vmatpush3.bf16.msra.mxu1 %v3986_v57  ;;  %2850 = vmatprep.subr.bf16.mxu0 %v3989_v28 }
 0x2c7   :  { %3467 = vmatprep.subr.bf16.mxu1 %v3990_v30 }
 0x2c9   :  { %2851 = vmatpush1.bf16.msra.mxu0 %v3987_v31 }
 0x2ca   :  { %3468 = vmatpush3.bf16.msra.mxu1 %v3991_v32  ;;  %2861 = vmatprep.subr.bf16.mxu0 %v3994_v33 }
 0x2cc   :  { %2853 = vmatmul.mubr.bf16.vlgmr.msra.gmra.mrb[8].mxu0 %v4367_v9  ;;  %v4009_v9 = vld [vmem:[#allocation8 + $0x4ac] ss:$28 sps:$4 sm:$0xff]  }
 0x2cd   :  { %2975 = vmatmul.mubr.bf16.vlgmr.msra.gmra.mrb[20].mxu1 %v4380_v27  ;;  %2862 = vmatpush1.bf16.msra.mxu0 %v3992_v34 }
 0x2ce   :  { %2893 = vmatprep.mubr.bf16.mxu0 %v4371_v12  ;;  %2863 = vmatprep.subr.bf16.mxu0 %v3997_v36  ;;  %v4010_v12 = vld [vmem:[#allocation8 + $0x4e0] ss:$28 sps:$4 sm:$0xff]  }
 0x2d1   :  { %2864 = vmatpush1.bf16.msra.mxu0 %v3995_v37 }
 0x2d2   :  { %2865 = vmatprep.subr.bf16.mxu0 %v4000_v38 }
 0x2d5   :  { %2866 = vmatpush1.bf16.msra.mxu0 %v3998_v39 }
 0x2d6   :  { %2867 = vmatprep.subr.bf16.mxu0 %v4003_v40 }
 0x2d9   :  { %2868 = vmatpush1.bf16.msra.mxu0 %v4001_v41 }
 0x2da   :  { %2869 = vmatprep.subr.bf16.mxu0 %v4006_v42 }
 0x2dd   :  { %2870 = vmatpush1.bf16.msra.mxu0 %v4004_v6 }
 0x2de   :  { %2871 = vmatprep.subr.bf16.mxu0 %v4009_v9 }
 0x2e1   :  { %2872 = vmatpush1.bf16.msra.mxu0 %v4007_v43  ;;  %v1495_v43 = vsub.s32 6, %v4322_v13 }
 0x2e2   :  { %2873 = vmatprep.subr.bf16.mxu0 %v4012_v44 }
 0x2e3   :  { %v1496_v44 = vrot.slane %v4395_v63, %v1495_v43 }
 0x2e5   :  { %2874 = vmatpush1.bf16.msra.mxu0 %v4010_v12 }
 0x2e6   :  { %2875 = vmatprep.subr.bf16.mxu0 %v4015_v45 }
 0x2e9   :  { %2876 = vmatpush1.bf16.msra.mxu0 %v4013_v15 }
 0x2ea   :  { %2877 = vmatprep.subr.bf16.mxu0 %v4018_v46 }
 0x2ed   :  { %2878 = vmatpush1.bf16.msra.mxu0 %v4016_v47 }
 0x2ee   :  { %2879 = vmatprep.subr.bf16.mxu0 %v4021_v48 }
 0x2f1   :  { %2880 = vmatpush1.bf16.msra.mxu0 %v4019_v49 }
 0x2f2   :  { %2881 = vmatprep.subr.bf16.mxu0 %v4024_v35 }
 0x2f5   :  { %2882 = vmatpush1.bf16.msra.mxu0 %v4022_v50 }
 0x2f6   :  { %2883 = vmatprep.subr.bf16.mxu0 %v4027_v51 }
 0x2f9   :  { %2884 = vmatpush1.bf16.msra.mxu0 %v4025_v53 }
 0x2fa   :  { %2885 = vmatprep.subr.bf16.mxu0 %v4030_v54 }
 0x2fd   :  { %2886 = vmatpush1.bf16.msra.mxu0 %v4028_v55  ;;  %v1487_v55 = vsub.s32 4, %v4322_v13 }
 0x2fe   :  { %2887 = vmatprep.subr.bf16.mxu0 %v4033_v56  ;;  %v1491_v56 = vsub.s32 5, %v4322_v13 }
 0x301   :  { %2888 = vmatpush1.bf16.msra.mxu0 %v4031_v58  ;;  %v1488_v58 = vrot.slane %v4395_v63, %v1487_v55 }
 0x302   :  { %2889 = vmatprep.subr.bf16.mxu0 %v4036_v59  ;;  %v1492_v59 = vrot.slane %v4395_v63, %v1491_v56 }
 0x305   :  { %2890 = vmatpush1.bf16.msra.mxu0 %v4034_v60 }
 0x306   :  { %2891 = vmatprep.subr.bf16.mxu0 %v4039_v61 }
 0x309   :  { %2892 = vmatpush1.bf16.msra.mxu0 %v4037_v62 }
 0x30c   :  { %2894 = vmatmul.mubr.bf16.vlgmr.msra.gmra.mrb[8].mxu0 %v4380_v27 }
 0x35f   :  { %v2731_v4 = vpop.f32.mrb[4].mxu0  ;;  %v2813_v5 = vpop.f32.mrb[12].mxu1 }
 0x360   :  { %v3479_v27 = vadd.f32 %v2731_v4, %v1472_v0  ;;  %v3481_v7 = vadd.f32 %v2813_v5, %v1480_v1  ;;  %v2733_v8 = vpop.f32.mrb[5].mxu0  ;;  %v2815_v10 = vpop.f32.mrb[13].mxu1 }
 0x361   :  { %v3480_v11 = vadd.f32 %v2733_v8, %v1476_v2  ;;  %v3482_v17 = vadd.f32 %v2815_v10, %v1484_v3  ;;  %v2735_v18 = vpop.f32.mrb[6].mxu0  ;;  %v2817_v19 = vpop.f32.mrb[14].mxu1 }
 0x362   :  { %2982 = vst [vmem:[#allocation10] sm:$0xff] %v3479_v27  ;;  %v2989_v14 = vsub.f32 0.0, %v3479_v27  ;;  %2984 = vst [vmem:[#allocation10 + $0x10] sm:$0xff] %v3481_v7  ;;  %v2991_v29 = vsub.f32 0.0, %v3481_v7  ;;  %v2736_v20 = vpop.f32.mrb[7].mxu0  ;;  %v2818_v21 = vpop.f32.mrb[15].mxu1 }
 0x363   :  { %2983 = vst [vmem:[#allocation10 + $0x8] sm:$0xff] %v3480_v11  ;;  %v2990_v16 = vsub.f32 0.0, %v3480_v11  ;;  %2985 = vst [vmem:[#allocation10 + $0x18] sm:$0xff] %v3482_v17  ;;  %v2992_v24 = vsub.f32 0.0, %v3482_v17 }
 0x364   :  { %v2996_v22 = vmul.f32 1.442695, %v2989_v14  ;;  %v3000_v23 = vmul.f32 1.442695, %v2991_v29 }
 0x365   :  { %v2998_v52 = vmul.f32 1.442695, %v2990_v16  ;;  %v3002_v25 = vmul.f32 1.442695, %v2992_v24 }
 0x366   :  { %4040 = vpow2.f32 %v2996_v22 }
 0x367   :  { %4042 = vpow2.f32 %v3000_v23 }
 0x368   :  { %4044 = vpow2.f32 %v2998_v52 }
 0x369   :  { %4046 = vpow2.f32 %v3002_v25 }
 0x370   :  { %v4041_v26 = vpop.eup %4040 }
 0x371   :  { %v4043_v57 = vpop.eup %4042  ;;  %v3010_v28 = vadd.f32 1.0, %v4041_v26 }
 0x372   :  { %v4045_v30 = vpop.eup %4044  ;;  %v3012_v31 = vadd.f32 1.0, %v4043_v57 }
 0x373   :  { %v4047_v32 = vpop.eup %4046  ;;  %4048 = vrcp.f32 %v3010_v28  ;;  %v3011_v33 = vadd.f32 1.0, %v4045_v30 }
 0x374   :  { %4050 = vrcp.f32 %v3012_v31  ;;  %v3013_v34 = vadd.f32 1.0, %v4047_v32 }
 0x375   :  { %4052 = vrcp.f32 %v3011_v33 }
 0x376   :  { %4054 = vrcp.f32 %v3013_v34 }
 0x37d   :  { %v4049_v36 = vpop.eup %4048 }
 0x37e   :  { %v4051_v37 = vpop.eup %4050  ;;  %3031 = vst [vmem:[#allocation11] sm:$0xff] %v4049_v36 }
 0x37f   :  { %v4053_v38 = vpop.eup %4052  ;;  %3033 = vst [vmem:[#allocation11 + $0x10] sm:$0xff] %v4051_v37 }
 0x380   :  { %v4055_v39 = vpop.eup %4054  ;;  %3032 = vst [vmem:[#allocation11 + $0x8] sm:$0xff] %v4053_v38  ;;  %v3447_v40 = vpop.f32.mrb[16].mxu1 }
 0x381   :  { %3034 = vst [vmem:[#allocation11 + $0x18] sm:$0xff] %v4055_v39  ;;  %v3448_v41 = vpop.f32.mrb[17].mxu1 }
 0x382   :  { %v3449_v42 = vadd.f32 %v3448_v41, %v3447_v40  ;;  %v3450_v6 = vpop.f32.mrb[18].mxu1 }
 0x383   :  { %v3451_v9 = vpop.f32.mrb[19].mxu1 }
 0x384   :  { %v2937_v15 = vadd.f32 %v3449_v42, %v1496_v44 }
 0x3a0   :  { %v3469_v12 = vpop.f32.mrb[20].mxu1 }
 0x3a1   :  { %v3470_v45 = vpop.f32.mrb[21].mxu1 }
 0x3a2   :  { %v3471_v46 = vadd.f32 %v3470_v45, %v3469_v12  ;;  %v3472_v47 = vpop.f32.mrb[22].mxu1 }
 0x3a3   :  { %v3473_v48 = vpop.f32.mrb[23].mxu1 }
 0x3a4   :  { %v2977_v49 = vadd.f32 %v3471_v46, %v2937_v15 }
 0x3a6   :  { %2988 = vst [vmem:[#allocation10 + $0x30] sm:$0xff] %v2977_v49  ;;  %v2995_v35 = vsub.f32 0.0, %v2977_v49 }
 0x3a8   :  { %v3008_v50 = vmul.f32 1.442695, %v2995_v35 }
 0x3aa   :  { %4056 = vpow2.f32 %v3008_v50 }
 0x3b4   :  { %v4057_v51 = vpop.eup %4056 }
 0x3b5   :  { %v3016_v53 = vadd.f32 1.0, %v4057_v51 }
 0x3b7   :  { %4058 = vrcp.f32 %v3016_v53 }
 0x3c1   :  { %v4059_v54 = vpop.eup %4058 }
 0x3c2   :  { %3037 = vst [vmem:[#allocation11 + $0x30] sm:$0xff] %v4059_v54 }
 0x3df   :  { %v2895_v60 = vpop.f32.mrb[8].mxu0 }
 0x3e0   :  { %v3483_v61 = vadd.f32 %v2895_v60, %v1488_v58  ;;  %v2897_v62 = vpop.f32.mrb[9].mxu0 }
 0x3e1   :  { %v3484_v0 = vadd.f32 %v2897_v62, %v1492_v59  ;;  %v2899_v1 = vpop.f32.mrb[10].mxu0 }
 0x3e2   :  { %2986 = vst [vmem:[#allocation10 + $0x20] sm:$0xff] %v3483_v61  ;;  %v2993_v2 = vsub.f32 0.0, %v3483_v61  ;;  %v2900_v3 = vpop.f32.mrb[11].mxu0 }
 0x3e3   :  { %2987 = vst [vmem:[#allocation10 + $0x28] sm:$0xff] %v3484_v0  ;;  %v2994_v4 = vsub.f32 0.0, %v3484_v0 }
 0x3e4   :  { %v3004_v5 = vmul.f32 1.442695, %v2993_v2 }
 0x3e5   :  { %4167 = shalt.err (!%p4164_p8)
}
 0x3e6   :  { %s4168_s18 = scalar_lea.hbm %s4442_s7, 896 }
 0x3e7   :  { %p4169_p9 = scmp.ne.s32.totalorder %s4442_s7, %s4168_s18  ;;  %p4172_p10 = scmp.lt.u32.totalorder %s4168_s18, %s4442_s7 }
 0x3e9   :  { %p4174_p11 = pnand %p4172_p10, %p4169_p9 }
 0x3eb   :  { %4177 = shalt.err (!%p4174_p11)
}
 0x3ec   :  { %3047 = dma.vmem_to_hbm [thread:$0]  %s3045_s12, 896, %s4442_s7, [#allocation4]   ;;  %v3006_v13 = vmul.f32 1.442695, %v2994_v4  ;;  %4060 = vpow2.f32 %v3004_v5 }
 0x3ed   :  { %s4220_s25 = smov [#allocation11]  }
 0x3ee   :  { %4062 = vpow2.f32 %v3006_v13  ;;  %s3054_s26 = sshll.u32 %s4220_s25, 4  ;;  %s3055_s26 = int_to_ptr.vmem [resolvable:$true] %s3054_s26 }
 0x3ef   :  { %s4178_s27 = scalar_lea.vmem %s3055_s26, 896  ;;  %p4183_p13 = scmp.lt.s32.totalorder %s3055_s26, %s3055_s26 }
 0x3f0   :  { %p4179_p12 = scmp.ne.s32.totalorder %s3055_s26, %s4178_s27  ;;  %p4184_p0 = scmp.lt.s32.totalorder %s4178_s27, %s4178_s27 }
 0x3f2   :  { %p4185_p1 = por %p4184_p0, %p4183_p13 }
 0x3f4   :  { %p4186_p2 = pnand %p4185_p1, %p4179_p12 }
 0x3f6   :  { %v4061_v63 = vpop.eup %4060 }
 0x3f7   :  { %v3014_v7 = vadd.f32 1.0, %v4061_v63 }
 0x3f8   :  { %v4063_v27 = vpop.eup %4062 }
 0x3f9   :  { %v3015_v8 = vadd.f32 1.0, %v4063_v27  ;;  %4064 = vrcp.f32 %v3014_v7 }
 0x3fb   :  { %4066 = vrcp.f32 %v3015_v8 }
 0x403   :  { %v4065_v10 = vpop.eup %4064 }
 0x404   :  { %3035 = vst [vmem:[#allocation11 + $0x20] sm:$0xff] %v4065_v10 }
 0x405   :  { %v4067_v11 = vpop.eup %4066 }
 0x406   :  { %3036 = vst [vmem:[#allocation11 + $0x28] sm:$0xff] %v4067_v11 }
 0x407   :  { %4189 = shalt.err (!%p4186_p2)
}
 0x408   :  { %s4190_s30 = scalar_lea.hbm %s4443_s8, 896 }
 0x409   :  { %p4191_p3 = scmp.ne.s32.totalorder %s4443_s8, %s4190_s30  ;;  %p4194_p4 = scmp.lt.u32.totalorder %s4190_s30, %s4443_s8 }
 0x40b   :  { %p4196_p5 = pnand %p4194_p4, %p4191_p3 }
 0x40d   :  { %4199 = shalt.err (!%p4196_p5)
}
 0x40e   :  { %3057 = dma.vmem_to_hbm [thread:$0]  %s3055_s26, 896, %s4443_s8, [#allocation12]  }
 0x40f   :  { %4206 = dma.done.wait [#allocation4], 896  }
 0x410   :  { %4207 = vsyncadd [#allocation4], 4294966400 }
 0x411   :  { %4208 = dma.done.wait [#allocation12], 896  }
 0x412   :  { %4209 = vsyncadd [#allocation12], 4294966400 }
 0x413   :  { %3064 = vsyncpa [#allocation3], 1 }
 0x414   :  { %3065 = vsyncpa [#allocation6], 1 }
 0x415   :  { %3066 = vsyncpa [#allocation9], 1 }
 0x416   :  { %3067 = vsyncpa [#allocation4], 1 }
 0x417   :  { %3068 = vsyncpa [#allocation12], 1 }

</bundles_post_ra>
